<compile_context>
chip_gen: v5e
topology: v5e:2x2
jax: 0.10.0
libtpu: 0.0.40
codegen_flags: <defaults>
</compile_context>

<pallas_src>
import functools

import jax
import jax.numpy as jnp
from jax.experimental import pallas as pl
from jax.experimental.pallas import tpu as pltpu


def _fused_diffusion_kernel(x_ref, emb_ref, w1_ref, b1_ref, w2_ref, b2_ref,
                            o_ref, xpad_ref, h1pad_ref):
    """Fused forward for one batch element.

    x_ref   : (1, H, W, Cx)            NHWC input tile
    emb_ref : (1, 1, Cl)               label embedding row
    w1_ref  : (3, 3*Cin1, Cmid)        conv1 weights, [dw, dh*Cin1+c, o]
    b1_ref  : (1, Cmid)
    w2_ref  : (3, Cout, 3*Cmid)        conv2 weights, [dw, o, dh*Cmid+c]
    b2_ref  : (Cout, 1)
    o_ref   : (1, Cout, H*W)           lane-dense output
    xpad_ref: (H+2, W+2, Cin1)  VMEM scratch (padded conv1 input)
    h1pad_ref:(H+2, W+2, Cmid)  VMEM scratch (padded conv1 output)
    """
    _, H, W, Cx = x_ref.shape
    Cl = emb_ref.shape[2]
    Cin1 = Cx + Cl
    Cmid = h1pad_ref.shape[2]
    Cout = o_ref.shape[1]

    # ---- build padded conv1 input: concat([x, broadcast(label emb)]) ----
    xpad_ref[...] = jnp.zeros_like(xpad_ref)
    lab = jnp.broadcast_to(emb_ref[0].reshape(1, 1, Cl), (H, W, Cl))
    xpad_ref[1:H + 1, 1:W + 1, :] = jnp.concatenate([x_ref[0], lab], axis=-1)

    # ---- conv1 (3x3 same) + bias + ReLU; row taps folded -> 3 matmuls, K=3*Cin1 ----
    acc1 = None
    for dw in range(3):
        op = jnp.concatenate(
            [xpad_ref[dh:dh + H, dw:dw + W, :] for dh in range(3)], axis=-1
        ).reshape(H * W, 3 * Cin1)
        part = jnp.dot(op, w1_ref[dw], preferred_element_type=jnp.float32)
        acc1 = part if acc1 is None else acc1 + part
    h1 = jnp.maximum(acc1 + b1_ref[...], 0.0)                     # (H*W, Cmid)

    # ---- stage h1 with zero "same" border in VMEM (no HBM round trip) ----
    h1pad_ref[...] = jnp.zeros_like(h1pad_ref)
    h1pad_ref[1:H + 1, 1:W + 1, :] = h1.reshape(H, W, Cmid)

    # ---- conv2 (3x3 same); accumulate directly in lane-dense (Cout, H*W) ----
    acc2 = None
    for dw in range(3):
        op = jnp.concatenate(
            [h1pad_ref[dh:dh + H, dw:dw + W, :] for dh in range(3)], axis=-1
        ).reshape(H * W, 3 * Cmid)
        # (Cout, 3*Cmid) . (H*W, 3*Cmid)^T  ->  (Cout, H*W)
        part = jax.lax.dot_general(
            w2_ref[dw], op,
            dimension_numbers=(((1,), (1,)), ((), ())),
            preferred_element_type=jnp.float32)
        acc2 = part if acc2 is None else acc2 + part
    o_ref[0] = (acc2 + b2_ref[...]).astype(o_ref.dtype)


def conditional_diffusion_forward(params, x_nchw, t, labels, *, latent_dim):
    """Matches ConditionalDiffusionModel.forward (t is unused, as in PyTorch)."""
    del t
    B, Cx, H, W = x_nchw.shape
    w1, b1, w2, b2 = params["w1"], params["b1"], params["w2"], params["b2"]
    Cin1 = Cx + latent_dim
    Cmid = w1.shape[-1]
    Cout = w2.shape[-1]

    # Layout glue (tiny, outside the kernel).
    emb = params["embedding"][labels].reshape(B, 1, latent_dim)          # gather
    x_nhwc = jnp.transpose(x_nchw, (0, 2, 3, 1)).astype(jnp.float32)     # NCHW->NHWC
    # Weight re-layout for tap-folded matmuls.
    w1f = jnp.transpose(w1, (1, 0, 2, 3)).reshape(3, 3 * Cin1, Cmid)     # [dw, dh*Cin1+c, o]
    w2t = jnp.transpose(w2, (1, 3, 0, 2)).reshape(3, Cout, 3 * Cmid)     # [dw, o, dh*Cmid+c]
    b1r = b1.reshape(1, Cmid)
    b2r = b2.reshape(Cout, 1)

    out = pl.pallas_call(
        _fused_diffusion_kernel,
        out_shape=jax.ShapeDtypeStruct((B, Cout, H * W), jnp.float32),
        grid=(B,),
        in_specs=[
            pl.BlockSpec((1, H, W, Cx), lambda b: (b, 0, 0, 0)),
            pl.BlockSpec((1, 1, latent_dim), lambda b: (b, 0, 0)),
            pl.BlockSpec((3, 3 * Cin1, Cmid), lambda b: (0, 0, 0)),
            pl.BlockSpec((1, Cmid), lambda b: (0, 0)),
            pl.BlockSpec((3, Cout, 3 * Cmid), lambda b: (0, 0, 0)),
            pl.BlockSpec((Cout, 1), lambda b: (0, 0)),
        ],
        out_specs=pl.BlockSpec((1, Cout, H * W), lambda b: (b, 0, 0)),
        scratch_shapes=[
            pltpu.VMEM((H + 2, W + 2, Cin1), jnp.float32),   # padded conv1 input
            pltpu.VMEM((H + 2, W + 2, Cmid), jnp.float32),   # padded h1
        ],
        # Batch axis is parallel so both TensorCores are used on v7x.
        compiler_params=pltpu.CompilerParams(dimension_semantics=("parallel",)),
    )(x_nhwc, emb, w1f, b1r, w2t, b2r)

    # Free reshape: (B, Cout, H*W) -> (B, Cout, H, W) NCHW.
    return out.reshape(B, Cout, H, W)


def _reference_forward(params, x_nchw, t, labels, *, latent_dim):
    """Pure-JAX reference (XLA convs) for correctness checking."""
    del t
    B, Cx, H, W = x_nchw.shape
    emb = params["embedding"][labels]
    x_nhwc = jnp.transpose(x_nchw, (0, 2, 3, 1))
    lab = jnp.broadcast_to(emb[:, None, None, :], (B, H, W, latent_dim))
    xc = jnp.concatenate([x_nhwc, lab], axis=-1)
    dn = ("NHWC", "HWIO", "NHWC")
    h1 = jax.lax.conv_general_dilated(xc, params["w1"], (1, 1), "SAME",
                                      dimension_numbers=dn) + params["b1"]
    h1 = jnp.maximum(h1, 0.0)
    o = jax.lax.conv_general_dilated(h1, params["w2"], (1, 1), "SAME",
                                     dimension_numbers=dn) + params["b2"]
    return jnp.transpose(o, (0, 3, 1, 2))


if __name__ == "__main__":
    timesteps, latent_dim, num_classes = 1000, 8, 4
    B, H, W = 2, 16, 16
    cin1 = latent_dim + num_classes  # conv1 input channels

    key = jax.random.PRNGKey(0)
    k_e, k_w1, k_b1, k_w2, k_b2, k_x, k_t, k_l = jax.random.split(key, 8)
    params = {
        "embedding": jax.random.normal(k_e, (num_classes, latent_dim), jnp.float32),
        "w1": 0.1 * jax.random.normal(k_w1, (3, 3, cin1, 64), jnp.float32),
        "b1": 0.1 * jax.random.normal(k_b1, (64,), jnp.float32),
        "w2": 0.1 * jax.random.normal(k_w2, (3, 3, 64, 3), jnp.float32),
        "b2": 0.1 * jax.random.normal(k_b2, (3,), jnp.float32),
    }

    # The PyTorch forward concatenates x with a latent_dim embedding and feeds
    # a (latent_dim + num_classes)-channel conv, so x must have num_classes
    # channels: x is (B, num_classes, H, W) in NCHW.
    x = jax.random.normal(k_x, (B, num_classes, H, W), jnp.float32)
    t = jax.random.randint(k_t, (B,), 0, timesteps)
    labels = jax.random.randint(k_l, (B,), 0, num_classes)

    fwd = jax.jit(functools.partial(conditional_diffusion_forward,
                                    latent_dim=latent_dim))
    out = jax.block_until_ready(fwd(params, x, t, labels))

    ref = _reference_forward(params, x, t, labels, latent_dim=latent_dim)
    assert out.shape == (B, 3, H, W), out.shape
    assert jnp.allclose(out, ref, atol=1e-4, rtol=1e-4), float(
        jnp.max(jnp.abs(out - ref)))
    print("KERNEL_OK")
</pallas_src>

<mosaic_0001>
module attributes {stable_mosaic.version = 11 : i64} {
  func.func @_fused_diffusion_kernel(%arg0: i32, %arg1: memref<1x16x16x4xf32, #tpu.memory_space<vmem>>, %arg2: memref<1x1x8xf32, #tpu.memory_space<vmem>>, %arg3: memref<3x36x64xf32, #tpu.memory_space<vmem>>, %arg4: memref<1x64xf32, #tpu.memory_space<vmem>>, %arg5: memref<3x3x192xf32, #tpu.memory_space<vmem>>, %arg6: memref<3x1xf32, #tpu.memory_space<vmem>>, %arg7: memref<1x3x256xf32, #tpu.memory_space<vmem>>, %arg8: memref<18x18x12xf32, #tpu.memory_space<vmem>>, %arg9: memref<18x18x64xf32, #tpu.memory_space<vmem>>) attributes {dimension_semantics = [#tpu.dimension_semantics<parallel>], iteration_bounds = array<i64: 2>, scalar_prefetch = 0 : i64, scratch_operands = 2 : i64, tpu.core_type = #tpu.core_type<tc>, window_params = [{transform_indices = @transform_0, window_bounds = array<i64: 1, 16, 16, 4>}, {transform_indices = @transform_1, window_bounds = array<i64: 1, 1, 8>}, {pipeline_mode = #tpu.pipeline_mode<synchronous>, transform_indices = @transform_2, window_bounds = array<i64: 3, 36, 64>}, {pipeline_mode = #tpu.pipeline_mode<synchronous>, transform_indices = @transform_3, window_bounds = array<i64: 1, 64>}, {pipeline_mode = #tpu.pipeline_mode<synchronous>, transform_indices = @transform_4, window_bounds = array<i64: 3, 3, 192>}, {pipeline_mode = #tpu.pipeline_mode<synchronous>, transform_indices = @transform_5, window_bounds = array<i64: 3, 1>}, {transform_indices = @transform_6, window_bounds = array<i64: 1, 3, 256>}]} {
    %cst = arith.constant 0.000000e+00 : f32
    %0 = vector.broadcast %cst : f32 to vector<18x18x12xf32>
    %c0 = arith.constant 0 : index
    %c0_0 = arith.constant 0 : index
    %c0_1 = arith.constant 0 : index
    %1 = vector.load %arg8[%c0, %c0_0, %c0_1] : memref<18x18x12xf32, #tpu.memory_space<vmem>>, vector<18x18x12xf32>
    tpu.vector_store %arg8[%c0, %c0_0, %c0_1], %0 {strides = array<i32>} : memref<18x18x12xf32, #tpu.memory_space<vmem>>, vector<18x18x12xf32>,
    %c0_2 = arith.constant 0 : index
    %c0_3 = arith.constant 0 : index
    %c0_4 = arith.constant 0 : index
    %2 = vector.load %arg2[%c0_2, %c0_3, %c0_4] : memref<1x1x8xf32, #tpu.memory_space<vmem>>, vector<1x1x8xf32>
    %3 = vector.shape_cast %2 : vector<1x1x8xf32> to vector<1x8xf32>
    %4 = vector.shape_cast %3 : vector<1x8xf32> to vector<1x1x8xf32>
    %5 = vector.shape_cast %4 : vector<1x1x8xf32> to vector<1x1x8xf32>
    %6 = vector.broadcast %5 : vector<1x1x8xf32> to vector<16x16x8xf32>
    %c0_5 = arith.constant 0 : index
    %c0_6 = arith.constant 0 : index
    %c0_7 = arith.constant 0 : index
    %c0_8 = arith.constant 0 : index
    %7 = vector.load %arg1[%c0_5, %c0_6, %c0_7, %c0_8] : memref<1x16x16x4xf32, #tpu.memory_space<vmem>>, vector<1x16x16x4xf32>
    %8 = vector.shape_cast %7 : vector<1x16x16x4xf32> to vector<16x16x4xf32>
    %9 = tpu.concatenate %8, %6 in 2 : vector<16x16x4xf32>, vector<16x16x8xf32> -> vector<16x16x12xf32>
    %c1 = arith.constant 1 : index
    %c1_9 = arith.constant 1 : index
    %c0_10 = arith.constant 0 : index
    %10 = vector.load %arg8[%c1, %c1_9, %c0_10] : memref<18x18x12xf32, #tpu.memory_space<vmem>>, vector<16x16x12xf32>
    tpu.vector_store %arg8[%c1, %c1_9, %c0_10], %9 {strides = array<i32>} : memref<18x18x12xf32, #tpu.memory_space<vmem>>, vector<16x16x12xf32>,
    %c0_11 = arith.constant 0 : index
    %c0_12 = arith.constant 0 : index
    %c0_13 = arith.constant 0 : index
    %11 = vector.load %arg8[%c0_11, %c0_12, %c0_13] : memref<18x18x12xf32, #tpu.memory_space<vmem>>, vector<16x16x12xf32>
    %c1_14 = arith.constant 1 : index
    %c0_15 = arith.constant 0 : index
    %c0_16 = arith.constant 0 : index
    %12 = vector.load %arg8[%c1_14, %c0_15, %c0_16] : memref<18x18x12xf32, #tpu.memory_space<vmem>>, vector<16x16x12xf32>
    %c2 = arith.constant 2 : index
    %c0_17 = arith.constant 0 : index
    %c0_18 = arith.constant 0 : index
    %13 = vector.load %arg8[%c2, %c0_17, %c0_18] : memref<18x18x12xf32, #tpu.memory_space<vmem>>, vector<16x16x12xf32>
    %14 = tpu.concatenate %11, %12, %13 in 2 : vector<16x16x12xf32>, vector<16x16x12xf32>, vector<16x16x12xf32> -> vector<16x16x36xf32>
    %15 = vector.shape_cast %14 : vector<16x16x36xf32> to vector<256x36xf32>
    %c0_19 = arith.constant 0 : index
    %c0_20 = arith.constant 0 : index
    %c0_21 = arith.constant 0 : index
    %16 = vector.load %arg3[%c0_19, %c0_20, %c0_21] : memref<3x36x64xf32, #tpu.memory_space<vmem>>, vector<1x36x64xf32>
    %17 = vector.shape_cast %16 : vector<1x36x64xf32> to vector<36x64xf32>
    %cst_22 = arith.constant dense<0.000000e+00> : vector<256x64xf32>
    %18 = tpu.matmul %15, %17, %cst_22 {dimension_numbers = #tpu.dot_dimension_numbers<[1], [0], [0], [1], [0, 0, 1, 1], [], []>} : vector<256x36xf32>, vector<36x64xf32>, vector<256x64xf32> -> vector<256x64xf32>
    %c0_23 = arith.constant 0 : index
    %c1_24 = arith.constant 1 : index
    %c0_25 = arith.constant 0 : index
    %19 = vector.load %arg8[%c0_23, %c1_24, %c0_25] : memref<18x18x12xf32, #tpu.memory_space<vmem>>, vector<16x16x12xf32>
    %c1_26 = arith.constant 1 : index
    %c1_27 = arith.constant 1 : index
    %c0_28 = arith.constant 0 : index
    %20 = vector.load %arg8[%c1_26, %c1_27, %c0_28] : memref<18x18x12xf32, #tpu.memory_space<vmem>>, vector<16x16x12xf32>
    %c2_29 = arith.constant 2 : index
    %c1_30 = arith.constant 1 : index
    %c0_31 = arith.constant 0 : index
    %21 = vector.load %arg8[%c2_29, %c1_30, %c0_31] : memref<18x18x12xf32, #tpu.memory_space<vmem>>, vector<16x16x12xf32>
    %22 = tpu.concatenate %19, %20, %21 in 2 : vector<16x16x12xf32>, vector<16x16x12xf32>, vector<16x16x12xf32> -> vector<16x16x36xf32>
    %23 = vector.shape_cast %22 : vector<16x16x36xf32> to vector<256x36xf32>
    %c1_32 = arith.constant 1 : index
    %c0_33 = arith.constant 0 : index
    %c0_34 = arith.constant 0 : index
    %24 = vector.load %arg3[%c1_32, %c0_33, %c0_34] : memref<3x36x64xf32, #tpu.memory_space<vmem>>, vector<1x36x64xf32>
    %25 = vector.shape_cast %24 : vector<1x36x64xf32> to vector<36x64xf32>
    %cst_35 = arith.constant dense<0.000000e+00> : vector<256x64xf32>
    %26 = tpu.matmul %23, %25, %cst_35 {dimension_numbers = #tpu.dot_dimension_numbers<[1], [0], [0], [1], [0, 0, 1, 1], [], []>} : vector<256x36xf32>, vector<36x64xf32>, vector<256x64xf32> -> vector<256x64xf32>
    %27 = arith.addf %18, %26 : vector<256x64xf32>
    %c0_36 = arith.constant 0 : index
    %c2_37 = arith.constant 2 : index
    %c0_38 = arith.constant 0 : index
    %28 = vector.load %arg8[%c0_36, %c2_37, %c0_38] : memref<18x18x12xf32, #tpu.memory_space<vmem>>, vector<16x16x12xf32>
    %c1_39 = arith.constant 1 : index
    %c2_40 = arith.constant 2 : index
    %c0_41 = arith.constant 0 : index
    %29 = vector.load %arg8[%c1_39, %c2_40, %c0_41] : memref<18x18x12xf32, #tpu.memory_space<vmem>>, vector<16x16x12xf32>
    %c2_42 = arith.constant 2 : index
    %c2_43 = arith.constant 2 : index
    %c0_44 = arith.constant 0 : index
    %30 = vector.load %arg8[%c2_42, %c2_43, %c0_44] : memref<18x18x12xf32, #tpu.memory_space<vmem>>, vector<16x16x12xf32>
    %31 = tpu.concatenate %28, %29, %30 in 2 : vector<16x16x12xf32>, vector<16x16x12xf32>, vector<16x16x12xf32> -> vector<16x16x36xf32>
    %32 = vector.shape_cast %31 : vector<16x16x36xf32> to vector<256x36xf32>
    %c2_45 = arith.constant 2 : index
    %c0_46 = arith.constant 0 : index
    %c0_47 = arith.constant 0 : index
    %33 = vector.load %arg3[%c2_45, %c0_46, %c0_47] : memref<3x36x64xf32, #tpu.memory_space<vmem>>, vector<1x36x64xf32>
    %34 = vector.shape_cast %33 : vector<1x36x64xf32> to vector<36x64xf32>
    %cst_48 = arith.constant dense<0.000000e+00> : vector<256x64xf32>
    %35 = tpu.matmul %32, %34, %cst_48 {dimension_numbers = #tpu.dot_dimension_numbers<[1], [0], [0], [1], [0, 0, 1, 1], [], []>} : vector<256x36xf32>, vector<36x64xf32>, vector<256x64xf32> -> vector<256x64xf32>
    %36 = arith.addf %27, %35 : vector<256x64xf32>
    %c0_49 = arith.constant 0 : index
    %c0_50 = arith.constant 0 : index
    %37 = vector.load %arg4[%c0_49, %c0_50] : memref<1x64xf32, #tpu.memory_space<vmem>>, vector<1x64xf32>
    %38 = vector.broadcast %37 : vector<1x64xf32> to vector<256x64xf32>
    %39 = arith.addf %36, %38 : vector<256x64xf32>
    %cst_51 = arith.constant 0.000000e+00 : f32
    %40 = vector.broadcast %cst_51 : f32 to vector<256x64xf32>
    %41 = arith.maximumf %39, %40 : vector<256x64xf32>
    %cst_52 = arith.constant 0.000000e+00 : f32
    %42 = vector.broadcast %cst_52 : f32 to vector<18x18x64xf32>
    %c0_53 = arith.constant 0 : index
    %c0_54 = arith.constant 0 : index
    %c0_55 = arith.constant 0 : index
    %43 = vector.load %arg9[%c0_53, %c0_54, %c0_55] : memref<18x18x64xf32, #tpu.memory_space<vmem>>, vector<18x18x64xf32>
    tpu.vector_store %arg9[%c0_53, %c0_54, %c0_55], %42 {strides = array<i32>} : memref<18x18x64xf32, #tpu.memory_space<vmem>>, vector<18x18x64xf32>,
    %44 = vector.shape_cast %41 : vector<256x64xf32> to vector<16x16x64xf32>
    %c1_56 = arith.constant 1 : index
    %c1_57 = arith.constant 1 : index
    %c0_58 = arith.constant 0 : index
    %45 = vector.load %arg9[%c1_56, %c1_57, %c0_58] : memref<18x18x64xf32, #tpu.memory_space<vmem>>, vector<16x16x64xf32>
    tpu.vector_store %arg9[%c1_56, %c1_57, %c0_58], %44 {strides = array<i32>} : memref<18x18x64xf32, #tpu.memory_space<vmem>>, vector<16x16x64xf32>,
    %c0_59 = arith.constant 0 : index
    %c0_60 = arith.constant 0 : index
    %c0_61 = arith.constant 0 : index
    %46 = vector.load %arg9[%c0_59, %c0_60, %c0_61] : memref<18x18x64xf32, #tpu.memory_space<vmem>>, vector<16x16x64xf32>
    %c1_62 = arith.constant 1 : index
    %c0_63 = arith.constant 0 : index
    %c0_64 = arith.constant 0 : index
    %47 = vector.load %arg9[%c1_62, %c0_63, %c0_64] : memref<18x18x64xf32, #tpu.memory_space<vmem>>, vector<16x16x64xf32>
    %c2_65 = arith.constant 2 : index
    %c0_66 = arith.constant 0 : index
    %c0_67 = arith.constant 0 : index
    %48 = vector.load %arg9[%c2_65, %c0_66, %c0_67] : memref<18x18x64xf32, #tpu.memory_space<vmem>>, vector<16x16x64xf32>
    %49 = tpu.concatenate %46, %47, %48 in 2 : vector<16x16x64xf32>, vector<16x16x64xf32>, vector<16x16x64xf32> -> vector<16x16x192xf32>
    %50 = vector.shape_cast %49 : vector<16x16x192xf32> to vector<256x192xf32>
    %c0_68 = arith.constant 0 : index
    %c0_69 = arith.constant 0 : index
    %c0_70 = arith.constant 0 : index
    %51 = vector.load %arg5[%c0_68, %c0_69, %c0_70] : memref<3x3x192xf32, #tpu.memory_space<vmem>>, vector<1x3x192xf32>
    %52 = vector.shape_cast %51 : vector<1x3x192xf32> to vector<3x192xf32>
    %cst_71 = arith.constant dense<0.000000e+00> : vector<3x256xf32>
    %53 = tpu.matmul %52, %50, %cst_71 {dimension_numbers = #tpu.dot_dimension_numbers<[1], [1], [0], [0], [0, 0, 1, 0], [], []>} : vector<3x192xf32>, vector<256x192xf32>, vector<3x256xf32> -> vector<3x256xf32>
    %c0_72 = arith.constant 0 : index
    %c1_73 = arith.constant 1 : index
    %c0_74 = arith.constant 0 : index
    %54 = vector.load %arg9[%c0_72, %c1_73, %c0_74] : memref<18x18x64xf32, #tpu.memory_space<vmem>>, vector<16x16x64xf32>
    %c1_75 = arith.constant 1 : index
    %c1_76 = arith.constant 1 : index
    %c0_77 = arith.constant 0 : index
    %55 = vector.load %arg9[%c1_75, %c1_76, %c0_77] : memref<18x18x64xf32, #tpu.memory_space<vmem>>, vector<16x16x64xf32>
    %c2_78 = arith.constant 2 : index
    %c1_79 = arith.constant 1 : index
    %c0_80 = arith.constant 0 : index
    %56 = vector.load %arg9[%c2_78, %c1_79, %c0_80] : memref<18x18x64xf32, #tpu.memory_space<vmem>>, vector<16x16x64xf32>
    %57 = tpu.concatenate %54, %55, %56 in 2 : vector<16x16x64xf32>, vector<16x16x64xf32>, vector<16x16x64xf32> -> vector<16x16x192xf32>
    %58 = vector.shape_cast %57 : vector<16x16x192xf32> to vector<256x192xf32>
    %c1_81 = arith.constant 1 : index
    %c0_82 = arith.constant 0 : index
    %c0_83 = arith.constant 0 : index
    %59 = vector.load %arg5[%c1_81, %c0_82, %c0_83] : memref<3x3x192xf32, #tpu.memory_space<vmem>>, vector<1x3x192xf32>
    %60 = vector.shape_cast %59 : vector<1x3x192xf32> to vector<3x192xf32>
    %cst_84 = arith.constant dense<0.000000e+00> : vector<3x256xf32>
    %61 = tpu.matmul %60, %58, %cst_84 {dimension_numbers = #tpu.dot_dimension_numbers<[1], [1], [0], [0], [0, 0, 1, 0], [], []>} : vector<3x192xf32>, vector<256x192xf32>, vector<3x256xf32> -> vector<3x256xf32>
    %62 = arith.addf %53, %61 : vector<3x256xf32>
    %c0_85 = arith.constant 0 : index
    %c2_86 = arith.constant 2 : index
    %c0_87 = arith.constant 0 : index
    %63 = vector.load %arg9[%c0_85, %c2_86, %c0_87] : memref<18x18x64xf32, #tpu.memory_space<vmem>>, vector<16x16x64xf32>
    %c1_88 = arith.constant 1 : index
    %c2_89 = arith.constant 2 : index
    %c0_90 = arith.constant 0 : index
    %64 = vector.load %arg9[%c1_88, %c2_89, %c0_90] : memref<18x18x64xf32, #tpu.memory_space<vmem>>, vector<16x16x64xf32>
    %c2_91 = arith.constant 2 : index
    %c2_92 = arith.constant 2 : index
    %c0_93 = arith.constant 0 : index
    %65 = vector.load %arg9[%c2_91, %c2_92, %c0_93] : memref<18x18x64xf32, #tpu.memory_space<vmem>>, vector<16x16x64xf32>
    %66 = tpu.concatenate %63, %64, %65 in 2 : vector<16x16x64xf32>, vector<16x16x64xf32>, vector<16x16x64xf32> -> vector<16x16x192xf32>
    %67 = vector.shape_cast %66 : vector<16x16x192xf32> to vector<256x192xf32>
    %c2_94 = arith.constant 2 : index
    %c0_95 = arith.constant 0 : index
    %c0_96 = arith.constant 0 : index
    %68 = vector.load %arg5[%c2_94, %c0_95, %c0_96] : memref<3x3x192xf32, #tpu.memory_space<vmem>>, vector<1x3x192xf32>
    %69 = vector.shape_cast %68 : vector<1x3x192xf32> to vector<3x192xf32>
    %cst_97 = arith.constant dense<0.000000e+00> : vector<3x256xf32>
    %70 = tpu.matmul %69, %67, %cst_97 {dimension_numbers = #tpu.dot_dimension_numbers<[1], [1], [0], [0], [0, 0, 1, 0], [], []>} : vector<3x192xf32>, vector<256x192xf32>, vector<3x256xf32> -> vector<3x256xf32>
    %71 = arith.addf %62, %70 : vector<3x256xf32>
    %c0_98 = arith.constant 0 : index
    %c0_99 = arith.constant 0 : index
    %72 = vector.load %arg6[%c0_98, %c0_99] : memref<3x1xf32, #tpu.memory_space<vmem>>, vector<3x1xf32>
    %73 = vector.broadcast %72 : vector<3x1xf32> to vector<3x256xf32>
    %74 = arith.addf %71, %73 : vector<3x256xf32>
    %c0_100 = arith.constant 0 : index
    %c0_101 = arith.constant 0 : index
    %c0_102 = arith.constant 0 : index
    %75 = vector.load %arg7[%c0_100, %c0_101, %c0_102] : memref<1x3x256xf32, #tpu.memory_space<vmem>>, vector<1x3x256xf32>
    %76 = vector.shape_cast %75 : vector<1x3x256xf32> to vector<3x256xf32>
    %77 = vector.shape_cast %74 : vector<3x256xf32> to vector<1x3x256xf32>
    tpu.vector_store %arg7[%c0_100, %c0_101, %c0_102], %77 {strides = array<i32>} : memref<1x3x256xf32, #tpu.memory_space<vmem>>, vector<1x3x256xf32>,
    return
  }
  func.func @transform_0(%arg0: i32) -> (i32, i32, i32, i32) {
    %c0_i32 = arith.constant 0 : i32
    %c0_i32_0 = arith.constant 0 : i32
    %c0_i32_1 = arith.constant 0 : i32
    %c0_i32_2 = arith.constant 0 : i32
    return %arg0, %c0_i32, %c0_i32_0, %c0_i32_1 : i32, i32, i32, i32
  }
  func.func @transform_1(%arg0: i32) -> (i32, i32, i32) {
    %c0_i32 = arith.constant 0 : i32
    %c0_i32_0 = arith.constant 0 : i32
    %c0_i32_1 = arith.constant 0 : i32
    return %arg0, %c0_i32, %c0_i32_0 : i32, i32, i32
  }
  func.func @transform_2(%arg0: i32) -> (i32, i32, i32) {
    %c0_i32 = arith.constant 0 : i32
    %c0_i32_0 = arith.constant 0 : i32
    %c0_i32_1 = arith.constant 0 : i32
    %c0_i32_2 = arith.constant 0 : i32
    return %c0_i32, %c0_i32_0, %c0_i32_1 : i32, i32, i32
  }
  func.func @transform_3(%arg0: i32) -> (i32, i32) {
    %c0_i32 = arith.constant 0 : i32
    %c0_i32_0 = arith.constant 0 : i32
    %c0_i32_1 = arith.constant 0 : i32
    return %c0_i32, %c0_i32_0 : i32, i32
  }
  func.func @transform_4(%arg0: i32) -> (i32, i32, i32) {
    %c0_i32 = arith.constant 0 : i32
    %c0_i32_0 = arith.constant 0 : i32
    %c0_i32_1 = arith.constant 0 : i32
    %c0_i32_2 = arith.constant 0 : i32
    return %c0_i32, %c0_i32_0, %c0_i32_1 : i32, i32, i32
  }
  func.func @transform_5(%arg0: i32) -> (i32, i32) {
    %c0_i32 = arith.constant 0 : i32
    %c0_i32_0 = arith.constant 0 : i32
    %c0_i32_1 = arith.constant 0 : i32
    return %c0_i32, %c0_i32_0 : i32, i32
  }
  func.func @transform_6(%arg0: i32) -> (i32, i32, i32) {
    %c0_i32 = arith.constant 0 : i32
    %c0_i32_0 = arith.constant 0 : i32
    %c0_i32_1 = arith.constant 0 : i32
    return %arg0, %c0_i32, %c0_i32_0 : i32, i32, i32
  }
}

</mosaic_0001>

<bundles_post_ra>
// kernel: conditional_diffusion_forward.1
= control target key start
LH: loop header
LB: loop body
LE: loop exit
PB: predicated region body
PF: predicated region fallthrough
CT: control target
= control target key end

     0   :  { %s4471_s21 = smov 0   ;;  %s6783_s0 = inlined_call_operand.vmem [shape: f32[2,16,16,4], index: 0, kind: input, shape index: {}]   ;;  %s6784_s1 = inlined_call_operand.vmem [shape: f32[2,1,8], index: 1, kind: input, shape index: {}]   ;;  %s6785_s2 = inlined_call_operand.vmem [shape: f32[3,36,64], index: 2, kind: input, shape index: {}]   ;;  %s6786_s3 = inlined_call_operand.vmem [shape: f32[1,64], index: 3, kind: input, shape index: {}]   ;;  %s6787_s4 = inlined_call_operand.vmem [shape: f32[3,3,192], index: 4, kind: input, shape index: {}]   ;;  %s6788_s5 = inlined_call_operand.vmem [shape: f32[3,1], index: 5, kind: input, shape index: {}]   ;;  %s6789_s6 = inlined_call_operand.vmem [shape: f32[2,3,256], index: 6, kind: output, shape index: {}]  }
   0x1 LB: > { %s3923_s22 = sadd.s32 4294967295, %s4428_s21   ;;  %p3927_p0 = scmp.ge.s32.totalorder %s4428_s21, 1  ;;  %s4428_s21 = sphi %s4471_s21, %s16_s21  }
   0x2   : > { %p220_p1 = scmp.lt.s32.totalorder %s4428_s21, 3 }
   0x4   : > { %p221_p2 = pnand %p3927_p0, %p220_p1 }
   0x6   : > { %224 = sbr.rel (%p221_p2) target bundleno = 1424 (0x590), region = 44 }
   0xb   : > { %p253_p3 = scmp.lt.s32.totalorder %s3923_s22, 1  ;;  %s4430_s26 = smov 4   ;;  %vm266_vm0 = vcmask 97280   ;;  %vm269_vm1 = vcmask 91136   ;;  %v6790_v1 = vmov 0.0   ;;  %vm360_vm2 = vcmask 31744  }
   0xc   : > { %274 = vst.msk [vmem:[#allocation2 + $0x30] sm:$0xff] %vm266_vm0, %v6790_v1  ;;  %s4432_s7 = smov 12   ;;  %s4433_s8 = smov 24   ;;  %vm1368_vm3 = vcmask 1043456   ;;  %vm1271_vm4 = vcmask 293888   ;;  %vm811_vm5 = vcmask 195584  }
   0xd   : > { %s6881_s22 = smov (!%p253_p3, %s3923_s22), 1  ;;  %275 = vst.msk [vmem:[#allocation2 + $0x38] sm:$0xff] %vm266_vm0, %v6790_v1  ;;  %vm2431_vm6 = vcmask 523264   ;;  %vm2434_vm7 = vcmask 517120  }
   0xe   : > { %s260_s25 = scalar_lea.vmem %s6784_s1, %s6881_s22  ;;  %276 = vst.msk [vmem:[#allocation2 + $0x40] sm:$0x3] %vm269_vm1, %v6790_v1  ;;  %s4147_s27 = sshll.u32 %s6881_s22, 8 }
   0xf   : > { %v4400_v0 = vld [vmem:[%s260_s25] ss:$0 sm:$0xff]  ;;  %267 = vst.msk [vmem:[#allocation2] sm:$0xff] %vm266_vm0, %v6790_v1  ;;  %s4541_s30 = scalar_lea.vmem %s6783_s0, %s4147_s27  ;;  %s4148_s10 = sshll.u32 %s6881_s22, 3 }
  0x10   : > { %357 = vrot.lane.b32.xlu0 %v4400_v0, %s4430_s26  ;;  %268 = vst.msk [vmem:[#allocation2 + $0x8] sm:$0xff] %vm266_vm0, %v6790_v1  ;;  %v327_v2 = vld [vmem:[%s4541_s30 + $0x10] sm:$0xff]  ;;  %v328_v3 = vld [vmem:[%s4541_s30 + $0x18] sm:$0xff]  ;;  %v325_v8 = vld [vmem:[%s4541_s30] sm:$0xff]  ;;  %s265_s13 = scalar_lea.vmem %s6789_s6, %s4148_s10 }
  0x11   : > { %270 = vst.msk [vmem:[#allocation2 + $0x10] sm:$0x3] %vm269_vm1, %v6790_v1  ;;  %v326_v9 = vld [vmem:[%s4541_s30 + $0x8] sm:$0xff]  ;;  %v329_v10 = vld [vmem:[%s4541_s30 + $0x20] sm:$0xff]  ;;  %v331_v14 = vld [vmem:[%s4541_s30 + $0x30] sm:$0xff] }
  0x12   : > { %271 = vst.msk [vmem:[#allocation2 + $0x18] sm:$0xff] %vm266_vm0, %v6790_v1  ;;  %v330_v12 = vld [vmem:[%s4541_s30 + $0x28] sm:$0xff]  ;;  %v332_v16 = vld [vmem:[%s4541_s30 + $0x38] sm:$0xff]  ;;  %v333_v18 = vld [vmem:[%s4541_s30 + $0x40] sm:$0xff] }
  0x13   : > { %272 = vst.msk [vmem:[#allocation2 + $0x20] sm:$0xff] %vm266_vm0, %v6790_v1  ;;  %v335_v20 = vld [vmem:[%s4541_s30 + $0x50] sm:$0xff]  ;;  %v334_v22 = vld [vmem:[%s4541_s30 + $0x48] sm:$0xff]  ;;  %v336_v24 = vld [vmem:[%s4541_s30 + $0x58] sm:$0xff] }
  0x14   : > { %273 = vst.msk [vmem:[#allocation2 + $0x28] sm:$0x3] %vm269_vm1, %v6790_v1  ;;  %v337_v26 = vld [vmem:[%s4541_s30 + $0x60] sm:$0xff]  ;;  %v338_v28 = vld [vmem:[%s4541_s30 + $0x68] sm:$0xff]  ;;  %v339_v30 = vld [vmem:[%s4541_s30 + $0x70] sm:$0xff] }
  0x15   : > { %277 = vst.msk [vmem:[#allocation2 + $0x48] sm:$0xff] %vm266_vm0, %v6790_v1  ;;  %v341_v33 = vld [vmem:[%s4541_s30 + $0x80] sm:$0xff]  ;;  %v340_v36 = vld [vmem:[%s4541_s30 + $0x78] sm:$0xff]  ;;  %v342_v39 = vld [vmem:[%s4541_s30 + $0x88] sm:$0xff] }
  0x16   : > { %278 = vst.msk [vmem:[#allocation2 + $0x50] sm:$0xff] %vm266_vm0, %v6790_v1  ;;  %v343_v41 = vld [vmem:[%s4541_s30 + $0x90] sm:$0xff]  ;;  %v344_v43 = vld [vmem:[%s4541_s30 + $0x98] sm:$0xff]  ;;  %v345_v45 = vld [vmem:[%s4541_s30 + $0xa0] sm:$0xff] }
  0x17   : > { %279 = vst.msk [vmem:[#allocation2 + $0x58] sm:$0x3] %vm269_vm1, %v6790_v1  ;;  %v347_v47 = vld [vmem:[%s4541_s30 + $0xb0] sm:$0xff]  ;;  %v346_v49 = vld [vmem:[%s4541_s30 + $0xa8] sm:$0xff]  ;;  %v348_v52 = vld [vmem:[%s4541_s30 + $0xb8] sm:$0xff] }
  0x18   : > { %280 = vst.msk [vmem:[#allocation2 + $0x60] sm:$0xff] %vm266_vm0, %v6790_v1  ;;  %v349_v55 = vld [vmem:[%s4541_s30 + $0xc0] sm:$0xff]  ;;  %v350_v58 = vld [vmem:[%s4541_s30 + $0xc8] sm:$0xff]  ;;  %v351_v60 = vld [vmem:[%s4541_s30 + $0xd0] sm:$0xff] }
  0x19   : > { %281 = vst.msk [vmem:[#allocation2 + $0x68] sm:$0xff] %vm266_vm0, %v6790_v1  ;;  %v353_v62 = vld [vmem:[%s4541_s30 + $0xe0] sm:$0xff]  ;;  %v352_v0 = vld [vmem:[%s4541_s30 + $0xd8] sm:$0xff] }
  0x1a   : > { %282 = vst.msk [vmem:[#allocation2 + $0x70] sm:$0x3] %vm269_vm1, %v6790_v1 }
  0x1b   : > { %283 = vst.msk [vmem:[#allocation2 + $0x78] sm:$0xff] %vm266_vm0, %v6790_v1 }
  0x1c   : > { %284 = vst.msk [vmem:[#allocation2 + $0x80] sm:$0xff] %vm266_vm0, %v6790_v1 }
  0x1d   : > { %285 = vst.msk [vmem:[#allocation2 + $0x88] sm:$0x3] %vm269_vm1, %v6790_v1 }
  0x1e   : > { %286 = vst.msk [vmem:[#allocation2 + $0x90] sm:$0xff] %vm266_vm0, %v6790_v1 }
  0x1f   : > { %287 = vst.msk [vmem:[#allocation2 + $0x98] sm:$0xff] %vm266_vm0, %v6790_v1 }
  0x20   : > { %288 = vst.msk [vmem:[#allocation2 + $0xa0] sm:$0x3] %vm269_vm1, %v6790_v1 }
  0x21   : > { %289 = vst.msk [vmem:[#allocation2 + $0xa8] sm:$0xff] %vm266_vm0, %v6790_v1 }
  0x22   : > { %290 = vst.msk [vmem:[#allocation2 + $0xb0] sm:$0xff] %vm266_vm0, %v6790_v1 }
  0x23   : > { %291 = vst.msk [vmem:[#allocation2 + $0xb8] sm:$0x3] %vm269_vm1, %v6790_v1 }
  0x24   : > { %292 = vst.msk [vmem:[#allocation2 + $0xc0] sm:$0xff] %vm266_vm0, %v6790_v1 }
  0x25   : > { %293 = vst.msk [vmem:[#allocation2 + $0xc8] sm:$0xff] %vm266_vm0, %v6790_v1 }
  0x26   : > { %294 = vst.msk [vmem:[#allocation2 + $0xd0] sm:$0x3] %vm269_vm1, %v6790_v1 }
  0x27   : > { %295 = vst.msk [vmem:[#allocation2 + $0xd8] sm:$0xff] %vm266_vm0, %v6790_v1 }
  0x28   : > { %296 = vst.msk [vmem:[#allocation2 + $0xe0] sm:$0xff] %vm266_vm0, %v6790_v1 }
  0x29   : > { %297 = vst.msk [vmem:[#allocation2 + $0xe8] sm:$0x3] %vm269_vm1, %v6790_v1 }
  0x2a   : > { %298 = vst.msk [vmem:[#allocation2 + $0xf0] sm:$0xff] %vm266_vm0, %v6790_v1 }
  0x2b   : > { %299 = vst.msk [vmem:[#allocation2 + $0xf8] sm:$0xff] %vm266_vm0, %v6790_v1 }
  0x2c   : > { %300 = vst.msk [vmem:[#allocation2 + $0x100] sm:$0x3] %vm269_vm1, %v6790_v1 }
  0x2d   : > { %301 = vst.msk [vmem:[#allocation2 + $0x108] sm:$0xff] %vm266_vm0, %v6790_v1 }
  0x2e   : > { %302 = vst.msk [vmem:[#allocation2 + $0x110] sm:$0xff] %vm266_vm0, %v6790_v1 }
  0x2f   : > { %303 = vst.msk [vmem:[#allocation2 + $0x118] sm:$0x3] %vm269_vm1, %v6790_v1 }
  0x30   : > { %304 = vst.msk [vmem:[#allocation2 + $0x120] sm:$0xff] %vm266_vm0, %v6790_v1 }
  0x31   : > { %305 = vst.msk [vmem:[#allocation2 + $0x128] sm:$0xff] %vm266_vm0, %v6790_v1 }
  0x32   : > { %306 = vst.msk [vmem:[#allocation2 + $0x130] sm:$0x3] %vm269_vm1, %v6790_v1 }
  0x33   : > { %307 = vst.msk [vmem:[#allocation2 + $0x138] sm:$0xff] %vm266_vm0, %v6790_v1 }
  0x34   : > { %308 = vst.msk [vmem:[#allocation2 + $0x140] sm:$0xff] %vm266_vm0, %v6790_v1 }
  0x35   : > { %309 = vst.msk [vmem:[#allocation2 + $0x148] sm:$0x3] %vm269_vm1, %v6790_v1 }
  0x36   : > { %310 = vst.msk [vmem:[#allocation2 + $0x150] sm:$0xff] %vm266_vm0, %v6790_v1 }
  0x37   : > { %311 = vst.msk [vmem:[#allocation2 + $0x158] sm:$0xff] %vm266_vm0, %v6790_v1 }
  0x38   : > { %312 = vst.msk [vmem:[#allocation2 + $0x160] sm:$0x3] %vm269_vm1, %v6790_v1 }
  0x39   : > { %313 = vst.msk [vmem:[#allocation2 + $0x168] sm:$0xff] %vm266_vm0, %v6790_v1 }
  0x3a   : > { %314 = vst.msk [vmem:[#allocation2 + $0x170] sm:$0xff] %vm266_vm0, %v6790_v1 }
  0x3b   : > { %315 = vst.msk [vmem:[#allocation2 + $0x178] sm:$0x3] %vm269_vm1, %v6790_v1 }
  0x3c   : > { %316 = vst.msk [vmem:[#allocation2 + $0x180] sm:$0xff] %vm266_vm0, %v6790_v1 }
  0x3d   : > { %317 = vst.msk [vmem:[#allocation2 + $0x188] sm:$0xff] %vm266_vm0, %v6790_v1 }
  0x3e   : > { %318 = vst.msk [vmem:[#allocation2 + $0x190] sm:$0x3] %vm269_vm1, %v6790_v1 }
  0x3f   : > { %319 = vst.msk [vmem:[#allocation2 + $0x198] sm:$0xff] %vm266_vm0, %v6790_v1 }
  0x40   : > { %320 = vst.msk [vmem:[#allocation2 + $0x1a0] sm:$0xff] %vm266_vm0, %v6790_v1 }
  0x41   : > { %321 = vst.msk [vmem:[#allocation2 + $0x1a8] sm:$0x3] %vm269_vm1, %v6790_v1 }
  0x82   : > { %v4555_v4 = vpop.permute.xlu0 %357 }
  0x83   : > { %v363_v5 = vsel %vm360_vm2, %v327_v2, %v4555_v4  ;;  %v364_v6 = vsel %vm360_vm2, %v328_v3, %v4555_v4  ;;  %v361_v11 = vsel %vm360_vm2, %v325_v8, %v4555_v4  ;;  %v362_v13 = vsel %vm360_vm2, %v326_v9, %v4555_v4  ;;  %v354_v3 = vld [vmem:[%s4541_s30 + $0xe8] sm:$0xff] }
  0x84   : > { %396 = vst.msk [vmem:[#allocation2 + $0x31] sm:$0xff] %vm266_vm0, %v363_v5  ;;  %v365_v15 = vsel %vm360_vm2, %v329_v10, %v4555_v4  ;;  %v366_v17 = vsel %vm360_vm2, %v330_v12, %v4555_v4  ;;  %v367_v19 = vsel %vm360_vm2, %v331_v14, %v4555_v4  ;;  %v368_v21 = vsel %vm360_vm2, %v332_v16, %v4555_v4  ;;  %v356_v10 = vld [vmem:[%s4541_s30 + $0xf8] sm:$0xff] }
  0x85   : > { %397 = vst.msk [vmem:[#allocation2 + $0x39] sm:$0xff] %vm266_vm0, %v364_v6  ;;  %v369_v23 = vsel %vm360_vm2, %v333_v18, %v4555_v4  ;;  %v371_v25 = vsel %vm360_vm2, %v335_v20, %v4555_v4  ;;  %v370_v27 = vsel %vm360_vm2, %v334_v22, %v4555_v4  ;;  %v372_v29 = vsel %vm360_vm2, %v336_v24, %v4555_v4  ;;  %v355_v6 = vld [vmem:[%s4541_s30 + $0xf0] sm:$0xff] }
  0x86   : > { %394 = vst.msk [vmem:[#allocation2 + $0x19] sm:$0xff] %vm266_vm0, %v361_v11  ;;  %v373_v32 = vsel %vm360_vm2, %v337_v26, %v4555_v4  ;;  %v374_v35 = vsel %vm360_vm2, %v338_v28, %v4555_v4  ;;  %v375_v38 = vsel %vm360_vm2, %v339_v30, %v4555_v4  ;;  %v377_v40 = vsel %vm360_vm2, %v341_v33, %v4555_v4 }
  0x87   : > { %395 = vst.msk [vmem:[#allocation2 + $0x21] sm:$0xff] %vm266_vm0, %v362_v13  ;;  %v376_v42 = vsel %vm360_vm2, %v340_v36, %v4555_v4  ;;  %v378_v44 = vsel %vm360_vm2, %v342_v39, %v4555_v4  ;;  %v379_v46 = vsel %vm360_vm2, %v343_v41, %v4555_v4  ;;  %v380_v48 = vsel %vm360_vm2, %v344_v43, %v4555_v4 }
  0x88   : > { %398 = vst.msk [vmem:[#allocation2 + $0x49] sm:$0xff] %vm266_vm0, %v365_v15  ;;  %v381_v51 = vsel %vm360_vm2, %v345_v45, %v4555_v4  ;;  %v383_v54 = vsel %vm360_vm2, %v347_v47, %v4555_v4  ;;  %v382_v57 = vsel %vm360_vm2, %v346_v49, %v4555_v4  ;;  %v384_v59 = vsel %vm360_vm2, %v348_v52, %v4555_v4 }
  0x89   : > { %399 = vst.msk [vmem:[#allocation2 + $0x51] sm:$0xff] %vm266_vm0, %v366_v17  ;;  %v385_v61 = vsel %vm360_vm2, %v349_v55, %v4555_v4  ;;  %v386_v63 = vsel %vm360_vm2, %v350_v58, %v4555_v4  ;;  %v387_v2 = vsel %vm360_vm2, %v351_v60, %v4555_v4  ;;  %v389_v5 = vsel %vm360_vm2, %v353_v62, %v4555_v4 }
  0x8a   : > { %400 = vst.msk [vmem:[#allocation2 + $0x61] sm:$0xff] %vm266_vm0, %v367_v19  ;;  %v388_v9 = vsel %vm360_vm2, %v352_v0, %v4555_v4  ;;  %v390_v12 = vsel %vm360_vm2, %v354_v3, %v4555_v4  ;;  %v391_v14 = vsel %vm360_vm2, %v355_v6, %v4555_v4  ;;  %v392_v15 = vsel %vm360_vm2, %v356_v10, %v4555_v4 }
  0x8b   : > { %401 = vst.msk [vmem:[#allocation2 + $0x69] sm:$0xff] %vm266_vm0, %v368_v21  ;;  %v4703_v53 = vld [vmem:[#allocation2 + $0x30] sm:$0xff] }
  0x8c   : > { %v4579_v7 = vld [vmem:[#allocation2 + $0x38] sm:$0xff]  ;;  %402 = vst.msk [vmem:[#allocation2 + $0x79] sm:$0xff] %vm266_vm0, %v369_v23 }
  0x8d   : > { %561 = vrot.lane.b32.xlu2 %v4579_v7, %s4432_s7  ;;  %v4653_v31 = vld [vmem:[#allocation2 + $0x18] sm:$0xff]  ;;  %404 = vst.msk [vmem:[#allocation2 + $0x91] sm:$0xff] %vm266_vm0, %v371_v25 }
  0x8e   : > { %v4659_v34 = vld [vmem:[#allocation2 + $0x20] sm:$0xff]  ;;  %555 = vrot.lane.b32.xlu0 %v4653_v31, %s4432_s7  ;;  %403 = vst.msk [vmem:[#allocation2 + $0x81] sm:$0xff] %vm266_vm0, %v370_v27  ;;  %v4848_v45 = vld [vmem:[#allocation2 + $0x31] sm:$0xff] }
  0x8f   : > { %557 = vrot.lane.b32.xlu1 %v4659_v34, %s4432_s7  ;;  %v4669_v37 = vld [vmem:[#allocation2 + $0x48] sm:$0xff]  ;;  %405 = vst.msk [vmem:[#allocation2 + $0x99] sm:$0xff] %vm266_vm0, %v372_v29  ;;  %v4872_v55 = vld [vmem:[#allocation2 + $0x39] sm:$0xff] }
  0x90   : > { %406 = vst.msk [vmem:[#allocation2 + $0xa9] sm:$0xff] %vm266_vm0, %v373_v32  ;;  %v4697_v50 = vld [vmem:[#allocation2 + $0x50] sm:$0xff]  ;;  %v4854_v47 = vld [vmem:[#allocation2 + $0x22] sm:$0xff] }
  0x91   : > { %407 = vst.msk [vmem:[#allocation2 + $0xb1] sm:$0xff] %vm266_vm0, %v374_v35  ;;  %v4747_v11 = vld [vmem:[#allocation2 + $0x60] sm:$0xff]  ;;  %v4880_v58 = vld [vmem:[#allocation2 + $0x4a] sm:$0xff] }
  0x92   : > { %408 = vst.msk [vmem:[#allocation2 + $0xc1] sm:$0xff] %vm266_vm0, %v375_v38  ;;  %v4713_v56 = vld [vmem:[#allocation2 + $0x68] sm:$0xff] }
  0x93   : > { %410 = vst.msk [vmem:[#allocation2 + $0xd9] sm:$0xff] %vm266_vm0, %v377_v40  ;;  %v4741_v8 = vld [vmem:[#allocation2 + $0x78] sm:$0xff]  ;;  %v4862_v49 = vld [vmem:[#allocation2 + $0x21] sm:$0xff]  ;;  %v4904_v3 = vld [vmem:[#allocation2 + $0x49] sm:$0xff] }
  0x94   : > { %409 = vst.msk [vmem:[#allocation2 + $0xc9] sm:$0xff] %vm266_vm0, %v376_v42  ;;  %v4756_v13 = vld [vmem:[#allocation2 + $0x90] sm:$0xff]  ;;  %v4836_v42 = vld [vmem:[#allocation2 + $0x1a] sm:$0xff] }
  0x95   : > { %563 = vrot.lane.b32.xlu2 %v4669_v37, %s4432_s7  ;;  %411 = vst.msk [vmem:[#allocation2 + $0xe1] sm:$0xff] %vm266_vm0, %v378_v44  ;;  %v4771_v17 = vld [vmem:[#allocation2 + $0x80] sm:$0xff]  ;;  %v4842_v44 = vld [vmem:[#allocation2 + $0x32] sm:$0xff] }
  0x96   : > { %565 = vrot.lane.b32.xlu0 %v4697_v50, %s4432_s7  ;;  %412 = vst.msk [vmem:[#allocation2 + $0xf1] sm:$0xff] %vm266_vm0, %v379_v46  ;;  %v4769_v16 = vld [vmem:[#allocation2 + $0x98] sm:$0xff] }
  0x97   : > { %559 = vrot.lane.b32.xlu1 %v4703_v53, %s4432_s7  ;;  %413 = vst.msk [vmem:[#allocation2 + $0xf9] sm:$0xff] %vm266_vm0, %v380_v48  ;;  %v4783_v19 = vld [vmem:[#allocation2 + $0xa8] sm:$0xff]  ;;  %v4856_v48 = vld [vmem:[#allocation2 + $0x19] sm:$0xff] }
  0x98   : > { %414 = vst.msk [vmem:[#allocation2 + $0x109] sm:$0xff] %vm266_vm0, %v381_v51  ;;  %v4777_v18 = vld [vmem:[#allocation2 + $0xb0] sm:$0xff]  ;;  %v4986_v1 = vld [vmem:[#allocation2 + $0x79] sm:$0xff] }
  0x99   : > { %416 = vst.msk [vmem:[#allocation2 + $0x121] sm:$0xff] %vm266_vm0, %v383_v54  ;;  %v4781_v4 = vld [vmem:[#allocation2 + $0xc0] sm:$0xff] }
  0x9a   : > { %415 = vst.msk [vmem:[#allocation2 + $0x111] sm:$0xff] %vm266_vm0, %v382_v57  ;;  %v4789_v20 = vld [vmem:[#allocation2 + $0xd8] sm:$0xff] }
  0x9b   : > { %417 = vst.msk [vmem:[#allocation2 + $0x129] sm:$0xff] %vm266_vm0, %v384_v59  ;;  %v4795_v22 = vld [vmem:[#allocation2 + $0xc8] sm:$0xff]  ;;  %v4874_v57 = vld [vmem:[#allocation2 + $0x3a] sm:$0xff] }
  0x9c   : > { %418 = vst.msk [vmem:[#allocation2 + $0x139] sm:$0xff] %vm266_vm0, %v385_v61  ;;  %v4793_v21 = vld [vmem:[#allocation2 + $0xe0] sm:$0xff] }
  0x9d   : > { %569 = vrot.lane.b32.xlu2 %v4713_v56, %s4432_s7  ;;  %419 = vst.msk [vmem:[#allocation2 + $0x141] sm:$0xff] %vm266_vm0, %v386_v63  ;;  %v4802_v25 = vld [vmem:[#allocation2 + $0xf0] sm:$0xff] }
  0x9e   : > { %571 = vrot.lane.b32.xlu0 %v4741_v8, %s4432_s7  ;;  %420 = vst.msk [vmem:[#allocation2 + $0x151] sm:$0xff] %vm266_vm0, %v387_v2  ;;  %v477_v23 = vld [vmem:[#allocation2 + $0xf8] sm:$0xff] }
  0x9f   : > { %567 = vrot.lane.b32.xlu1 %v4747_v11, %s4432_s7  ;;  %6810 = vst [vmem:[#allocation4_spill] sm:$0xff] %v4756_v13  ;;  %v478_v24 = vld [vmem:[#allocation2 + $0x108] sm:$0xff]  ;;  %v4902_v2 = vld [vmem:[#allocation2 + $0x52] sm:$0xff] }
  0xa0   : > { %422 = vst.msk [vmem:[#allocation2 + $0x169] sm:$0xff] %vm266_vm0, %v389_v5  ;;  %v480_v26 = vld [vmem:[#allocation2 + $0x120] sm:$0xff]  ;;  %v4910_v5 = vld [vmem:[#allocation2 + $0x51] sm:$0xff] }
  0xa1   : > { %421 = vst.msk [vmem:[#allocation2 + $0x159] sm:$0xff] %vm266_vm0, %v388_v9  ;;  %v479_v28 = vld [vmem:[#allocation2 + $0x110] sm:$0xff] }
  0xa2   : > { %423 = vst.msk [vmem:[#allocation2 + $0x171] sm:$0xff] %vm266_vm0, %v390_v12  ;;  %v481_v27 = vld [vmem:[#allocation2 + $0x128] sm:$0xff] }
  0xa3   : > { %424 = vst.msk [vmem:[#allocation2 + $0x181] sm:$0xff] %vm266_vm0, %v391_v14  ;;  %v482_v32 = vld [vmem:[#allocation2 + $0x138] sm:$0xff] }
  0xa4   : > { %425 = vst.msk [vmem:[#allocation2 + $0x189] sm:$0xff] %vm266_vm0, %v392_v15  ;;  %v483_v29 = vld [vmem:[#allocation2 + $0x140] sm:$0xff] }
  0xa5   : > { %575 = vrot.lane.b32.xlu2 %v4756_v13, %s4432_s7  ;;  %6811 = vst [vmem:[#allocation5_spill] sm:$0xff] %v4771_v17  ;;  %v484_v30 = vld [vmem:[#allocation2 + $0x150] sm:$0xff] }
  0xa6   : > { %577 = vrot.lane.b32.xlu0 %v4769_v16, %s4432_s7 }
  0xa7   : > { %573 = vrot.lane.b32.xlu1 %v4771_v17, %s4432_s7  ;;  %v486_v33 = vld [vmem:[#allocation2 + $0x168] sm:$0xff] }
  0xa8   : > { %v485_v36 = vld [vmem:[#allocation2 + $0x158] sm:$0xff] }
  0xa9   : > { %v487_v35 = vld [vmem:[#allocation2 + $0x170] sm:$0xff] }
  0xaa   : > { %v488_v39 = vld [vmem:[#allocation2 + $0x180] sm:$0xff] }
  0xab   : > { %v489_v38 = vld [vmem:[#allocation2 + $0x188] sm:$0xff] }
  0xad   : > { %581 = vrot.lane.b32.xlu2 %v4777_v18, %s4432_s7 }
  0xae   : > { %583 = vrot.lane.b32.xlu0 %v4781_v4, %s4432_s7 }
  0xaf   : > { %579 = vrot.lane.b32.xlu1 %v4783_v19, %s4432_s7 }
  0xb5   : > { %587 = vrot.lane.b32.xlu2 %v4789_v20, %s4432_s7 }
  0xb6   : > { %589 = vrot.lane.b32.xlu0 %v4793_v21, %s4432_s7 }
  0xb7   : > { %585 = vrot.lane.b32.xlu1 %v4795_v22, %s4432_s7 }
  0xbd   : > { %593 = vrot.lane.b32.xlu2 %v477_v23, %s4432_s7  ;;  %v4932_v23 = vld [vmem:[#allocation2 + $0x61] sm:$0xff] }
  0xbe   : > { %595 = vrot.lane.b32.xlu0 %v478_v24, %s4432_s7  ;;  %v4934_v24 = vld [vmem:[#allocation2 + $0x62] sm:$0xff] }
  0xbf   : > { %591 = vrot.lane.b32.xlu1 %v4802_v25, %s4432_s7 }
  0xc5   : > { %599 = vrot.lane.b32.xlu2 %v480_v26, %s4432_s7  ;;  %v4940_v26 = vld [vmem:[#allocation2 + $0x6a] sm:$0xff] }
  0xc6   : > { %601 = vrot.lane.b32.xlu0 %v481_v27, %s4432_s7 }
  0xc7   : > { %597 = vrot.lane.b32.xlu1 %v479_v28, %s4432_s7 }
  0xcd   : > { %605 = vrot.lane.b32.xlu2 %v483_v29, %s4432_s7 }
  0xce   : > { %607 = vrot.lane.b32.xlu0 %v484_v30, %s4432_s7  ;;  %v848_v30 = vld [vmem:[%s6785_s2 + $0x20] sm:$0xf] }
  0xcf   : > { %603 = vrot.lane.b32.xlu1 %v482_v32, %s4432_s7  ;;  %v847_v32 = vld [vmem:[%s6785_s2 + $0x18] sm:$0xff]  ;;  %3970 = vmatpush.msk.msra.mxu1 %vm1368_vm3, %v848_v30  ;;  %v844_v30 = vld [vmem:[%s6785_s2] sm:$0xff] }
  0xd1   : > { %1596 = vmatpush.msra.mxu1 %v847_v32  ;;  %v4978_v32 = vld [vmem:[#allocation2 + $0x7a] sm:$0xff] }
  0xd5   : > { %611 = vrot.lane.b32.xlu2 %v486_v33, %s4432_s7  ;;  %v846_v33 = vld [vmem:[%s6785_s2 + $0x10] sm:$0xff] }
  0xd6   : > { %613 = vrot.lane.b32.xlu0 %v487_v35, %s4432_s7  ;;  %1597 = vmatpush.msra.mxu1 %v846_v33  ;;  %v845_v35 = vld [vmem:[%s6785_s2 + $0x8] sm:$0xff]  ;;  %v4980_v33 = vld [vmem:[#allocation2 + $0x69] sm:$0xff] }
  0xd7   : > { %609 = vrot.lane.b32.xlu1 %v485_v36, %s4432_s7 }
  0xd8   : > { %1598 = vmatpush.msra.mxu1 %v845_v35 }
  0xda   : > { %1599 = vmatpush.msra.mxu1 %v844_v30 }
  0xdd   : > { %617 = vrot.lane.b32.xlu2 %v489_v38, %s4432_s7 }
  0xde   : > { %683 = vrot.lane.b32.xlu0 %v4703_v53, %s4433_s8 }
  0xdf   : > { %615 = vrot.lane.b32.xlu1 %v488_v39, %s4432_s7 }
  0xe5   : > { %687 = vrot.lane.b32.xlu2 %v4669_v37, %s4433_s8 }
  0xe6   : > { %689 = vrot.lane.b32.xlu0 %v4697_v50, %s4433_s8 }
  0xe7   : > { %v4822_v40 = vpop.permute.xlu2 %561  ;;  %685 = vrot.lane.b32.xlu1 %v4579_v7, %s4433_s8 }
  0xed   : > { %693 = vrot.lane.b32.xlu2 %v4713_v56, %s4433_s8 }
  0xee   : > { %695 = vrot.lane.b32.xlu0 %v4741_v8, %s4433_s8 }
  0xef   : > { %v4830_v41 = vpop.permute.xlu2 %563  ;;  %691 = vrot.lane.b32.xlu1 %v4747_v11, %s4433_s8 }
  0xf5   : > { %1825 = vrot.lane.b32.xlu2 %v4836_v42, %s4432_s7 }
  0xf6   : > { %1953 = vrot.lane.b32.xlu0 %v4842_v44, %s4433_s8 }
  0xf7   : > { %v4840_v43 = vpop.permute.xlu2 %569  ;;  %697 = vrot.lane.b32.xlu1 %v4771_v17, %s4433_s8  ;;  %v427_v17 = vld [vmem:[#allocation2 + $0x8] sm:$0xff] }
  0xfd   : > { %1105 = vrot.lane.b32.xlu2 %v4848_v45, %s4433_s8 }
  0xfe   : > { %1827 = vrot.lane.b32.xlu0 %v4854_v47, %s4432_s7 }
  0xff   : > { %v4852_v46 = vpop.permute.xlu2 %575  ;;  %977 = vrot.lane.b32.xlu1 %v4856_v48, %s4432_s7 }
 0x100   : > { %v4864_v51 = vpop.permute.xlu0 %555 }
 0x101   : > { %v4868_v52 = vpop.permute.xlu1 %557 }
 0x105   : > { %979 = vrot.lane.b32.xlu2 %v4862_v49, %s4432_s7 }
 0x106   : > { %1107 = vrot.lane.b32.xlu0 %v4872_v55, %s4433_s8 }
 0x107   : > { %v4870_v54 = vpop.permute.xlu2 %581  ;;  %1955 = vrot.lane.b32.xlu1 %v4874_v57, %s4433_s8 }
 0x108   : > { %6812 = vst [vmem:[#allocation6_spill] sm:$0xff] %v4870_v54  ;;  %v4882_v59 = vpop.permute.xlu0 %565 }
 0x109   : > { %v4886_v60 = vpop.permute.xlu1 %559 }
 0x10d   : > { %1957 = vrot.lane.b32.xlu2 %v4880_v58, %s4433_s8 }
 0x10e   : > { %981 = vrot.lane.b32.xlu0 %v4848_v45, %s4432_s7 }
 0x10f   : > { %v4888_v61 = vpop.permute.xlu2 %587  ;;  %1829 = vrot.lane.b32.xlu1 %v4842_v44, %s4432_s7 }
 0x110   : > { %6813 = vst [vmem:[#allocation7_spill] sm:$0xff] %v4888_v61  ;;  %v4894_v62 = vpop.permute.xlu0 %571 }
 0x111   : > { %v4898_v63 = vpop.permute.xlu1 %567 }
 0x115   : > { %1831 = vrot.lane.b32.xlu2 %v4874_v57, %s4432_s7 }
 0x116   : > { %1959 = vrot.lane.b32.xlu0 %v4902_v2, %s4433_s8 }
 0x117   : > { %v4900_v0 = vpop.permute.xlu2 %593  ;;  %1109 = vrot.lane.b32.xlu1 %v4904_v3, %s4433_s8 }
 0x118   : > { %6814 = vst [vmem:[#allocation8_spill] sm:$0xff] %v4900_v0  ;;  %v4912_v6 = vpop.permute.xlu0 %577  ;;  %v4004_v0 = vld [vmem:[%s6785_s2 + $0x58] sm:$0xff] }
 0x119   : > { %v4916_v9 = vpop.permute.xlu1 %573 }
 0x11d   : > { %1111 = vrot.lane.b32.xlu2 %v4910_v5, %s4433_s8 }
 0x11e   : > { %1833 = vrot.lane.b32.xlu0 %v4880_v58, %s4432_s7 }
 0x11f   : > { %v4918_v10 = vpop.permute.xlu2 %599  ;;  %983 = vrot.lane.b32.xlu1 %v4872_v55, %s4432_s7 }
 0x120   : > { %6815 = vst [vmem:[#allocation9_spill] sm:$0xff] %v4918_v10  ;;  %v4924_v12 = vpop.permute.xlu0 %583 }
 0x121   : > { %6816 = vst [vmem:[#allocation10_spill] sm:$0xff] %v4924_v12  ;;  %v4928_v14 = vpop.permute.xlu1 %579 }
 0x122   : > { %6817 = vst [vmem:[#allocation11_spill] sm:$0xff] %v4928_v14  ;;  %v3932_v14 = vld [vmem:[%s6785_s2 + $0x28] sm:$0xff] }
 0x125   : > { %985 = vrot.lane.b32.xlu2 %v4904_v3, %s4432_s7 }
 0x126   : > { %1113 = vrot.lane.b32.xlu0 %v4932_v23, %s4433_s8 }
 0x127   : > { %v4930_v15 = vpop.permute.xlu2 %605  ;;  %1961 = vrot.lane.b32.xlu1 %v4934_v24, %s4433_s8 }
 0x128   : > { %6818 = vst [vmem:[#allocation12_spill] sm:$0xff] %v4930_v15  ;;  %v4942_v27 = vpop.permute.xlu0 %589 }
 0x129   : > { %6819 = vst [vmem:[#allocation13_spill] sm:$0xff] %v4942_v27  ;;  %v4946_v28 = vpop.permute.xlu1 %585  ;;  %v3936_v27 = vld [vmem:[%s6785_s2 + $0x48] sm:$0xf] }
 0x12a   : > { %6820 = vst [vmem:[#allocation14_spill] sm:$0xff] %v4946_v28  ;;  %3937 = vmatpush.msk.msra.mxu0 %vm1368_vm3, %v3936_v27  ;;  %v3933_v27 = vld [vmem:[%s6785_s2 + $0x30] sm:$0xff] }
 0x12d   : > { %1963 = vrot.lane.b32.xlu2 %v4940_v26, %s4433_s8 }
 0x12e   : > { %987 = vrot.lane.b32.xlu0 %v4910_v5, %s4432_s7 }
 0x12f   : > { %v4948_v29 = vpop.permute.xlu2 %611  ;;  %1835 = vrot.lane.b32.xlu1 %v4902_v2, %s4432_s7 }
 0x130   : > { %6821 = vst [vmem:[#allocation15_spill] sm:$0xff] %v4948_v29  ;;  %v4967_v36 = vpop.permute.xlu0 %595 }
 0x131   : > { %6822 = vst [vmem:[#allocation16_spill] sm:$0xff] %v4967_v36  ;;  %v4971_v38 = vpop.permute.xlu1 %591  ;;  %v5018_v36 = vld [vmem:[#allocation2 + $0x81] sm:$0xff] }
 0x132   : > { %6823 = vst [vmem:[#allocation17_spill] sm:$0xff] %v4971_v38 }
 0x135   : > { %1837 = vrot.lane.b32.xlu2 %v4934_v24, %s4432_s7 }
 0x136   : > { %1965 = vrot.lane.b32.xlu0 %v4978_v32, %s4433_s8 }
 0x137   : > { %v4973_v39 = vpop.permute.xlu2 %617  ;;  %1115 = vrot.lane.b32.xlu1 %v4980_v33, %s4433_s8 }
 0x138   : > { %6824 = vst [vmem:[#allocation18_spill] sm:$0xff] %v4973_v39  ;;  %v4988_v35 = vpop.permute.xlu0 %601 }
 0x139   : > { %6825 = vst [vmem:[#allocation19_spill] sm:$0xff] %v4988_v35  ;;  %v4992_v39 = vpop.permute.xlu1 %597  ;;  %v4007_v35 = vld [vmem:[%s6785_s2 + $0x70] sm:$0xf] }
 0x13a   : > { %6826 = vst [vmem:[#allocation20_spill] sm:$0xff] %v4992_v39  ;;  %4008 = vmatpush.msk.msra.mxu2 %vm1368_vm3, %v4007_v35  ;;  %v4006_v39 = vld [vmem:[%s6785_s2 + $0x68] sm:$0xff]  ;;  %v5026_v35 = vld [vmem:[#allocation2 + $0x92] sm:$0xff] }
 0x13b   : > { %6829 = vst [vmem:[#allocation23_spill] sm:$0xff] %v5026_v35 }
 0x13c   : > { %2230 = vmatpush.msra.mxu2 %v4006_v39 }
 0x13d   : > { %1117 = vrot.lane.b32.xlu2 %v4986_v1, %s4433_s8 }
 0x13e   : > { %1839 = vrot.lane.b32.xlu0 %v4940_v26, %s4432_s7 }
 0x13f   : > { %v4994_v30 = vpop.permute.xlu2 %687  ;;  %989 = vrot.lane.b32.xlu1 %v4932_v23, %s4432_s7 }
 0x140   : > { %v5000_v29 = vpop.permute.xlu0 %607 }
 0x141   : > { %6827 = vst [vmem:[#allocation21_spill] sm:$0xff] %v5000_v29  ;;  %v5004_v15 = vpop.permute.xlu1 %603  ;;  %v4005_v29 = vld [vmem:[%s6785_s2 + $0x60] sm:$0xff] }
 0x142   : > { %6828 = vst [vmem:[#allocation22_spill] sm:$0xff] %v5004_v15  ;;  %v5020_v15 = vld [vmem:[#allocation2 + $0x82] sm:$0xff]  ;;  %2231 = vmatpush.msra.mxu2 %v4005_v29 }
 0x143   : > { %v4003_v29 = vld [vmem:[%s6785_s2 + $0x50] sm:$0xff] }
 0x144   : > { %2232 = vmatpush.msra.mxu2 %v4004_v0  ;;  %v3934_v0 = vld [vmem:[%s6785_s2 + $0x38] sm:$0xff] }
 0x145   : > { %991 = vrot.lane.b32.xlu2 %v4980_v33, %s4432_s7 }
 0x146   : > { %1119 = vrot.lane.b32.xlu0 %v5018_v36, %s4433_s8  ;;  %2233 = vmatpush.msra.mxu2 %v4003_v29  ;;  %v5054_v29 = vld [vmem:[#allocation2 + $0x91] sm:$0xff] }
 0x147   : > { %v5009_v10 = vpop.permute.xlu2 %693  ;;  %1967 = vrot.lane.b32.xlu1 %v5020_v15, %s4433_s8  ;;  %6832 = vst [vmem:[#allocation26_spill] sm:$0xff] %v5054_v29 }
 0x148   : > { %v5031_v38 = vpop.permute.xlu0 %613 }
 0x149   : > { %6830 = vst [vmem:[#allocation24_spill] sm:$0xff] %v5031_v38  ;;  %v5035_v39 = vpop.permute.xlu1 %609  ;;  %v3935_v38 = vld [vmem:[%s6785_s2 + $0x40] sm:$0xff] }
 0x14a   : > { %6831 = vst [vmem:[#allocation25_spill] sm:$0xff] %v5035_v39  ;;  %1384 = vmatpush.msra.mxu0 %v3935_v38  ;;  %v426_v39 = vld [vmem:[#allocation2] sm:$0xff] }
 0x14b   : > { %v779_v28 = vsel %vm266_vm0, %v426_v39, %v4864_v51 }
 0x14c   : > { %1385 = vmatpush.msra.mxu0 %v3934_v0 }
 0x14d   : > { %1969 = vrot.lane.b32.xlu2 %v5026_v35, %s4433_s8 }
 0x14e   : > { %993 = vrot.lane.b32.xlu0 %v4986_v1, %s4432_s7  ;;  %1386 = vmatpush.msra.mxu0 %v3933_v27 }
 0x14f   : > { %v1826_v61 = vpop.permute.xlu2 %1825  ;;  %1841 = vrot.lane.b32.xlu1 %v4978_v32, %s4432_s7 }
 0x150   : > { %v684_v12 = vpop.permute.xlu0 %683  ;;  %1387 = vmatpush.msra.mxu0 %v3932_v14  ;;  %v5080_v14 = vld [vmem:[#allocation2 + $0x9a] sm:$0xff] }
 0x151   : > { %v5063_v38 = vpop.permute.xlu1 %615  ;;  %v812_v0 = vsel %vm811_vm5, %v779_v28, %v684_v12  ;;  %v780_v12 = vsel %vm266_vm0, %v427_v17, %v4868_v52  ;;  %v781_v17 = vsel %vm266_vm0, %v4653_v31, %v4886_v60 }
 0x152   : > { %6833 = vst [vmem:[#allocation27_spill] sm:$0xff] %v5063_v38  ;;  %3971 = vmatmul.msk.f32.vlgmr.msra.gmra.mxu1 %vm1271_vm4, %v812_v0  ;;  %v5098_v38 = vld [vmem:[#allocation2 + $0x99] sm:$0xff] }
 0x155   : > { %1121 = vrot.lane.b32.xlu2 %v5054_v29, %s4433_s8 }
 0x156   : > { %1843 = vrot.lane.b32.xlu0 %v5020_v15, %s4432_s7 }
 0x157   : > { %v1106_v54 = vpop.permute.xlu2 %1105  ;;  %699 = vrot.lane.b32.xlu1 %v4756_v13, %s4433_s8 }
 0x158   : > { %v690_v51 = vpop.permute.xlu0 %689 }
 0x159   : > { %v686_v28 = vpop.permute.xlu1 %685 }
 0x15a   : > { %v813_v39 = vsel %vm811_vm5, %v780_v12, %v686_v28  ;;  %v814_v12 = vsel %vm811_vm5, %v781_v17, %v4994_v30  ;;  %v782_v30 = vsel %vm266_vm0, %v4659_v34, %v4822_v40  ;;  %v849_v34 = vld [vmem:[#allocation2 + $0x1] sm:$0xff] }
 0x15b   : > { %3972 = vmatmul.msk.f32.gmra.mxu1 %vm1271_vm4, %v813_v39  ;;  %v5096_v39 = vld [vmem:[#allocation2 + $0xaa] sm:$0xff] }
 0x15d   : > { %995 = vrot.lane.b32.xlu2 %v5018_v36, %s4432_s7 }
 0x15e   : > { %701 = vrot.lane.b32.xlu0 %v4769_v16, %s4433_s8  ;;  %v1697_v16 = vld [vmem:[#allocation2 + $0x2] sm:$0xff] }
 0x15f   : > { %v980_v27 = vpop.permute.xlu2 %979  ;;  %1971 = vrot.lane.b32.xlu1 %v5080_v14, %s4433_s8  ;;  %v2049_v31 = vsel %vm266_vm0, %v1697_v16, %v1826_v61  ;;  %v5116_v61 = vld [vmem:[#allocation2 + $0xa9] sm:$0xff] }
 0x160   : > { %v5086_v0 = vpop.permute.xlu0 %695 }
 0x161   : > { %v692_v52 = vpop.permute.xlu1 %691 }
 0x163   : > { %3973 = vmatmul.msk.f32.gmra.mxu1 %vm1271_vm4, %v814_v12 }
 0x165   : > { %1845 = vrot.lane.b32.xlu2 %v5026_v35, %s4432_s7  ;;  %v815_v35 = vsel %vm811_vm5, %v782_v30, %v690_v51  ;;  %v783_v51 = vsel %vm266_vm0, %v4703_v53, %v4830_v41  ;;  %v5138_v53 = vld [vmem:[#allocation2 + $0xb1] sm:$0xff] }
 0x166   : > { %1973 = vrot.lane.b32.xlu0 %v5096_v39, %s4433_s8 }
 0x167   : > { %v1958_v28 = vpop.permute.xlu2 %1957  ;;  %1123 = vrot.lane.b32.xlu1 %v5098_v38, %s4433_s8 }
 0x168   : > { %v1954_v60 = vpop.permute.xlu0 %1953 }
 0x169   : > { %v5110_v17 = vpop.permute.xlu1 %697  ;;  %v2081_v12 = vsel %vm811_vm5, %v2049_v31, %v1954_v60  ;;  %v816_v31 = vsel %vm811_vm5, %v783_v51, %v692_v52 }
 0x16a   : > { %4009 = vmatmul.msk.f32.vlgmr.msra.gmra.mxu2 %vm1271_vm4, %v2081_v12  ;;  %v850_v12 = vld [vmem:[#allocation2 + $0x9] sm:$0xff] }
 0x16b   : > { %3974 = vmatmul.msk.f32.gmra.mxu1 %vm1271_vm4, %v815_v35  ;;  %v1202_v41 = vsel %vm266_vm0, %v850_v12, %v980_v27  ;;  %v5170_v12 = vld [vmem:[#allocation2 + $0xc2] sm:$0xff] }
 0x16d   : > { %703 = vrot.lane.b32.xlu2 %v4783_v19, %s4433_s8  ;;  %v5122_v19 = vld [vmem:[#allocation2 + $0xb2] sm:$0xff] }
 0x16e   : > { %1125 = vrot.lane.b32.xlu0 %v5116_v61, %s4433_s8 }
 0x16f   : > { %v1832_v13 = vpop.permute.xlu2 %1831  ;;  %997 = vrot.lane.b32.xlu1 %v5054_v29, %s4432_s7  ;;  %v1698_v29 = vld [vmem:[#allocation2 + $0xa] sm:$0xff] }
 0x170   : > { %v1828_v40 = vpop.permute.xlu0 %1827 }
 0x171   : > { %v978_v35 = vpop.permute.xlu1 %977 }
 0x172   : > { %v1201_v16 = vsel %vm266_vm0, %v849_v34, %v978_v35  ;;  %v2050_v34 = vsel %vm266_vm0, %v1698_v29, %v1828_v40 }
 0x173   : > { %3975 = vmatmul.msk.f32.gmra.mxu1 %vm1271_vm4, %v816_v31  ;;  %v1233_v30 = vsel %vm811_vm5, %v1201_v16, %v1106_v54  ;;  %v784_v54 = vsel %vm266_vm0, %v4579_v7, %v4882_v59  ;;  %v785_v59 = vsel %vm266_vm0, %v4669_v37, %v4898_v63  ;;  %v2052_v37 = vsel %vm266_vm0, %v4854_v47, %v1832_v13  ;;  %v5192_v47 = vld [vmem:[#allocation2 + $0xca] sm:$0xff] }
 0x174   : > { %3938 = vmatmul.msk.f32.vlgmr.msra.gmra.mxu0 %vm1271_vm4, %v1233_v30  ;;  %v817_v16 = vsel %vm811_vm5, %v784_v54, %v5009_v10  ;;  %v818_v27 = vsel %vm811_vm5, %v785_v59, %v5086_v0  ;;  %v786_v63 = vsel %vm266_vm0, %v4697_v50, %v4840_v43  ;;  %v5194_v50 = vld [vmem:[#allocation2 + $0xc1] sm:$0xff] }
 0x175   : > { %1975 = vrot.lane.b32.xlu2 %v5122_v19, %s4433_s8 }
 0x176   : > { %999 = vrot.lane.b32.xlu0 %v5098_v38, %s4432_s7 }
 0x177   : > { %v1112_v60 = vpop.permute.xlu2 %1111  ;;  %1847 = vrot.lane.b32.xlu1 %v5080_v14, %s4432_s7 }
 0x178   : > { %v1108_v52 = vpop.permute.xlu0 %1107 }
 0x179   : > { %v1956_v51 = vpop.permute.xlu1 %1955  ;;  %v1234_v35 = vsel %vm811_vm5, %v1202_v41, %v1108_v52  ;;  %v819_v52 = vsel %vm811_vm5, %v786_v63, %v5110_v17 }
 0x17a   : > { %v2082_v31 = vsel %vm811_vm5, %v2050_v34, %v1956_v51  ;;  %v5206_v51 = vld [vmem:[#allocation2 + $0xc9] sm:$0xff] }
 0x17b   : > { %3976 = vmatmul.msk.f32.gmra.mxu1 %vm1271_vm4, %v817_v16  ;;  %4010 = vmatmul.msk.f32.gmra.mxu2 %vm1271_vm4, %v2082_v31 }
 0x17c   : > { %3939 = vmatmul.msk.f32.gmra.mxu0 %vm1271_vm4, %v1234_v35  ;;  %v5212_v35 = vld [vmem:[#allocation2 + $0xda] sm:$0xff] }
 0x17d   : > { %1127 = vrot.lane.b32.xlu2 %v5138_v53, %s4433_s8 }
 0x17e   : > { %1849 = vrot.lane.b32.xlu0 %v5096_v39, %s4432_s7 }
 0x17f   : > { %v986_v30 = vpop.permute.xlu2 %985  ;;  %705 = vrot.lane.b32.xlu1 %v4777_v18, %s4433_s8 }
 0x180   : > { %v982_v7 = vpop.permute.xlu0 %981 }
 0x181   : > { %v1830_v10 = vpop.permute.xlu1 %1829  ;;  %v1203_v0 = vsel %vm266_vm0, %v4856_v48, %v982_v7 }
 0x182   : > { %v2051_v29 = vsel %vm266_vm0, %v4836_v42, %v1830_v10 }
 0x183   : > { %3977 = vmatmul.msk.f32.gmra.mxu1 %vm1271_vm4, %v818_v27  ;;  %v2083_v18 = vsel %vm811_vm5, %v2051_v29, %v1958_v28 }
 0x184   : > { %4011 = vmatmul.msk.f32.gmra.mxu2 %vm1271_vm4, %v2083_v18 }
 0x185   : > { %1001 = vrot.lane.b32.xlu2 %v5116_v61, %s4432_s7 }
 0x186   : > { %707 = vrot.lane.b32.xlu0 %v4781_v4, %s4433_s8 }
 0x187   : > { %v1964_v40 = vpop.permute.xlu2 %1963  ;;  %1977 = vrot.lane.b32.xlu1 %v5170_v12, %s4433_s8 }
 0x188   : > { %v1960_v42 = vpop.permute.xlu0 %1959 }
 0x189   : > { %v1110_v28 = vpop.permute.xlu1 %1109  ;;  %v2084_v4 = vsel %vm811_vm5, %v2052_v37, %v1960_v42 }
 0x18a   : > { %v1235_v41 = vsel %vm811_vm5, %v1203_v0, %v1110_v28 }
 0x18b   : > { %3940 = vmatmul.msk.f32.gmra.mxu0 %vm1271_vm4, %v1235_v41  ;;  %3978 = vmatmul.msk.f32.gmra.mxu1 %vm1271_vm4, %v819_v52  ;;  %v5264_v52 = vld [vmem:[#allocation2 + $0xf2] sm:$0xff] }
 0x18c   : > { %4012 = vmatmul.msk.f32.gmra.mxu2 %vm1271_vm4, %v2084_v4 }
 0x18d   : > { %1851 = vrot.lane.b32.xlu2 %v5122_v19, %s4432_s7 }
 0x18e   : > { %1979 = vrot.lane.b32.xlu0 %v5192_v47, %s4433_s8 }
 0x18f   : > { %v1838_v13 = vpop.permute.xlu2 %1837  ;;  %1129 = vrot.lane.b32.xlu1 %v5194_v50, %s4433_s8 }
 0x190   : > { %v1834_v43 = vpop.permute.xlu0 %1833  ;;  %v2055_v18 = vsel %vm266_vm0, %v4880_v58, %v1838_v13 }
 0x191   : > { %v984_v48 = vpop.permute.xlu1 %983 }
 0x192   : > { %v1204_v17 = vsel %vm266_vm0, %v4862_v49, %v984_v48  ;;  %v2053_v49 = vsel %vm266_vm0, %v4842_v44, %v1834_v43 }
 0x193   : > { %v1236_v34 = vsel %vm811_vm5, %v1204_v17, %v1112_v60 }
 0x194   : > { %3941 = vmatmul.msk.f32.gmra.mxu0 %vm1271_vm4, %v1236_v34 }
 0x195   : > { %709 = vrot.lane.b32.xlu2 %v4795_v22, %s4433_s8  ;;  %v1205_v22 = vsel %vm266_vm0, %v4848_v45, %v986_v30  ;;  %v5228_v45 = vld [vmem:[#allocation2 + $0xd9] sm:$0xff] }
 0x196   : > { %1131 = vrot.lane.b32.xlu0 %v5206_v51, %s4433_s8 }
 0x197   : > { %v1118_v54 = vpop.permute.xlu2 %1117  ;;  %1003 = vrot.lane.b32.xlu1 %v5138_v53, %s4432_s7 }
 0x198   : > { %v1114_v16 = vpop.permute.xlu0 %1113 }
 0x199   : > { %v1962_v60 = vpop.permute.xlu1 %1961  ;;  %v1237_v31 = vsel %vm811_vm5, %v1205_v22, %v1114_v16  ;;  %v5282_v22 = vld [vmem:[#allocation2 + $0xf1] sm:$0xff] }
 0x19a   : > { %v2085_v7 = vsel %vm811_vm5, %v2053_v49, %v1962_v60 }
 0x19b   : > { %4013 = vmatmul.msk.f32.gmra.mxu2 %vm1271_vm4, %v2085_v7 }
 0x19c   : > { %3942 = vmatmul.msk.f32.gmra.mxu0 %vm1271_vm4, %v1237_v31 }
 0x19d   : > { %1981 = vrot.lane.b32.xlu2 %v5212_v35, %s4433_s8 }
 0x19e   : > { %1005 = vrot.lane.b32.xlu0 %v5194_v50, %s4432_s7 }
 0x19f   : > { %v992_v59 = vpop.permute.xlu2 %991  ;;  %1853 = vrot.lane.b32.xlu1 %v5170_v12, %s4432_s7 }
 0x1a0   : > { %v988_v30 = vpop.permute.xlu0 %987  ;;  %v1208_v13 = vsel %vm266_vm0, %v4910_v5, %v992_v59  ;;  %v5304_v59 = vld [vmem:[#allocation2 + $0xf9] sm:$0xff] }
 0x1a1   : > { %v1836_v44 = vpop.permute.xlu1 %1835 }
 0x1a2   : > { %v2054_v10 = vsel %vm266_vm0, %v4874_v57, %v1836_v44  ;;  %v1206_v57 = vsel %vm266_vm0, %v4872_v55, %v988_v30 }
 0x1a3   : > { %v2086_v27 = vsel %vm811_vm5, %v2054_v10, %v1964_v40 }
 0x1a4   : > { %4014 = vmatmul.msk.f32.gmra.mxu2 %vm1271_vm4, %v2086_v27  ;;  %v788_v27 = vsel %vm266_vm0, %v4713_v56, %v4916_v9 }
 0x1a5   : > { %1133 = vrot.lane.b32.xlu2 %v5228_v45, %s4433_s8 }
 0x1a6   : > { %1855 = vrot.lane.b32.xlu0 %v5192_v47, %s4432_s7 }
 0x1a7   : > { %v1970_v29 = vpop.permute.xlu2 %1969  ;;  %711 = vrot.lane.b32.xlu1 %v4789_v20, %s4433_s8  ;;  %v5250_v20 = vld [vmem:[#allocation2 + $0xe2] sm:$0xff] }
 0x1a8   : > { %v1966_v37 = vpop.permute.xlu0 %1965 }
 0x1a9   : > { %v1116_v42 = vpop.permute.xlu1 %1115  ;;  %v2087_v40 = vsel %vm811_vm5, %v2055_v18, %v1966_v37 }
 0x1aa   : > { %v1238_v63 = vsel %vm811_vm5, %v1206_v57, %v1116_v42 }
 0x1ab   : > { %3943 = vmatmul.msk.f32.gmra.mxu0 %vm1271_vm4, %v1238_v63  ;;  %v5329_v63 = vld [vmem:[#allocation2 + $0x10a] sm:$0xff] }
 0x1ac   : > { %4015 = vmatmul.msk.f32.gmra.mxu2 %vm1271_vm4, %v2087_v40  ;;  %v509_v40 = vld [vmem:[#allocation2 + $0x108] sm:$0xff] }
 0x1ad   : > { %1007 = vrot.lane.b32.xlu2 %v5206_v51, %s4432_s7 }
 0x1ae   : > { %713 = vrot.lane.b32.xlu0 %v4793_v21, %s4433_s8  ;;  %v5266_v21 = vld [vmem:[#allocation2 + $0xe1] sm:$0xff] }
 0x1af   : > { %v1122_v0 = vpop.permute.xlu2 %1121  ;;  %1983 = vrot.lane.b32.xlu1 %v5250_v20, %s4433_s8 }
 0x1b0   : > { %v1840_v58 = vpop.permute.xlu0 %1839 }
 0x1b1   : > { %v990_v55 = vpop.permute.xlu1 %989  ;;  %v2056_v43 = vsel %vm266_vm0, %v4902_v2, %v1840_v58 }
 0x1b2   : > { %v1207_v28 = vsel %vm266_vm0, %v4904_v3, %v990_v55 }
 0x1b3   : > { %v1239_v41 = vsel %vm811_vm5, %v1207_v28, %v1118_v54  ;;  %v6834_v28 = vmov 0.0  }
 0x1b4   : > { %3944 = vmatmul.msk.f32.gmra.mxu0 %vm1271_vm4, %v1239_v41  ;;  %2436 = vst.msk [vmem:[#allocation3 + $0x18] sm:$0xff] %vm2431_vm6, %v6834_v28 }
 0x1b5   : > { %1857 = vrot.lane.b32.xlu2 %v5212_v35, %s4432_s7  ;;  %2437 = vst.msk [vmem:[#allocation3 + $0x20] sm:$0xff] %vm2431_vm6, %v6834_v28 }
 0x1b6   : > { %1985 = vrot.lane.b32.xlu0 %v5264_v52, %s4433_s8  ;;  %2432 = vst.msk [vmem:[#allocation3] sm:$0xff] %vm2431_vm6, %v6834_v28 }
 0x1b7   : > { %v5260_v4 = vpop.permute.xlu2 %995  ;;  %1135 = vrot.lane.b32.xlu1 %v5266_v21, %s4433_s8  ;;  %2433 = vst.msk [vmem:[#allocation3 + $0x8] sm:$0xff] %vm2431_vm6, %v6834_v28 }
 0x1b8   : > { %v1120_v3 = vpop.permute.xlu0 %1119  ;;  %2439 = vst.msk [vmem:[#allocation3 + $0x30] sm:$0xff] %vm2431_vm6, %v6834_v28 }
 0x1b9   : > { %v1968_v48 = vpop.permute.xlu1 %1967  ;;  %v1240_v17 = vsel %vm811_vm5, %v1208_v13, %v1120_v3  ;;  %2440 = vst.msk [vmem:[#allocation3 + $0x38] sm:$0xff] %vm2431_vm6, %v6834_v28 }
 0x1ba   : > { %v2088_v54 = vsel %vm811_vm5, %v2056_v43, %v1968_v48  ;;  %2442 = vst.msk [vmem:[#allocation3 + $0x48] sm:$0xff] %vm2431_vm6, %v6834_v28 }
 0x1bb   : > { %4016 = vmatmul.msk.f32.gmra.mxu2 %vm1271_vm4, %v2088_v54  ;;  %2443 = vst.msk [vmem:[#allocation3 + $0x50] sm:$0xff] %vm2431_vm6, %v6834_v28  ;;  %v5391_v54 = vld [vmem:[#allocation2 + $0x111] sm:$0xff] }
 0x1bc   : > { %3945 = vmatmul.msk.f32.gmra.mxu0 %vm1271_vm4, %v1240_v17  ;;  %2445 = vst.msk [vmem:[#allocation3 + $0x60] sm:$0xff] %vm2431_vm6, %v6834_v28 }
 0x1bd   : > { %715 = vrot.lane.b32.xlu2 %v4802_v25, %s4433_s8  ;;  %v5288_v25 = vld [vmem:[#allocation2 + $0xfa] sm:$0xff]  ;;  %2446 = vst.msk [vmem:[#allocation3 + $0x68] sm:$0xff] %vm2431_vm6, %v6834_v28 }
 0x1be   : > { %1137 = vrot.lane.b32.xlu0 %v5282_v22, %s4433_s8  ;;  %2448 = vst.msk [vmem:[#allocation3 + $0x78] sm:$0xff] %vm2431_vm6, %v6834_v28 }
 0x1bf   : > { %v1846_v34 = vpop.permute.xlu2 %1845  ;;  %1009 = vrot.lane.b32.xlu1 %v5228_v45, %s4432_s7  ;;  %2449 = vst.msk [vmem:[#allocation3 + $0x80] sm:$0xff] %vm2431_vm6, %v6834_v28 }
 0x1c0   : > { %v994_v2 = vpop.permute.xlu0 %993  ;;  %v2059_v56 = vsel %vm266_vm0, %v4978_v32, %v1846_v34  ;;  %2451 = vst.msk [vmem:[#allocation3 + $0x90] sm:$0xff] %vm2431_vm6, %v6834_v28 }
 0x1c1   : > { %v1842_v5 = vpop.permute.xlu1 %1841  ;;  %v1209_v16 = vsel %vm266_vm0, %v4932_v23, %v994_v2  ;;  %2452 = vst.msk [vmem:[#allocation3 + $0x98] sm:$0xff] %vm2431_vm6, %v6834_v28 }
 0x1c2   : > { %v2057_v49 = vsel %vm266_vm0, %v4934_v24, %v1842_v5  ;;  %v1241_v60 = vsel %vm811_vm5, %v1209_v16, %v1122_v0  ;;  %v787_v24 = vsel %vm266_vm0, %v4747_v11, %v4894_v62  ;;  %v1210_v0 = vsel %vm266_vm0, %v4980_v33, %v5260_v4  ;;  %v510_v33 = vld [vmem:[#allocation2 + $0x110] sm:$0xff]  ;;  %2454 = vst.msk [vmem:[#allocation3 + $0xa8] sm:$0xff] %vm2431_vm6, %v6834_v28 }
 0x1c3   : > { %v2089_v7 = vsel %vm811_vm5, %v2057_v49, %v1970_v29  ;;  %v508_v29 = vld [vmem:[#allocation2 + $0xf8] sm:$0xff]  ;;  %2455 = vst.msk [vmem:[#allocation3 + $0xb0] sm:$0xff] %vm2431_vm6, %v6834_v28 }
 0x1c4   : > { %3946 = vmatmul.msk.f32.gmra.mxu0 %vm1271_vm4, %v1241_v60  ;;  %4017 = vmatmul.msk.f32.gmra.mxu2 %vm1271_vm4, %v2089_v7  ;;  %2457 = vst.msk [vmem:[#allocation3 + $0xc0] sm:$0xff] %vm2431_vm6, %v6834_v28 }
 0x1c5   : > { %1987 = vrot.lane.b32.xlu2 %v5288_v25, %s4433_s8  ;;  %2458 = vst.msk [vmem:[#allocation3 + $0xc8] sm:$0xff] %vm2431_vm6, %v6834_v28 }
 0x1c6   : > { %1011 = vrot.lane.b32.xlu0 %v5266_v21, %s4432_s7  ;;  %2460 = vst.msk [vmem:[#allocation3 + $0xd8] sm:$0xff] %vm2431_vm6, %v6834_v28 }
 0x1c7   : > { %v704_v31 = vpop.permute.xlu2 %703  ;;  %1859 = vrot.lane.b32.xlu1 %v5250_v20, %s4432_s7  ;;  %2461 = vst.msk [vmem:[#allocation3 + $0xe0] sm:$0xff] %vm2431_vm6, %v6834_v28 }
 0x1c8   : > { %v1844_v23 = vpop.permute.xlu0 %1843  ;;  %2463 = vst.msk [vmem:[#allocation3 + $0xf0] sm:$0xff] %vm2431_vm6, %v6834_v28 }
 0x1c9   : > { %v700_v30 = vpop.permute.xlu1 %699  ;;  %v2058_v11 = vsel %vm266_vm0, %v4940_v26, %v1844_v23  ;;  %v789_v26 = vsel %vm266_vm0, %v4741_v8, %v4852_v46  ;;  %v5360_v8 = vld [vmem:[#allocation2 + $0x112] sm:$0xff]  ;;  %v5364_v46 = vld [vmem:[#allocation2 + $0x109] sm:$0xff]  ;;  %2464 = vst.msk [vmem:[#allocation3 + $0xf8] sm:$0xff] %vm2431_vm6, %v6834_v28 }
 0x1ca   : > { %v820_v44 = vsel %vm811_vm5, %v787_v24, %v700_v30  ;;  %v822_v41 = vsel %vm811_vm5, %v789_v26, %v704_v31  ;;  %2466 = vst.msk [vmem:[#allocation3 + $0x108] sm:$0xff] %vm2431_vm6, %v6834_v28  ;;  %v6835_v23 = vld [vmem:[#allocation5_spill] sm:$0xff]  ;;  %v6838_v26 = vld [vmem:[#allocation23_spill] sm:$0xff] }
 0x1cb   : > { %3979 = vmatmul.msk.f32.gmra.mxu1 %vm1271_vm4, %v820_v44  ;;  %2467 = vst.msk [vmem:[#allocation3 + $0x110] sm:$0xff] %vm2431_vm6, %v6834_v28  ;;  %v790_v24 = vsel %vm266_vm0, %v6835_v23, %v4912_v6 }
 0x1cc   : > { %2469 = vst.msk [vmem:[#allocation3 + $0x120] sm:$0xff] %vm2431_vm6, %v6834_v28 }
 0x1cd   : > { %1139 = vrot.lane.b32.xlu2 %v5304_v59, %s4433_s8  ;;  %2470 = vst.msk [vmem:[#allocation3 + $0x128] sm:$0xff] %vm2431_vm6, %v6834_v28 }
 0x1ce   : > { %1861 = vrot.lane.b32.xlu0 %v5264_v52, %s4432_s7  ;;  %2472 = vst.msk [vmem:[#allocation3 + $0x138] sm:$0xff] %vm2431_vm6, %v6834_v28 }
 0x1cf   : > { %v5312_v10 = vpop.permute.xlu2 %1975  ;;  %717 = vrot.lane.b32.xlu1 %v508_v29, %s4433_s8  ;;  %v5452_v29 = vld [vmem:[%s6786_s3] ss:$0 sm:$0xff]  ;;  %2473 = vst.msk [vmem:[#allocation3 + $0x140] sm:$0xff] %vm2431_vm6, %v6834_v28 }
 0x1d0   : > { %v702_v18 = vpop.permute.xlu0 %701  ;;  %2475 = vst.msk [vmem:[#allocation3 + $0x150] sm:$0xff] %vm2431_vm6, %v6834_v28 }
 0x1d1   : > { %v1972_v62 = vpop.permute.xlu1 %1971  ;;  %v821_v37 = vsel %vm811_vm5, %v788_v27, %v702_v18  ;;  %2476 = vst.msk [vmem:[#allocation3 + $0x158] sm:$0xff] %vm2431_vm6, %v6834_v28 }
 0x1d2   : > { %v2090_v57 = vsel %vm811_vm5, %v2058_v11, %v1972_v62  ;;  %2478 = vst.msk [vmem:[#allocation3 + $0x168] sm:$0xff] %vm2431_vm6, %v6834_v28 }
 0x1d3   : > { %3980 = vmatmul.msk.f32.gmra.mxu1 %vm1271_vm4, %v821_v37  ;;  %4018 = vmatmul.msk.f32.gmra.mxu2 %vm1271_vm4, %v2090_v57  ;;  %v511_v37 = vld [vmem:[#allocation2 + $0x120] sm:$0xff]  ;;  %v6836_v57 = vld [vmem:[#allocation11_spill] sm:$0xff]  ;;  %2479 = vst.msk [vmem:[#allocation3 + $0x170] sm:$0xff] %vm2431_vm6, %v6834_v28 }
 0x1d4   : > { %2481 = vst.msk [vmem:[#allocation3 + $0x180] sm:$0xff] %vm2431_vm6, %v6834_v28 }
 0x1d5   : > { %1013 = vrot.lane.b32.xlu2 %v5282_v22, %s4432_s7  ;;  %2482 = vst.msk [vmem:[#allocation3 + $0x188] sm:$0xff] %vm2431_vm6, %v6834_v28 }
 0x1d6   : > { %719 = vrot.lane.b32.xlu0 %v509_v40, %s4433_s8  ;;  %2484 = vst.msk [vmem:[#allocation3 + $0x198] sm:$0xff] %vm2431_vm6, %v6834_v28 }
 0x1d7   : > { %v1128_v42 = vpop.permute.xlu2 %1127  ;;  %1989 = vrot.lane.b32.xlu1 %v5329_v63, %s4433_s8  ;;  %2485 = vst.msk [vmem:[#allocation3 + $0x1a0] sm:$0xff] %vm2431_vm6, %v6834_v28 }
 0x1d8   : > { %v1974_v9 = vpop.permute.xlu0 %1973  ;;  %2438 = vst.msk [vmem:[#allocation3 + $0x28] sm:$0x3] %vm2434_vm7, %v6834_v28 }
 0x1d9   : > { %v1124_v58 = vpop.permute.xlu1 %1123  ;;  %v2091_v55 = vsel %vm811_vm5, %v2059_v56, %v1974_v9  ;;  %2435 = vst.msk [vmem:[#allocation3 + $0x10] sm:$0x3] %vm2434_vm7, %v6834_v28 }
 0x1da   : > { %v1242_v32 = vsel %vm811_vm5, %v1210_v0, %v1124_v58  ;;  %2441 = vst.msk [vmem:[#allocation3 + $0x40] sm:$0x3] %vm2434_vm7, %v6834_v28 }
 0x1db   : > { %3947 = vmatmul.msk.f32.gmra.mxu0 %vm1271_vm4, %v1242_v32  ;;  %3981 = vmatmul.msk.f32.gmra.mxu1 %vm1271_vm4, %v822_v41  ;;  %2444 = vst.msk [vmem:[#allocation3 + $0x58] sm:$0x3] %vm2434_vm7, %v6834_v28 }
 0x1dc   : > { %4019 = vmatmul.msk.f32.gmra.mxu2 %vm1271_vm4, %v2091_v55  ;;  %2447 = vst.msk [vmem:[#allocation3 + $0x70] sm:$0x3] %vm2434_vm7, %v6834_v28 }
 0x1dd   : > { %1863 = vrot.lane.b32.xlu2 %v5288_v25, %s4432_s7  ;;  %2450 = vst.msk [vmem:[#allocation3 + $0x88] sm:$0x3] %vm2434_vm7, %v6834_v28 }
 0x1de   : > { %1991 = vrot.lane.b32.xlu0 %v5360_v8, %s4433_s8  ;;  %2453 = vst.msk [vmem:[#allocation3 + $0xa0] sm:$0x3] %vm2434_vm7, %v6834_v28 }
 0x1df   : > { %v5349_v13 = vpop.permute.xlu2 %1001  ;;  %1141 = vrot.lane.b32.xlu1 %v5364_v46, %s4433_s8  ;;  %2456 = vst.msk [vmem:[#allocation3 + $0xb8] sm:$0x3] %vm2434_vm7, %v6834_v28 }
 0x1e0   : > { %v1126_v4 = vpop.permute.xlu0 %1125  ;;  %2459 = vst.msk [vmem:[#allocation3 + $0xd0] sm:$0x3] %vm2434_vm7, %v6834_v28 }
 0x1e1   : > { %v998_v3 = vpop.permute.xlu1 %997  ;;  %2462 = vst.msk [vmem:[#allocation3 + $0xe8] sm:$0x3] %vm2434_vm7, %v6834_v28 }
 0x1e2   : > { %v1211_v43 = vsel %vm266_vm0, %v4986_v1, %v998_v3  ;;  %v5401_v1 = vld [vmem:[#allocation2 + $0x122] sm:$0xff]  ;;  %2465 = vst.msk [vmem:[#allocation3 + $0x100] sm:$0x3] %vm2434_vm7, %v6834_v28 }
 0x1e3   : > { %v1243_v17 = vsel %vm811_vm5, %v1211_v43, %v1126_v4  ;;  %v512_v43 = vld [vmem:[#allocation2 + $0x128] sm:$0xff]  ;;  %2468 = vst.msk [vmem:[#allocation3 + $0x118] sm:$0x3] %vm2434_vm7, %v6834_v28 }
 0x1e4   : > { %3948 = vmatmul.msk.f32.gmra.mxu0 %vm1271_vm4, %v1243_v17  ;;  %2471 = vst.msk [vmem:[#allocation3 + $0x130] sm:$0x3] %vm2434_vm7, %v6834_v28 }
 0x1e5   : > { %721 = vrot.lane.b32.xlu2 %v510_v33, %s4433_s8  ;;  %2474 = vst.msk [vmem:[#allocation3 + $0x148] sm:$0x3] %vm2434_vm7, %v6834_v28 }
 0x1e6   : > { %1143 = vrot.lane.b32.xlu0 %v5391_v54, %s4433_s8  ;;  %2477 = vst.msk [vmem:[#allocation3 + $0x160] sm:$0x3] %vm2434_vm7, %v6834_v28 }
 0x1e7   : > { %v5381_v48 = vpop.permute.xlu2 %1851  ;;  %1015 = vrot.lane.b32.xlu1 %v5304_v59, %s4432_s7  ;;  %2480 = vst.msk [vmem:[#allocation3 + $0x178] sm:$0x3] %vm2434_vm7, %v6834_v28 }
 0x1e8   : > { %v1000_v34 = vpop.permute.xlu0 %999  ;;  %2483 = vst.msk [vmem:[#allocation3 + $0x190] sm:$0x3] %vm2434_vm7, %v6834_v28 }
 0x1e9   : > { %v1848_v2 = vpop.permute.xlu1 %1847  ;;  %v1212_v5 = vsel %vm266_vm0, %v5018_v36, %v1000_v34  ;;  %v1601_v36 = vpop.f32.mrf.mxu1  ;;  %v5500_v34 = vld [vmem:[#allocation2 + $0x12a] sm:$0xff]  ;;  %2486 = vst.msk [vmem:[#allocation3 + $0x1a8] sm:$0x3] %vm2434_vm7, %v6834_v28 }
 0x1ea   : > { %v2060_v16 = vsel %vm266_vm0, %v5020_v15, %v1848_v2  ;;  %v1244_v49 = vsel %vm811_vm5, %v1212_v5, %v1128_v42  ;;  %v5438_v15 = vld [vmem:[#allocation2 + $0x121] sm:$0xff]  ;;  %v2062_v5 = vsel %vm266_vm0, %v5080_v14, %v5381_v48 }
 0x1eb   : > { %v2092_v31 = vsel %vm811_vm5, %v2060_v16, %v5312_v10  ;;  %v6837_v42 = vld [vmem:[#allocation4_spill] sm:$0xff] }
 0x1ec   : > { %3949 = vmatmul.msk.f32.gmra.mxu0 %vm1271_vm4, %v1244_v49  ;;  %4020 = vmatmul.msk.f32.gmra.mxu2 %vm1271_vm4, %v2092_v31  ;;  %v791_v40 = vsel %vm266_vm0, %v6837_v42, %v6836_v57  ;;  %v4402_v49 = vld [vmem:[#allocation2 + $0x98] sm:$0xff]  ;;  %v6839_v31 = vld [vmem:[#allocation6_spill] sm:$0xff] }
 0x1ed   : > { %1993 = vrot.lane.b32.xlu2 %v5401_v1, %s4433_s8  ;;  %v2235_v11 = vpop.f32.mrf.mxu2 }
 0x1ee   : > { %1017 = vrot.lane.b32.xlu0 %v5364_v46, %s4432_s7 }
 0x1ef   : > { %v5416_v60 = vpop.permute.xlu2 %709  ;;  %1865 = vrot.lane.b32.xlu1 %v5329_v63, %s4432_s7 }
 0x1f0   : > { %v1850_v7 = vpop.permute.xlu0 %1849 }
 0x1f1   : > { %v1389_v30 = vpop.f32.mrf.mxu0  ;;  %v706_v44 = vpop.permute.xlu1 %705  ;;  %v2061_v0 = vsel %vm266_vm0, %v6838_v26, %v1850_v7  ;;  %v6840_v7 = vld [vmem:[#allocation26_spill] sm:$0xff] }
 0x1f2   : > { %v1602_v10 = vadd.f32 %v1601_v36, %v1389_v30  ;;  %v823_v27 = vsel %vm811_vm5, %v790_v24, %v706_v44  ;;  %v1604_v4 = vpop.f32.mrf.mxu1  ;;  %v792_v36 = vsel %vm266_vm0, %v4402_v49, %v6839_v31  ;;  %v1213_v23 = vsel %vm266_vm0, %v6840_v7, %v5349_v13  ;;  %v5538_v13 = vld [vmem:[#allocation2 + $0x13a] sm:$0xff] }
 0x1f3   : > { %3982 = vmatmul.msk.f32.gmra.mxu1 %vm1271_vm4, %v823_v27  ;;  %v825_v44 = vsel %vm811_vm5, %v792_v36, %v5416_v60 }
 0x1f4   : > { %v2331_v6 = vadd.f32 %v2235_v11, %v1602_v10  ;;  %v5542_v11 = vld [vmem:[#allocation2 + $0x129] sm:$0xff] }
 0x1f5   : > { %1145 = vrot.lane.b32.xlu2 %v5438_v15, %s4433_s8 }
 0x1f6   : > { %v2367_v62 = vadd.f32 %v5452_v29, %v2331_v6  ;;  %1867 = vrot.lane.b32.xlu0 %v5360_v8, %s4432_s7  ;;  %v513_v6 = vld [vmem:[#allocation2 + $0x138] sm:$0xff] }
 0x1f7   : > { %v5457_v18 = vpop.permute.xlu2 %1981  ;;  %723 = vrot.lane.b32.xlu1 %v511_v37, %s4433_s8 }
 0x1f8   : > { %v2399_v56 = vmax.f32 %v2367_v62, 0.0  ;;  %v708_v9 = vpop.permute.xlu0 %707 }
 0x1f9   : > { %v1978_v58 = vpop.permute.xlu1 %1977  ;;  %v824_v55 = vsel %vm811_vm5, %v791_v40, %v708_v9  ;;  %v1392_v32 = vpop.f32.mrf.mxu0 }
 0x1fa   : > { %2488 = vst.msk [vmem:[#allocation3 + $0x19] sm:$0xff] %vm2431_vm6, %v2399_v56  ;;  %v2093_v41 = vsel %vm811_vm5, %v2061_v0, %v1978_v58  ;;  %v1605_v3 = vadd.f32 %v1604_v4, %v1392_v32  ;;  %v1607_v60 = vpop.f32.mrf.mxu1  ;;  %v5580_v32 = vld [vmem:[#allocation2 + $0x142] sm:$0xff] }
 0x1fb   : > { %3983 = vmatmul.msk.f32.gmra.mxu1 %vm1271_vm4, %v824_v55  ;;  %4021 = vmatmul.msk.f32.gmra.mxu2 %vm1271_vm4, %v2093_v41  ;;  %v5570_v55 = vld [vmem:[#allocation2 + $0x139] sm:$0xff] }
 0x1fd   : > { %1019 = vrot.lane.b32.xlu2 %v5391_v54, %s4432_s7 }
 0x1fe   : > { %v2238_v17 = vpop.f32.mrf.mxu2  ;;  %725 = vrot.lane.b32.xlu0 %v512_v43, %s4433_s8 }
 0x1ff   : > { %v5488_v33 = vpop.permute.xlu2 %1133  ;;  %v2332_v2 = vadd.f32 %v2238_v17, %v1605_v3  ;;  %1995 = vrot.lane.b32.xlu1 %v5500_v34, %s4433_s8 }
 0x200   : > { %v1980_v16 = vpop.permute.xlu0 %1979 }
 0x201   : > { %v2368_v24 = vadd.f32 %v5452_v29, %v2332_v2  ;;  %v1130_v14 = vpop.permute.xlu1 %1129  ;;  %v2094_v48 = vsel %vm811_vm5, %v2062_v5, %v1980_v16 }
 0x202   : > { %v1245_v30 = vsel %vm811_vm5, %v1213_v23, %v1130_v14  ;;  %v1610_v41 = vpop.f32.mrf.mxu1 }
 0x203   : > { %v2400_v27 = vmax.f32 %v2368_v24, 0.0  ;;  %3950 = vmatmul.msk.f32.gmra.mxu0 %vm1271_vm4, %v1245_v30  ;;  %3984 = vmatmul.msk.f32.gmra.mxu1 %vm1271_vm4, %v825_v44 }
 0x204   : > { %4022 = vmatmul.msk.f32.gmra.mxu2 %vm1271_vm4, %v2094_v48 }
 0x205   : > { %1869 = vrot.lane.b32.xlu2 %v5401_v1, %s4432_s7  ;;  %2489 = vst.msk [vmem:[#allocation3 + $0x21] sm:$0xff] %vm2431_vm6, %v2400_v27 }
 0x206   : > { %1997 = vrot.lane.b32.xlu0 %v5538_v13, %s4433_s8 }
 0x207   : > { %v5528_v10 = vpop.permute.xlu2 %1007  ;;  %1147 = vrot.lane.b32.xlu1 %v5542_v11, %s4433_s8  ;;  %v2241_v62 = vpop.f32.mrf.mxu2 }
 0x208   : > { %v1395_v37 = vpop.f32.mrf.mxu0  ;;  %v1132_v40 = vpop.permute.xlu0 %1131 }
 0x209   : > { %v1608_v57 = vadd.f32 %v1607_v60, %v1395_v37  ;;  %v1004_v42 = vpop.permute.xlu1 %1003 }
 0x20a   : > { %v1214_v56 = vsel %vm266_vm0, %v5098_v38, %v1004_v42  ;;  %v1613_v27 = vpop.f32.mrf.mxu1 }
 0x20b   : > { %v2333_v26 = vadd.f32 %v2241_v62, %v1608_v57  ;;  %v1246_v0 = vsel %vm811_vm5, %v1214_v56, %v1132_v40  ;;  %v514_v62 = vld [vmem:[#allocation2 + $0x140] sm:$0xff]  ;;  %v4404_v56 = vld [vmem:[#allocation2 + $0xb0] sm:$0xff] }
 0x20c   : > { %3951 = vmatmul.msk.f32.gmra.mxu0 %vm1271_vm4, %v1246_v0 }
 0x20d   : > { %727 = vrot.lane.b32.xlu2 %v513_v6, %s4433_s8  ;;  %v2369_v58 = vadd.f32 %v5452_v29, %v2333_v26  ;;  %v6842_v26 = vld [vmem:[#allocation14_spill] sm:$0xff] }
 0x20e   : > { %1149 = vrot.lane.b32.xlu0 %v5570_v55, %s4433_s8  ;;  %v794_v0 = vsel %vm266_vm0, %v4404_v56, %v6842_v26 }
 0x20f   : > { %v5559_v9 = vpop.permute.xlu2 %1857  ;;  %v2401_v38 = vmax.f32 %v2369_v58, 0.0  ;;  %1021 = vrot.lane.b32.xlu1 %v5438_v15, %s4432_s7  ;;  %v2244_v16 = vpop.f32.mrf.mxu2 }
 0x210   : > { %v1006_v2 = vpop.permute.xlu0 %1005 }
 0x211   : > { %2490 = vst.msk [vmem:[#allocation3 + $0x31] sm:$0xff] %vm2431_vm6, %v2401_v38  ;;  %v1854_v4 = vpop.permute.xlu1 %1853  ;;  %v1398_v3 = vpop.f32.mrf.mxu0  ;;  %v1215_v49 = vsel %vm266_vm0, %v5116_v61, %v1006_v2  ;;  %v5604_v61 = vld [vmem:[#allocation2 + $0x141] sm:$0xff] }
 0x212   : > { %v2063_v43 = vsel %vm266_vm0, %v5096_v39, %v1854_v4  ;;  %v1611_v17 = vadd.f32 %v1610_v41, %v1398_v3  ;;  %v1247_v36 = vsel %vm811_vm5, %v1215_v49, %v5488_v33  ;;  %v6841_v33 = vld [vmem:[#allocation10_spill] sm:$0xff] }
 0x213   : > { %v2095_v28 = vsel %vm811_vm5, %v2063_v43, %v5457_v18  ;;  %v4403_v18 = vld [vmem:[#allocation2 + $0xa8] sm:$0xff]  ;;  %v1616_v43 = vpop.f32.mrf.mxu1 }
 0x214   : > { %v2334_v31 = vadd.f32 %v2244_v16, %v1611_v17  ;;  %4023 = vmatmul.msk.f32.gmra.mxu2 %vm1271_vm4, %v2095_v28  ;;  %3952 = vmatmul.msk.f32.gmra.mxu0 %vm1271_vm4, %v1247_v36  ;;  %v793_v23 = vsel %vm266_vm0, %v4403_v18, %v6841_v33  ;;  %v5632_v17 = vld [vmem:[#allocation2 + $0x152] sm:$0xff]  ;;  %v1216_v16 = vsel %vm266_vm0, %v5138_v53, %v5528_v10  ;;  %v4405_v36 = vld [vmem:[#allocation2 + $0xc0] sm:$0xff] }
 0x215   : > { %1999 = vrot.lane.b32.xlu2 %v5580_v32, %s4433_s8  ;;  %v2065_v18 = vsel %vm266_vm0, %v5170_v12, %v5559_v9  ;;  %v5657_v12 = vld [vmem:[#allocation2 + $0x15a] sm:$0xff]  ;;  %v5659_v9 = vld [vmem:[#allocation2 + $0x151] sm:$0xff] }
 0x216   : > { %v2370_v39 = vadd.f32 %v5452_v29, %v2334_v31  ;;  %1023 = vrot.lane.b32.xlu0 %v5542_v11, %s4432_s7 }
 0x217   : > { %v5589_v5 = vpop.permute.xlu2 %715  ;;  %1871 = vrot.lane.b32.xlu1 %v5500_v34, %s4432_s7 }
 0x218   : > { %v2402_v7 = vmax.f32 %v2370_v39, 0.0  ;;  %v1856_v48 = vpop.permute.xlu0 %1855  ;;  %v6843_v39 = vld [vmem:[#allocation7_spill] sm:$0xff] }
 0x219   : > { %v712_v24 = vpop.permute.xlu1 %711  ;;  %v1401_v14 = vpop.f32.mrf.mxu0  ;;  %v2064_v57 = vsel %vm266_vm0, %v5122_v19, %v1856_v48  ;;  %v515_v19 = vld [vmem:[#allocation2 + $0x150] sm:$0xff] }
 0x21a   : > { %2491 = vst.msk [vmem:[#allocation3 + $0x39] sm:$0xff] %vm2431_vm6, %v2402_v7  ;;  %v826_v30 = vsel %vm811_vm5, %v793_v23, %v712_v24  ;;  %v1614_v60 = vadd.f32 %v1613_v27, %v1401_v14  ;;  %v795_v7 = vsel %vm266_vm0, %v4405_v36, %v6843_v39 }
 0x21b   : > { %3985 = vmatmul.msk.f32.gmra.mxu1 %vm1271_vm4, %v826_v30  ;;  %v828_v53 = vsel %vm811_vm5, %v795_v7, %v5589_v5  ;;  %v516_v5 = vld [vmem:[#allocation2 + $0x158] sm:$0xff]  ;;  %v1619_v27 = vpop.f32.mrf.mxu1 }
 0x21d   : > { %1151 = vrot.lane.b32.xlu2 %v5604_v61, %s4433_s8 }
 0x21e   : > { %v2247_v6 = vpop.f32.mrf.mxu2  ;;  %1873 = vrot.lane.b32.xlu0 %v5538_v13, %s4432_s7 }
 0x21f   : > { %v5612_v44 = vpop.permute.xlu2 %1987  ;;  %v2335_v37 = vadd.f32 %v2247_v6, %v1614_v60  ;;  %729 = vrot.lane.b32.xlu1 %v514_v62, %s4433_s8 }
 0x220   : > { %v714_v58 = vpop.permute.xlu0 %713 }
 0x221   : > { %v2371_v42 = vadd.f32 %v5452_v29, %v2335_v37  ;;  %v1984_v40 = vpop.permute.xlu1 %1983  ;;  %v827_v3 = vsel %vm811_vm5, %v794_v0, %v714_v58  ;;  %v5673_v0 = vld [vmem:[#allocation2 + $0x159] sm:$0xff] }
 0x222   : > { %v2096_v38 = vsel %vm811_vm5, %v2064_v57, %v1984_v40 }
 0x223   : > { %v2403_v4 = vmax.f32 %v2371_v42, 0.0  ;;  %4024 = vmatmul.msk.f32.gmra.mxu2 %vm1271_vm4, %v2096_v38  ;;  %3986 = vmatmul.msk.f32.gmra.mxu1 %vm1271_vm4, %v827_v3 }
 0x225   : > { %1025 = vrot.lane.b32.xlu2 %v5570_v55, %s4432_s7  ;;  %2492 = vst.msk [vmem:[#allocation3 + $0x49] sm:$0xff] %vm2431_vm6, %v2403_v4 }
 0x226   : > { %731 = vrot.lane.b32.xlu0 %v515_v19, %s4433_s8 }
 0x227   : > { %v5626_v41 = vpop.permute.xlu2 %1139  ;;  %2001 = vrot.lane.b32.xlu1 %v5632_v17, %s4433_s8  ;;  %v2250_v49 = vpop.f32.mrf.mxu2 }
 0x228   : > { %v1404_v2 = vpop.f32.mrf.mxu0  ;;  %v1986_v33 = vpop.permute.xlu0 %1985 }
 0x229   : > { %v1617_v28 = vadd.f32 %v1616_v43, %v1404_v2  ;;  %v1136_v31 = vpop.permute.xlu1 %1135  ;;  %v2097_v10 = vsel %vm811_vm5, %v2065_v18, %v1986_v33 }
 0x22a   : > { %v1248_v23 = vsel %vm811_vm5, %v1216_v16, %v1136_v31 }
 0x22b   : > { %v2336_v14 = vadd.f32 %v2250_v49, %v1617_v28  ;;  %3953 = vmatmul.msk.f32.gmra.mxu0 %vm1271_vm4, %v1248_v23  ;;  %3987 = vmatmul.msk.f32.gmra.mxu1 %vm1271_vm4, %v828_v53  ;;  %v1622_v28 = vpop.f32.mrf.mxu1 }
 0x22c   : > { %4025 = vmatmul.msk.f32.gmra.mxu2 %vm1271_vm4, %v2097_v10 }
 0x22d   : > { %1875 = vrot.lane.b32.xlu2 %v5580_v32, %s4432_s7  ;;  %v2372_v48 = vadd.f32 %v5452_v29, %v2336_v14 }
 0x22e   : > { %2003 = vrot.lane.b32.xlu0 %v5657_v12, %s4433_s8 }
 0x22f   : > { %v5648_v24 = vpop.permute.xlu2 %1013  ;;  %v2404_v30 = vmax.f32 %v2372_v48, 0.0  ;;  %1153 = vrot.lane.b32.xlu1 %v5659_v9, %s4433_s8  ;;  %v2253_v40 = vpop.f32.mrf.mxu2  ;;  %v517_v48 = vld [vmem:[#allocation2 + $0x168] sm:$0xff] }
 0x230   : > { %v1138_v57 = vpop.permute.xlu0 %1137 }
 0x231   : > { %2493 = vst.msk [vmem:[#allocation3 + $0x51] sm:$0xff] %vm2431_vm6, %v2404_v30  ;;  %v1010_v60 = vpop.permute.xlu1 %1009  ;;  %v1407_v6 = vpop.f32.mrf.mxu0 }
 0x232   : > { %v1217_v62 = vsel %vm266_vm0, %v5194_v50, %v1010_v60  ;;  %v1620_v37 = vadd.f32 %v1619_v27, %v1407_v6  ;;  %v5680_v50 = vld [vmem:[#allocation2 + $0x16a] sm:$0xff] }
 0x233   : > { %v1249_v56 = vsel %vm811_vm5, %v1217_v62, %v1138_v57  ;;  %v6845_v57 = vld [vmem:[#allocation17_spill] sm:$0xff] }
 0x234   : > { %v2337_v26 = vadd.f32 %v2253_v40, %v1620_v37  ;;  %3954 = vmatmul.msk.f32.gmra.mxu0 %vm1271_vm4, %v1249_v56  ;;  %v4407_v37 = vld [vmem:[#allocation2 + $0xd8] sm:$0xff] }
 0x235   : > { %733 = vrot.lane.b32.xlu2 %v516_v5, %s4433_s8  ;;  %v797_v40 = vsel %vm266_vm0, %v4407_v37, %v6845_v57  ;;  %v1790_v37 = vld [vmem:[#allocation2 + $0x18a] sm:$0xff] }
 0x236   : > { %v2373_v58 = vadd.f32 %v5452_v29, %v2337_v26  ;;  %1155 = vrot.lane.b32.xlu0 %v5673_v0, %s4433_s8 }
 0x237   : > { %v5669_v42 = vpop.permute.xlu2 %1863  ;;  %1027 = vrot.lane.b32.xlu1 %v5604_v61, %s4432_s7 }
 0x238   : > { %v2405_v38 = vmax.f32 %v2373_v58, 0.0  ;;  %v1012_v43 = vpop.permute.xlu0 %1011 }
 0x239   : > { %v1860_v4 = vpop.permute.xlu1 %1859  ;;  %v1410_v3 = vpop.f32.mrf.mxu0  ;;  %v1218_v16 = vsel %vm266_vm0, %v5206_v51, %v1012_v43  ;;  %v5699_v51 = vld [vmem:[#allocation2 + $0x169] sm:$0xff] }
 0x23a   : > { %2494 = vst.msk [vmem:[#allocation3 + $0x61] sm:$0xff] %vm2431_vm6, %v2405_v38  ;;  %v2066_v19 = vsel %vm266_vm0, %v5192_v47, %v1860_v4  ;;  %v1250_v31 = vsel %vm811_vm5, %v1218_v16, %v5626_v41  ;;  %v1623_v36 = vadd.f32 %v1622_v28, %v1410_v3  ;;  %v6844_v41 = vld [vmem:[#allocation13_spill] sm:$0xff]  ;;  %v518_v3 = vld [vmem:[#allocation2 + $0x170] sm:$0xff]  ;;  %v1219_v16 = vsel %vm266_vm0, %v5228_v45, %v5648_v24  ;;  %v4408_v28 = vld [vmem:[#allocation2 + $0xe0] sm:$0xff] }
 0x23b   : > { %v2098_v49 = vsel %vm811_vm5, %v2066_v19, %v5612_v44  ;;  %v4406_v44 = vld [vmem:[#allocation2 + $0xc8] sm:$0xff]  ;;  %v5727_v19 = vld [vmem:[#allocation2 + $0x172] sm:$0xff] }
 0x23c   : > { %4026 = vmatmul.msk.f32.gmra.mxu2 %vm1271_vm4, %v2098_v49  ;;  %3955 = vmatmul.msk.f32.gmra.mxu0 %vm1271_vm4, %v1250_v31  ;;  %v796_v7 = vsel %vm266_vm0, %v4406_v44, %v6844_v41  ;;  %v6846_v31 = vld [vmem:[#allocation8_spill] sm:$0xff] }
 0x23d   : > { %2005 = vrot.lane.b32.xlu2 %v5680_v50, %s4433_s8 }
 0x23e   : > { %v2256_v39 = vpop.f32.mrf.mxu2  ;;  %1029 = vrot.lane.b32.xlu0 %v5659_v9, %s4432_s7 }
 0x23f   : > { %v722_v2 = vpop.permute.xlu2 %721  ;;  %v2338_v47 = vadd.f32 %v2256_v39, %v1623_v36  ;;  %1877 = vrot.lane.b32.xlu1 %v5632_v17, %s4432_s7  ;;  %v798_v36 = vsel %vm266_vm0, %v4408_v28, %v6846_v31  ;;  %v2068_v39 = vsel %vm266_vm0, %v5250_v20, %v5669_v42  ;;  %v519_v20 = vld [vmem:[#allocation2 + $0x180] sm:$0xff] }
 0x240   : > { %v1862_v23 = vpop.permute.xlu0 %1861  ;;  %v831_v45 = vsel %vm811_vm5, %v798_v36, %v722_v2 }
 0x241   : > { %v2374_v18 = vadd.f32 %v5452_v29, %v2338_v47  ;;  %v718_v33 = vpop.permute.xlu1 %717  ;;  %v1413_v30 = vpop.f32.mrf.mxu0  ;;  %v2067_v27 = vsel %vm266_vm0, %v5212_v35, %v1862_v23 }
 0x242   : > { %v829_v14 = vsel %vm811_vm5, %v796_v7, %v718_v33  ;;  %v1789_v7 = vld [vmem:[#allocation2 + $0x182] sm:$0xff]  ;;  %v5751_v33 = vld [vmem:[#allocation2 + $0x171] sm:$0xff] }
 0x243   : > { %v2406_v10 = vmax.f32 %v2374_v18, 0.0  ;;  %3988 = vmatmul.msk.f32.gmra.mxu1 %vm1271_vm4, %v829_v14 }
 0x245   : > { %1157 = vrot.lane.b32.xlu2 %v5699_v51, %s4433_s8  ;;  %2495 = vst.msk [vmem:[#allocation3 + $0x69] sm:$0xff] %vm2431_vm6, %v2406_v10 }
 0x246   : > { %1879 = vrot.lane.b32.xlu0 %v5657_v12, %s4432_s7 }
 0x247   : > { %v5707_v53 = vpop.permute.xlu2 %1993  ;;  %735 = vrot.lane.b32.xlu1 %v517_v48, %s4433_s8  ;;  %v2259_v60 = vpop.f32.mrf.mxu2 }
 0x248   : > { %v1625_v5 = vpop.f32.mrf.mxu1  ;;  %v720_v56 = vpop.permute.xlu0 %719 }
 0x249   : > { %v1626_v6 = vadd.f32 %v1625_v5, %v1413_v30  ;;  %v1990_v62 = vpop.permute.xlu1 %1989  ;;  %v830_v4 = vsel %vm811_vm5, %v797_v40, %v720_v56 }
 0x24a   : > { %v2099_v26 = vsel %vm811_vm5, %v2067_v27, %v1990_v62 }
 0x24b   : > { %v2339_v38 = vadd.f32 %v2259_v60, %v1626_v6  ;;  %4027 = vmatmul.msk.f32.gmra.mxu2 %vm1271_vm4, %v2099_v26  ;;  %3989 = vmatmul.msk.f32.gmra.mxu1 %vm1271_vm4, %v830_v4  ;;  %v941_v6 = vld [vmem:[#allocation2 + $0x181] sm:$0xff] }
 0x24d   : > { %1031 = vrot.lane.b32.xlu2 %v5673_v0, %s4432_s7  ;;  %v2375_v35 = vadd.f32 %v5452_v29, %v2339_v38 }
 0x24e   : > { %737 = vrot.lane.b32.xlu0 %v518_v3, %s4433_s8 }
 0x24f   : > { %v5721_v58 = vpop.permute.xlu2 %1145  ;;  %v2407_v43 = vmax.f32 %v2375_v35, 0.0  ;;  %2007 = vrot.lane.b32.xlu1 %v5727_v19, %s4433_s8 }
 0x250   : > { %v1992_v47 = vpop.permute.xlu0 %1991  ;;  %v1628_v18 = vpop.f32.mrf.mxu1 }
 0x251   : > { %2496 = vst.msk [vmem:[#allocation3 + $0x79] sm:$0xff] %vm2431_vm6, %v2407_v43  ;;  %v1142_v49 = vpop.permute.xlu1 %1141  ;;  %v2100_v24 = vsel %vm811_vm5, %v2068_v39, %v1992_v47 }
 0x252   : > { %v1251_v44 = vsel %vm811_vm5, %v1219_v16, %v1142_v49 }
 0x253   : > { %3956 = vmatmul.msk.f32.gmra.mxu0 %vm1271_vm4, %v1251_v44  ;;  %3990 = vmatmul.msk.f32.gmra.mxu1 %vm1271_vm4, %v831_v45  ;;  %v520_v45 = vld [vmem:[#allocation2 + $0x188] sm:$0xff] }
 0x254   : > { %4028 = vmatmul.msk.f32.gmra.mxu2 %vm1271_vm4, %v2100_v24 }
 0x255   : > { %1881 = vrot.lane.b32.xlu2 %v5680_v50, %s4432_s7 }
 0x256   : > { %2009 = vrot.lane.b32.xlu0 %v1789_v7, %s4433_s8  ;;  %v2262_v2 = vpop.f32.mrf.mxu2 }
 0x257   : > { %v5744_v41 = vpop.permute.xlu2 %1019  ;;  %1159 = vrot.lane.b32.xlu1 %v5751_v33, %s4433_s8 }
 0x258   : > { %v1416_v42 = vpop.f32.mrf.mxu0  ;;  %v1144_v48 = vpop.permute.xlu0 %1143 }
 0x259   : > { %v1629_v23 = vadd.f32 %v1628_v18, %v1416_v42  ;;  %v1016_v14 = vpop.permute.xlu1 %1015  ;;  %v1631_v57 = vpop.f32.mrf.mxu1 }
 0x25a   : > { %v1220_v10 = vsel %vm266_vm0, %v5266_v21, %v1016_v14  ;;  %v4410_v14 = vld [vmem:[#allocation2 + $0xf8] sm:$0xff] }
 0x25b   : > { %v2340_v5 = vadd.f32 %v2262_v2, %v1629_v23  ;;  %v1252_v27 = vsel %vm811_vm5, %v1220_v10, %v1144_v48  ;;  %v6848_v10 = vld [vmem:[#allocation20_spill] sm:$0xff] }
 0x25c   : > { %3957 = vmatmul.msk.f32.gmra.mxu0 %vm1271_vm4, %v1252_v27  ;;  %v800_v48 = vsel %vm266_vm0, %v4410_v14, %v6848_v10 }
 0x25d   : > { %739 = vrot.lane.b32.xlu2 %v519_v20, %s4433_s8  ;;  %v2376_v60 = vadd.f32 %v5452_v29, %v2340_v5 }
 0x25e   : > { %1161 = vrot.lane.b32.xlu0 %v941_v6, %s4433_s8 }
 0x25f   : > { %v5759_v30 = vpop.permute.xlu2 %1869  ;;  %v2408_v62 = vmax.f32 %v2376_v60, 0.0  ;;  %1033 = vrot.lane.b32.xlu1 %v5699_v51, %s4432_s7  ;;  %v2265_v35 = vpop.f32.mrf.mxu2 }
 0x260   : > { %v1018_v38 = vpop.permute.xlu0 %1017 }
 0x261   : > { %2497 = vst.msk [vmem:[#allocation3 + $0x81] sm:$0xff] %vm2431_vm6, %v2408_v62  ;;  %v1866_v21 = vpop.permute.xlu1 %1865  ;;  %v1419_v40 = vpop.f32.mrf.mxu0  ;;  %v1221_v3 = vsel %vm266_vm0, %v5282_v22, %v1018_v38  ;;  %v5784_v22 = vld [vmem:[#allocation2 + $0x189] sm:$0xff] }
 0x262   : > { %v2069_v56 = vsel %vm266_vm0, %v5264_v52, %v1866_v21  ;;  %v1632_v26 = vadd.f32 %v1631_v57, %v1419_v40  ;;  %v1253_v49 = vsel %vm811_vm5, %v1221_v3, %v5721_v58  ;;  %v6847_v58 = vld [vmem:[#allocation16_spill] sm:$0xff]  ;;  %v1222_v40 = vsel %vm266_vm0, %v5304_v59, %v5744_v41  ;;  %v6849_v38 = vld [vmem:[#allocation9_spill] sm:$0xff] }
 0x263   : > { %v2101_v43 = vsel %vm811_vm5, %v2069_v56, %v5707_v53  ;;  %v4409_v53 = vld [vmem:[#allocation2 + $0xf0] sm:$0xff]  ;;  %v2071_v3 = vsel %vm266_vm0, %v5329_v63, %v5759_v30 }
 0x264   : > { %v2341_v16 = vadd.f32 %v2265_v35, %v1632_v26  ;;  %4029 = vmatmul.msk.f32.gmra.mxu2 %vm1271_vm4, %v2101_v43  ;;  %3958 = vmatmul.msk.f32.gmra.mxu0 %vm1271_vm4, %v1253_v49  ;;  %v799_v31 = vsel %vm266_vm0, %v4409_v53, %v6847_v58  ;;  %v4411_v26 = vld [vmem:[#allocation2 + $0x108] sm:$0xff] }
 0x265   : > { %2011 = vrot.lane.b32.xlu2 %v1790_v37, %s4433_s8  ;;  %v801_v35 = vsel %vm266_vm0, %v4411_v26, %v6849_v38 }
 0x266   : > { %v2377_v52 = vadd.f32 %v5452_v29, %v2341_v16  ;;  %1035 = vrot.lane.b32.xlu0 %v5751_v33, %s4432_s7 }
 0x267   : > { %v728_v4 = vpop.permute.xlu2 %727  ;;  %1883 = vrot.lane.b32.xlu1 %v5727_v19, %s4432_s7 }
 0x268   : > { %v2409_v28 = vmax.f32 %v2377_v52, 0.0  ;;  %v1868_v39 = vpop.permute.xlu0 %1867  ;;  %v834_v59 = vsel %vm811_vm5, %v801_v35, %v728_v4  ;;  %v943_v52 = vld [vmem:[#allocation2 + $0x199] sm:$0xff] }
 0x269   : > { %v724_v36 = vpop.permute.xlu1 %723  ;;  %v1422_v24 = vpop.f32.mrf.mxu0  ;;  %v2070_v20 = vsel %vm266_vm0, %v5288_v25, %v1868_v39  ;;  %v1791_v25 = vld [vmem:[#allocation2 + $0x19a] sm:$0xff] }
 0x26a   : > { %2498 = vst.msk [vmem:[#allocation3 + $0x91] sm:$0xff] %vm2431_vm6, %v2409_v28  ;;  %v832_v47 = vsel %vm811_vm5, %v799_v31, %v724_v36  ;;  %v522_v28 = vld [vmem:[#allocation2 + $0x1a0] sm:$0xff] }
 0x26b   : > { %3991 = vmatmul.msk.f32.gmra.mxu1 %vm1271_vm4, %v832_v47  ;;  %v5865_v35 = vld [vmem:[#allocation3 + $0x49] sm:$0xff] }
 0x26d   : > { %1163 = vrot.lane.b32.xlu2 %v5784_v22, %s4433_s8 }
 0x26e   : > { %1885 = vrot.lane.b32.xlu0 %v1789_v7, %s4432_s7 }
 0x26f   : > { %v5792_v44 = vpop.permute.xlu2 %1999  ;;  %741 = vrot.lane.b32.xlu1 %v520_v45, %s4433_s8  ;;  %v2268_v42 = vpop.f32.mrf.mxu2 }
 0x270   : > { %v1634_v18 = vpop.f32.mrf.mxu1  ;;  %v726_v5 = vpop.permute.xlu0 %725 }
 0x271   : > { %v1635_v2 = vadd.f32 %v1634_v18, %v1422_v24  ;;  %v1996_v23 = vpop.permute.xlu1 %1995  ;;  %v833_v62 = vsel %vm811_vm5, %v800_v48, %v726_v5  ;;  %v944_v24 = vld [vmem:[#allocation2 + $0x1a1] sm:$0xff] }
 0x272   : > { %v2102_v27 = vsel %vm811_vm5, %v2070_v20, %v1996_v23 }
 0x273   : > { %v2342_v60 = vadd.f32 %v2268_v42, %v1635_v2  ;;  %4030 = vmatmul.msk.f32.gmra.mxu2 %vm1271_vm4, %v2102_v27  ;;  %3992 = vmatmul.msk.f32.gmra.mxu1 %vm1271_vm4, %v833_v62 }
 0x275   : > { %1037 = vrot.lane.b32.xlu2 %v941_v6, %s4432_s7  ;;  %v521_v6 = vld [vmem:[#allocation2 + $0x198] sm:$0xff]  ;;  %v2378_v57 = vadd.f32 %v5452_v29, %v2342_v60 }
 0x276   : > { %743 = vrot.lane.b32.xlu0 %v521_v6, %s4433_s8 }
 0x277   : > { %v1152_v7 = vpop.permute.xlu2 %1151  ;;  %v2410_v21 = vmax.f32 %v2378_v57, 0.0  ;;  %2013 = vrot.lane.b32.xlu1 %v1791_v25, %s4433_s8 }
 0x278   : > { %v1998_v43 = vpop.permute.xlu0 %1997  ;;  %v1637_v53 = vpop.f32.mrf.mxu1 }
 0x279   : > { %2499 = vst.msk [vmem:[#allocation3 + $0x99] sm:$0xff] %vm2431_vm6, %v2410_v21  ;;  %v1148_v56 = vpop.permute.xlu1 %1147  ;;  %v2103_v41 = vsel %vm811_vm5, %v2071_v3, %v1998_v43  ;;  %v6850_v21 = vld [vmem:[#allocation19_spill] sm:$0xff] }
 0x27a   : > { %v1254_v16 = vsel %vm811_vm5, %v1222_v40, %v1148_v56 }
 0x27b   : > { %3959 = vmatmul.msk.f32.gmra.mxu0 %vm1271_vm4, %v1254_v16  ;;  %3993 = vmatmul.msk.f32.gmra.mxu1 %vm1271_vm4, %v834_v59 }
 0x27c   : > { %4031 = vmatmul.msk.f32.gmra.mxu2 %vm1271_vm4, %v2103_v41 }
 0x27d   : > { %1887 = vrot.lane.b32.xlu2 %v1790_v37, %s4432_s7  ;;  %v1792_v37 = vld [vmem:[#allocation2 + $0x1a2] sm:$0xff] }
 0x27e   : > { %2015 = vrot.lane.b32.xlu0 %v1792_v37, %s4433_s8  ;;  %v2271_v30 = vpop.f32.mrf.mxu2 }
 0x27f   : > { %v5820_v49 = vpop.permute.xlu2 %1025  ;;  %1165 = vrot.lane.b32.xlu1 %v943_v52, %s4433_s8 }
 0x280   : > { %v1425_v63 = vpop.f32.mrf.mxu0  ;;  %v1150_v36 = vpop.permute.xlu0 %1149  ;;  %v5841_v23 = vld [vmem:[#allocation3 + $0x99] sm:$0xff] }
 0x281   : > { %v1638_v58 = vadd.f32 %v1637_v53, %v1425_v63  ;;  %v1022_v4 = vpop.permute.xlu1 %1021  ;;  %v1640_v42 = vpop.f32.mrf.mxu1  ;;  %v4413_v63 = vld [vmem:[#allocation2 + $0x120] sm:$0xff] }
 0x282   : > { %v1223_v31 = vsel %vm266_vm0, %v5364_v46, %v1022_v4 }
 0x283   : > { %v2343_v47 = vadd.f32 %v2271_v30, %v1638_v58  ;;  %v1255_v45 = vsel %vm811_vm5, %v1223_v31, %v1150_v36  ;;  %v6851_v30 = vld [vmem:[#allocation22_spill] sm:$0xff] }
 0x284   : > { %3960 = vmatmul.msk.f32.gmra.mxu0 %vm1271_vm4, %v1255_v45  ;;  %v803_v58 = vsel %vm266_vm0, %v4413_v63, %v6851_v30 }
 0x285   : > { %745 = vrot.lane.b32.xlu2 %v522_v28, %s4433_s8  ;;  %v2379_v18 = vadd.f32 %v5452_v29, %v2343_v47 }
 0x286   : > { %1167 = vrot.lane.b32.xlu0 %v944_v24, %s4433_s8 }
 0x287   : > { %v5832_v39 = vpop.permute.xlu2 %1875  ;;  %v2411_v20 = vmax.f32 %v2379_v18, 0.0  ;;  %1039 = vrot.lane.b32.xlu1 %v5784_v22, %s4432_s7  ;;  %v2274_v5 = vpop.f32.mrf.mxu2  ;;  %v5849_v22 = vld [vmem:[#allocation3 + $0x91] sm:$0xff]  ;;  %s4434_s7 = smov 64  }
 0x288   : > { %v1024_v48 = vpop.permute.xlu0 %1023  ;;  %v4173_v25 = vpack.i.bf16 %v5849_v22, %v5841_v23 }
 0x289   : > { %2500 = vst.msk [vmem:[#allocation3 + $0xa9] sm:$0xff] %vm2431_vm6, %v2411_v20  ;;  %v1872_v46 = vpop.permute.xlu1 %1871  ;;  %v1428_v2 = vpop.f32.mrf.mxu0  ;;  %v1224_v27 = vsel %vm266_vm0, %v5391_v54, %v1024_v48 }
 0x28a   : > { %v2072_v14 = vsel %vm266_vm0, %v5360_v8, %v1872_v46  ;;  %v1641_v10 = vadd.f32 %v1640_v42, %v1428_v2  ;;  %v1256_v6 = vsel %vm811_vm5, %v1224_v27, %v1152_v7  ;;  %v5860_v7 = vld [vmem:[#allocation3 + $0x51] sm:$0xff]  ;;  %v5888_v42 = vld [vmem:[#allocation3 + $0x69] sm:$0xff]  ;;  %v1225_v46 = vsel %vm266_vm0, %v5438_v15, %v5820_v49 }
 0x28b   : > { %v2104_v60 = vsel %vm811_vm5, %v2072_v14, %v5792_v44  ;;  %v4412_v44 = vld [vmem:[#allocation2 + $0x110] sm:$0xff]  ;;  %v4188_v3 = vpack.i.bf16 %v5865_v35, %v5860_v7  ;;  %v4414_v14 = vld [vmem:[#allocation2 + $0x128] sm:$0xff] }
 0x28c   : > { %v2344_v62 = vadd.f32 %v2274_v5, %v1641_v10  ;;  %4032 = vmatmul.msk.f32.gmra.mxu2 %vm1271_vm4, %v2104_v60  ;;  %3961 = vmatmul.msk.f32.gmra.mxu0 %vm1271_vm4, %v1256_v6  ;;  %v802_v40 = vsel %vm266_vm0, %v4412_v44, %v6850_v21  ;;  %v6852_v10 = vld [vmem:[#allocation12_spill] sm:$0xff]  ;;  %v2074_v5 = vsel %vm266_vm0, %v5500_v34, %v5832_v39 }
 0x28d   : > { %v804_v48 = vsel %vm266_vm0, %v4414_v14, %v6852_v10 }
 0x28e   : > { %v2380_v57 = vadd.f32 %v5452_v29, %v2344_v62  ;;  %4174 = vrot.lane.b32.xlu0 %v4173_v25, %s4434_s7  ;;  %v5900_v62 = vld [vmem:[#allocation3 + $0x61] sm:$0xff] }
 0x28f   : > { %v734_v8 = vpop.permute.xlu2 %733  ;;  %v4183_v49 = vpack.i.bf16 %v5900_v62, %v5888_v42  ;;  %v5910_v25 = vld [vmem:[#allocation3 + $0x21] sm:$0xff] }
 0x290   : > { %v2412_v54 = vmax.f32 %v2380_v57, 0.0  ;;  %v1874_v26 = vpop.permute.xlu0 %1873  ;;  %v5874_v28 = vld [vmem:[#allocation3 + $0xa9] sm:$0xff]  ;;  %v837_v6 = vsel %vm811_vm5, %v804_v48, %v734_v8 }
 0x291   : > { %v730_v56 = vpop.permute.xlu1 %729  ;;  %v1431_v16 = vpop.f32.mrf.mxu0  ;;  %v2073_v41 = vsel %vm266_vm0, %v5401_v1, %v1874_v26 }
 0x292   : > { %2501 = vst.msk [vmem:[#allocation3 + $0xb1] sm:$0xff] %vm2431_vm6, %v2412_v54  ;;  %v835_v38 = vsel %vm811_vm5, %v802_v40, %v730_v56  ;;  %v5916_v56 = vld [vmem:[#allocation3 + $0x19] sm:$0xff] }
 0x293   : > { %3994 = vmatmul.msk.f32.gmra.mxu1 %vm1271_vm4, %v835_v38 }
 0x296   : > { %4189 = vrot.lane.b32.xlu0 %v4188_v3, %s4434_s7  ;;  %v4198_v3 = vpack.i.bf16 %v5916_v56, %v5910_v25 }
 0x297   : > { %v5870_v43 = vpop.permute.xlu2 %2005  ;;  %v2277_v4 = vpop.f32.mrf.mxu2 }
 0x298   : > { %v1643_v59 = vpop.f32.mrf.mxu1  ;;  %v732_v36 = vpop.permute.xlu0 %731 }
 0x299   : > { %v1644_v37 = vadd.f32 %v1643_v59, %v1431_v16  ;;  %v2002_v52 = vpop.permute.xlu1 %2001  ;;  %v5876_v53 = vld [vmem:[#allocation3 + $0xb1] sm:$0xff]  ;;  %v836_v1 = vsel %vm811_vm5, %v803_v58, %v732_v36 }
 0x29a   : > { %v2105_v31 = vsel %vm811_vm5, %v2073_v41, %v2002_v52  ;;  %v4168_v47 = vpack.i.bf16 %v5874_v28, %v5876_v53 }
 0x29b   : > { %v2345_v45 = vadd.f32 %v2277_v4, %v1644_v37  ;;  %4033 = vmatmul.msk.f32.gmra.mxu2 %vm1271_vm4, %v2105_v31  ;;  %3995 = vmatmul.msk.f32.gmra.mxu1 %vm1271_vm4, %v836_v1 }
 0x29c   : > { %4169 = vrot.lane.b32.xlu2 %v4168_v47, %s4434_s7 }
 0x29d   : > { %v2381_v24 = vadd.f32 %v5452_v29, %v2345_v45 }
 0x29f   : > { %v2413_v18 = vmax.f32 %v2381_v24, 0.0  ;;  %v1158_v20 = vpop.permute.xlu2 %1157 }
 0x2a0   : > { %v2004_v60 = vpop.permute.xlu0 %2003  ;;  %v1646_v34 = vpop.f32.mrf.mxu1 }
 0x2a1   : > { %2502 = vst.msk [vmem:[#allocation3 + $0xc1] sm:$0xff] %vm2431_vm6, %v2413_v18  ;;  %v1154_v2 = vpop.permute.xlu1 %1153  ;;  %v2106_v15 = vsel %vm811_vm5, %v2074_v5, %v2004_v60  ;;  %v5947_v5 = vld [vmem:[#allocation3 + $0x81] sm:$0xff] }
 0x2a2   : > { %v1257_v27 = vsel %vm811_vm5, %v1225_v46, %v1154_v2  ;;  %v4415_v46 = vld [vmem:[#allocation2 + $0x138] sm:$0xff] }
 0x2a3   : > { %3962 = vmatmul.msk.f32.gmra.mxu0 %vm1271_vm4, %v1257_v27  ;;  %3996 = vmatmul.msk.f32.gmra.mxu1 %vm1271_vm4, %v837_v6  ;;  %v5949_v6 = vld [vmem:[#allocation3 + $0x79] sm:$0xff] }
 0x2a4   : > { %4034 = vmatmul.msk.f32.gmra.mxu2 %vm1271_vm4, %v2106_v15  ;;  %4184 = vrot.lane.b32.xlu2 %v4183_v49, %s4434_s7 }
 0x2a6   : > { %v2280_v57 = vpop.f32.mrf.mxu2 }
 0x2a7   : > { %v5912_v44 = vpop.permute.xlu2 %1031 }
 0x2a8   : > { %v1434_v39 = vpop.f32.mrf.mxu0  ;;  %v1156_v40 = vpop.permute.xlu0 %1155  ;;  %v5935_v24 = vld [vmem:[#allocation3 + $0xc1] sm:$0xff] }
 0x2a9   : > { %v1647_v54 = vadd.f32 %v1646_v34, %v1434_v39  ;;  %v1028_v8 = vpop.permute.xlu1 %1027  ;;  %v1649_v41 = vpop.f32.mrf.mxu1  ;;  %v4178_v39 = vpack.i.bf16 %v5949_v6, %v5947_v5 }
 0x2aa   : > { %v1226_v21 = vsel %vm266_vm0, %v5542_v11, %v1028_v8 }
 0x2ab   : > { %v2346_v26 = vadd.f32 %v2280_v57, %v1647_v54  ;;  %v1258_v38 = vsel %vm811_vm5, %v1226_v21, %v1156_v40  ;;  %v4416_v57 = vld [vmem:[#allocation2 + $0x140] sm:$0xff]  ;;  %v6854_v54 = vld [vmem:[#allocation25_spill] sm:$0xff] }
 0x2ac   : > { %3963 = vmatmul.msk.f32.gmra.mxu0 %vm1271_vm4, %v1258_v38  ;;  %4199 = vrot.lane.b32.xlu2 %v4198_v3, %s4434_s7  ;;  %v806_v8 = vsel %vm266_vm0, %v4416_v57, %v6854_v54 }
 0x2ad   : > { %v2382_v16 = vadd.f32 %v5452_v29, %v2346_v26 }
 0x2af   : > { %v2414_v59 = vmax.f32 %v2382_v16, 0.0  ;;  %v2283_v58 = vpop.f32.mrf.mxu2  ;;  %v1882_v36 = vpop.permute.xlu2 %1881  ;;  %v5963_v16 = vld [vmem:[#allocation3 + $0x39] sm:$0xff] }
 0x2b0   : > { %v1030_v30 = vpop.permute.xlu0 %1029 }
 0x2b1   : > { %2503 = vst.msk [vmem:[#allocation3 + $0xc9] sm:$0xff] %vm2431_vm6, %v2414_v59  ;;  %v1878_v11 = vpop.permute.xlu1 %1877  ;;  %v1437_v37 = vpop.f32.mrf.mxu0  ;;  %v1227_v4 = vsel %vm266_vm0, %v5570_v55, %v1030_v30  ;;  %v6853_v55 = vld [vmem:[#allocation21_spill] sm:$0xff]  ;;  %v4417_v30 = vld [vmem:[#allocation2 + $0x150] sm:$0xff] }
 0x2b2   : > { %v2075_v52 = vsel %vm266_vm0, %v5538_v13, %v1878_v11  ;;  %v1650_v63 = vadd.f32 %v1649_v41, %v1437_v37  ;;  %v1259_v45 = vsel %vm811_vm5, %v1227_v4, %v1158_v20  ;;  %v805_v2 = vsel %vm266_vm0, %v4415_v46, %v6853_v55  ;;  %v5965_v11 = vld [vmem:[#allocation3 + $0x31] sm:$0xff] }
 0x2b3   : > { %v2107_v31 = vsel %vm811_vm5, %v2075_v52, %v5870_v43  ;;  %v1228_v37 = vsel %vm266_vm0, %v5604_v61, %v5912_v44  ;;  %v2077_v4 = vsel %vm266_vm0, %v5632_v17, %v1882_v36  ;;  %v5988_v55 = vld [vmem:[#allocation3 + $0x38] sm:$0xff] }
 0x2b4   : > { %v2347_v47 = vadd.f32 %v2283_v58, %v1650_v63  ;;  %4035 = vmatmul.msk.f32.gmra.mxu2 %vm1271_vm4, %v2107_v31  ;;  %3964 = vmatmul.msk.f32.gmra.mxu0 %vm1271_vm4, %v1259_v45  ;;  %v4193_v63 = vpack.i.bf16 %v5965_v11, %v5963_v16  ;;  %v6855_v58 = vld [vmem:[#allocation15_spill] sm:$0xff] }
 0x2b6   : > { %v2383_v1 = vadd.f32 %v5452_v29, %v2347_v47 }
 0x2b7   : > { %v740_v48 = vpop.permute.xlu2 %739 }
 0x2b8   : > { %v2415_v13 = vmax.f32 %v2383_v1, 0.0  ;;  %v5937_v18 = vld [vmem:[#allocation3 + $0xc9] sm:$0xff]  ;;  %v1880_v10 = vpop.permute.xlu0 %1879 }
 0x2b9   : > { %v736_v43 = vpop.permute.xlu1 %735  ;;  %v4163_v14 = vpack.i.bf16 %v5935_v24, %v5937_v18  ;;  %v1440_v27 = vpop.f32.mrf.mxu0  ;;  %v2076_v15 = vsel %vm266_vm0, %v5580_v32, %v1880_v10 }
 0x2ba   : > { %2504 = vst.msk [vmem:[#allocation3 + $0xd9] sm:$0xff] %vm2431_vm6, %v2415_v13  ;;  %v838_v20 = vsel %vm811_vm5, %v805_v2, %v736_v43 }
 0x2bb   : > { %3997 = vmatmul.msk.f32.gmra.mxu1 %vm1271_vm4, %v838_v20  ;;  %4164 = vrot.lane.b32.xlu1 %v4163_v14, %s4434_s7 }
 0x2bf   : > { %v2286_v21 = vpop.f32.mrf.mxu2  ;;  %v2012_v41 = vpop.permute.xlu2 %2011 }
 0x2c0   : > { %v1652_v60 = vpop.f32.mrf.mxu1  ;;  %v738_v26 = vpop.permute.xlu0 %737 }
 0x2c1   : > { %v1653_v49 = vadd.f32 %v1652_v60, %v1440_v27  ;;  %v2008_v34 = vpop.permute.xlu1 %2007  ;;  %v839_v3 = vsel %vm811_vm5, %v806_v8, %v738_v26  ;;  %v5996_v27 = vld [vmem:[#allocation3 + $0xd8] sm:$0xff]  ;;  %v6001_v60 = vld [vmem:[%s6786_s3] ss:$0 sm:$0xff] }
 0x2c2   : > { %v2108_v40 = vsel %vm811_vm5, %v2076_v15, %v2008_v34  ;;  %v6006_v34 = vld [vmem:[#allocation3 + $0xc8] sm:$0xff] }
 0x2c3   : > { %v2348_v38 = vadd.f32 %v2286_v21, %v1653_v49  ;;  %4036 = vmatmul.msk.f32.gmra.mxu2 %vm1271_vm4, %v2108_v40  ;;  %4179 = vrot.lane.b32.xlu1 %v4178_v39, %s4434_s7 }
 0x2c4   : > { %3998 = vmatmul.msk.f32.gmra.mxu1 %vm1271_vm4, %v839_v3 }
 0x2c5   : > { %v2384_v32 = vadd.f32 %v5452_v29, %v2348_v38  ;;  %v807_v29 = vsel %vm266_vm0, %v4417_v30, %v6855_v58 }
 0x2c6   : > { %v840_v45 = vsel %vm811_vm5, %v807_v29, %v740_v48 }
 0x2c7   : > { %v2416_v59 = vmax.f32 %v2384_v32, 0.0  ;;  %v1164_v2 = vpop.permute.xlu2 %1163 }
 0x2c8   : > { %v2010_v47 = vpop.permute.xlu0 %2009  ;;  %v1655_v44 = vpop.f32.mrf.mxu1 }
 0x2c9   : > { %2505 = vst.msk [vmem:[#allocation3 + $0xe1] sm:$0xff] %vm2431_vm6, %v2416_v59  ;;  %v1160_v52 = vpop.permute.xlu1 %1159  ;;  %v2109_v61 = vsel %vm811_vm5, %v2077_v4, %v2010_v47 }
 0x2ca   : > { %v1260_v31 = vsel %vm811_vm5, %v1228_v37, %v1160_v52  ;;  %v6018_v37 = vld [vmem:[#allocation3 + $0xc0] sm:$0xff] }
 0x2cb   : > { %3965 = vmatmul.msk.f32.gmra.mxu0 %vm1271_vm4, %v1260_v31  ;;  %4194 = vrot.lane.b32.xlu1 %v4193_v63, %s4434_s7  ;;  %v6024_v63 = vld [vmem:[#allocation3 + $0xb0] sm:$0xff]  ;;  %v6033_v31 = vld [vmem:[#allocation3 + $0xa8] sm:$0xff] }
 0x2cc   : > { %3999 = vmatmul.msk.f32.gmra.mxu1 %vm1271_vm4, %v840_v45  ;;  %4037 = vmatmul.msk.f32.gmra.mxu2 %vm1271_vm4, %v2109_v61 }
 0x2ce   : > { %v2289_v17 = vpop.f32.mrf.mxu2 }
 0x2cf   : > { %v1038_v3 = vpop.permute.xlu2 %1037 }
 0x2d0   : > { %v1443_v1 = vpop.f32.mrf.mxu0  ;;  %v5984_v13 = vld [vmem:[#allocation3 + $0xe0] sm:$0xff]  ;;  %v1162_v14 = vpop.permute.xlu0 %1161 }
 0x2d1   : > { %v1656_v36 = vadd.f32 %v1655_v44, %v1443_v1  ;;  %v1034_v46 = vpop.permute.xlu1 %1033  ;;  %4076 = vmatpush.xpose.msk.msrb.mxu1 %vm2431_vm6, %v5984_v13  ;;  %v1658_v49 = vpop.f32.mrf.mxu1  ;;  %v6037_v44 = vld [vmem:[#allocation3 + $0x98] sm:$0xff] }
 0x2d2   : > { %v1229_v43 = vsel %vm266_vm0, %v5659_v9, %v1034_v46  ;;  %v4420_v46 = vld [vmem:[#allocation2 + $0x168] sm:$0xff] }
 0x2d3   : > { %v2349_v10 = vadd.f32 %v2289_v17, %v1656_v36  ;;  %v1261_v48 = vsel %vm811_vm5, %v1229_v43, %v1162_v14 }
 0x2d4   : > { %3966 = vmatmul.msk.f32.gmra.mxu0 %vm1271_vm4, %v1261_v48 }
 0x2d5   : > { %v2385_v15 = vadd.f32 %v6001_v60, %v2349_v10  ;;  %4077 = vmatpush.xpose.msk.msrb.mxu1 %vm2431_vm6, %v5996_v27 }
 0x2d7   : > { %v2417_v9 = vmax.f32 %v2385_v15, 0.0  ;;  %v2292_v40 = vpop.f32.mrf.mxu2  ;;  %v1888_v47 = vpop.permute.xlu2 %1887 }
 0x2d8   : > { %v1036_v21 = vpop.permute.xlu0 %1035 }
 0x2d9   : > { %2506 = vst.msk [vmem:[#allocation3 + $0xf1] sm:$0xff] %vm2431_vm6, %v2417_v9  ;;  %v1884_v39 = vpop.permute.xlu1 %1883  ;;  %v1446_v57 = vpop.f32.mrf.mxu0  ;;  %4078 = vmatpush.xpose.msk.msrb.mxu1 %vm2431_vm6, %v6006_v34  ;;  %v1230_v26 = vsel %vm266_vm0, %v5673_v0, %v1036_v21  ;;  %v4419_v0 = vld [vmem:[#allocation2 + $0x158] sm:$0xff] }
 0x2da   : > { %v2078_v54 = vsel %vm266_vm0, %v5657_v12, %v1884_v39  ;;  %v1659_v8 = vadd.f32 %v1658_v49, %v1446_v57  ;;  %v1262_v59 = vsel %vm811_vm5, %v1230_v26, %v1164_v2  ;;  %v6857_v2 = vld [vmem:[#allocation27_spill] sm:$0xff]  ;;  %v6858_v26 = vld [vmem:[#allocation18_spill] sm:$0xff] }
 0x2db   : > { %v2110_v38 = vsel %vm811_vm5, %v2078_v54, %v2012_v41  ;;  %v6856_v41 = vld [vmem:[#allocation24_spill] sm:$0xff]  ;;  %v809_v43 = vsel %vm266_vm0, %v4420_v46, %v6857_v2  ;;  %v6054_v54 = vld [vmem:[#allocation3 + $0x80] sm:$0xff] }
 0x2dc   : > { %v2350_v32 = vadd.f32 %v2292_v40, %v1659_v8  ;;  %4038 = vmatmul.msk.f32.gmra.mxu2 %vm1271_vm4, %v2110_v38  ;;  %3967 = vmatmul.msk.f32.gmra.mxu0 %vm1271_vm4, %v1262_v59  ;;  %v808_v30 = vsel %vm266_vm0, %v4419_v0, %v6856_v41  ;;  %v1231_v8 = vsel %vm266_vm0, %v5699_v51, %v1038_v3  ;;  %v4421_v40 = vld [vmem:[#allocation2 + $0x170] sm:$0xff]  ;;  %v6071_v3 = vld [vmem:[#allocation3 + $0x78] sm:$0xff]  ;;  %v6075_v41 = vld [vmem:[#allocation3 + $0x68] sm:$0xff] }
 0x2dd   : > { %4079 = vmatpush.xpose.msk.msrb.mxu1 %vm2431_vm6, %v6018_v37  ;;  %v810_v38 = vsel %vm266_vm0, %v4421_v40, %v6858_v26  ;;  %v6088_v46 = vld [vmem:[#allocation3 + $0x50] sm:$0xff]  ;;  %v6109_v40 = vld [vmem:[#allocation3 + $0xda] sm:$0xff] }
 0x2de   : > { %v2386_v12 = vadd.f32 %v6001_v60, %v2350_v32  ;;  %v2080_v32 = vsel %vm266_vm0, %v5727_v19, %v1888_v47 }
 0x2df   : > { %v746_v57 = vpop.permute.xlu2 %745 }
 0x2e0   : > { %v2418_v52 = vmax.f32 %v2386_v12, 0.0  ;;  %v1886_v4 = vpop.permute.xlu0 %1885 }
 0x2e1   : > { %v742_v58 = vpop.permute.xlu1 %741  ;;  %4080 = vmatpush.xpose.msk.msrb.mxu1 %vm2431_vm6, %v6024_v63  ;;  %v1449_v45 = vpop.f32.mrf.mxu0  ;;  %v2079_v1 = vsel %vm266_vm0, %v5680_v50, %v1886_v4  ;;  %v6049_v50 = vld [vmem:[#allocation3 + $0x90] sm:$0xff] }
 0x2e2   : > { %2507 = vst.msk [vmem:[#allocation3 + $0xf9] sm:$0xff] %vm2431_vm6, %v2418_v52  ;;  %v841_v29 = vsel %vm811_vm5, %v808_v30, %v742_v58  ;;  %v843_v52 = vsel %vm811_vm5, %v810_v38, %v746_v57 }
 0x2e3   : > { %4000 = vmatmul.msk.f32.gmra.mxu1 %vm1271_vm4, %v841_v29 }
 0x2e5   : > { %4081 = vmatpush.xpose.msk.msrb.mxu1 %vm2431_vm6, %v6033_v31 }
 0x2e7   : > { %v2295_v14 = vpop.f32.mrf.mxu2 }
 0x2e8   : > { %v1661_v61 = vpop.f32.mrf.mxu1  ;;  %v744_v48 = vpop.permute.xlu0 %743 }
 0x2e9   : > { %v1662_v17 = vadd.f32 %v1661_v61, %v1449_v45  ;;  %v2014_v36 = vpop.permute.xlu1 %2013  ;;  %4082 = vmatpush.xpose.msk.msrb.mxu1 %vm2431_vm6, %v6037_v44  ;;  %v842_v9 = vsel %vm811_vm5, %v809_v43, %v744_v48  ;;  %v6093_v48 = vld [vmem:[#allocation3 + $0x48] sm:$0xff] }
 0x2ea   : > { %v2111_v10 = vsel %vm811_vm5, %v2079_v1, %v2014_v36  ;;  %v6083_v1 = vld [vmem:[#allocation3 + $0x60] sm:$0xff] }
 0x2eb   : > { %v2351_v15 = vadd.f32 %v2295_v14, %v1662_v17  ;;  %4039 = vmatmul.msk.f32.gmra.mxu2 %vm1271_vm4, %v2111_v10  ;;  %4001 = vmatmul.msk.f32.gmra.mxu1 %vm1271_vm4, %v842_v9 }
 0x2ed   : > { %v2387_v49 = vadd.f32 %v6001_v60, %v2351_v15  ;;  %4083 = vmatpush.xpose.msk.msrb.mxu1 %vm2431_vm6, %v6049_v50 }
 0x2ef   : > { %v2419_v39 = vmax.f32 %v2387_v49, 0.0  ;;  %v6101_v49 = vld [vmem:[#allocation3 + $0x30] sm:$0xff] }
 0x2f0   : > { %v2016_v12 = vpop.permute.xlu0 %2015  ;;  %v1664_v0 = vpop.f32.mrf.mxu1 }
 0x2f1   : > { %2508 = vst.msk [vmem:[#allocation3 + $0x109] sm:$0xff] %vm2431_vm6, %v2419_v39  ;;  %v1166_v21 = vpop.permute.xlu1 %1165  ;;  %4084 = vmatpush.xpose.msk.msrb.mxu1 %vm2431_vm6, %v6054_v54  ;;  %v2112_v51 = vsel %vm811_vm5, %v2080_v32, %v2016_v12  ;;  %v6105_v39 = vld [vmem:[#allocation3 + $0xe2] sm:$0xff] }
 0x2f2   : > { %v1263_v59 = vsel %vm811_vm5, %v1231_v8, %v1166_v21 }
 0x2f3   : > { %3968 = vmatmul.msk.f32.gmra.mxu0 %vm1271_vm4, %v1263_v59  ;;  %4002 = vmatmul.msk.f32.gmra.mxu1 %vm1271_vm4, %v843_v52  ;;  %v6114_v59 = vld [vmem:[#allocation3 + $0xca] sm:$0xff]  ;;  %v6119_v52 = vld [vmem:[#allocation3 + $0xc2] sm:$0xff] }
 0x2f4   : > { %4040 = vmatmul.msk.f32.gmra.mxu2 %vm1271_vm4, %v2112_v51  ;;  %v6123_v51 = vld [vmem:[#allocation3 + $0xb2] sm:$0xff] }
 0x2f5   : > { %4085 = vmatpush.xpose.msk.msrb.mxu1 %vm2431_vm6, %v6071_v3 }
 0x2f6   : > { %v2298_v30 = vpop.f32.mrf.mxu2 }
 0x2f8   : > { %v1452_v19 = vpop.f32.mrf.mxu0  ;;  %v1168_v47 = vpop.permute.xlu0 %1167 }
 0x2f9   : > { %v1665_v58 = vadd.f32 %v1664_v0, %v1452_v19  ;;  %v1040_v29 = vpop.permute.xlu1 %1039  ;;  %4086 = vmatpush.xpose.msk.msrb.mxu1 %vm2431_vm6, %v6075_v41  ;;  %v1667_v2 = vpop.f32.mrf.mxu1 }
 0x2fa   : > { %v1232_v4 = vsel %vm266_vm0, %v5751_v33, %v1040_v29  ;;  %v6127_v29 = vld [vmem:[#allocation3 + $0xaa] sm:$0xff] }
 0x2fb   : > { %v2352_v45 = vadd.f32 %v2298_v30, %v1665_v58  ;;  %v1264_v61 = vsel %vm811_vm5, %v1232_v4, %v1168_v47 }
 0x2fc   : > { %3969 = vmatmul.msk.f32.gmra.mxu0 %vm1271_vm4, %v1264_v61 }
 0x2fd   : > { %v2388_v17 = vadd.f32 %v6001_v60, %v2352_v45  ;;  %4087 = vmatpush.xpose.msk.msrb.mxu1 %vm2431_vm6, %v6083_v1  ;;  %v6132_v45 = vld [vmem:[#allocation3 + $0x9a] sm:$0xff] }
 0x2ff   : > { %v2420_v36 = vmax.f32 %v2388_v17, 0.0  ;;  %v2301_v14 = vpop.f32.mrf.mxu2 }
 0x301   : > { %2509 = vst.msk [vmem:[#allocation3 + $0x111] sm:$0xff] %vm2431_vm6, %v2420_v36  ;;  %v1455_v33 = vpop.f32.mrf.mxu0  ;;  %4088 = vmatpush.xpose.msk.msrb.mxu1 %vm2431_vm6, %v6088_v46 }
 0x302   : > { %v1668_v43 = vadd.f32 %v1667_v2, %v1455_v33  ;;  %v6137_v2 = vld [vmem:[#allocation3 + $0x92] sm:$0xff] }
 0x304   : > { %v2353_v10 = vadd.f32 %v2301_v14, %v1668_v43 }
 0x305   : > { %4089 = vmatpush.xpose.msk.msrb.mxu1 %vm2431_vm6, %v6093_v48 }
 0x306   : > { %v2389_v15 = vadd.f32 %v6001_v60, %v2353_v10 }
 0x308   : > { %v2421_v9 = vmax.f32 %v2389_v15, 0.0  ;;  %v6141_v15 = vld [vmem:[#allocation3 + $0x82] sm:$0xff] }
 0x309   : > { %4090 = vmatpush.xpose.msk.msrb.mxu1 %vm2431_vm6, %v5988_v55  ;;  %v1458_v57 = vpop.f32.mrf.mxu0 }
 0x30a   : > { %2510 = vst.msk [vmem:[#allocation3 + $0x121] sm:$0xff] %vm2431_vm6, %v2421_v9 }
 0x30d   : > { %4091 = vmatpush.xpose.msk.msrb.mxu1 %vm2431_vm6, %v6101_v49 }
 0x30f   : > { %v2304_v26 = vpop.f32.mrf.mxu2 }
 0x310   : > { %v1670_v8 = vpop.f32.mrf.mxu1 }
 0x311   : > { %4111 = vmatpush.xpose.msk.msra.mxu1 %vm2431_vm6, %v6105_v39  ;;  %v1671_v21 = vadd.f32 %v1670_v8, %v1458_v57 }
 0x313   : > { %v2354_v38 = vadd.f32 %v2304_v26, %v1671_v21 }
 0x315   : > { %4112 = vmatpush.xpose.msk.msra.mxu1 %vm2431_vm6, %v6109_v40  ;;  %v2390_v32 = vadd.f32 %v6001_v60, %v2354_v38  ;;  %v4170_v38 = vpop.permute.xlu2 %4169 }
 0x317   : > { %v2422_v12 = vmax.f32 %v2390_v32, 0.0  ;;  %v6148_v32 = vld [vmem:[#allocation3 + $0x7a] sm:$0xff] }
 0x318   : > { %v1673_v0 = vpop.f32.mrf.mxu1 }
 0x319   : > { %4113 = vmatpush.xpose.msk.msra.mxu1 %vm2431_vm6, %v6114_v59  ;;  %2511 = vst.msk [vmem:[#allocation3 + $0x129] sm:$0xff] %vm2431_vm6, %v2422_v12  ;;  %v4171_v12 = vunpack.i.l.bf16 %v4170_v38 }
 0x31d   : > { %4114 = vmatpush.xpose.msk.msra.mxu1 %vm2431_vm6, %v6119_v52 }
 0x31e   : > { %v2307_v30 = vpop.f32.mrf.mxu2 }
 0x320   : > { %v1461_v19 = vpop.f32.mrf.mxu0  ;;  %v1676_v17 = vpop.f32.mrf.mxu1 }
 0x321   : > { %4115 = vmatpush.xpose.msk.msra.mxu1 %vm2431_vm6, %v6123_v51  ;;  %v1674_v58 = vadd.f32 %v1673_v0, %v1461_v19  ;;  %v6155_v19 = vld [vmem:[#allocation3 + $0x6a] sm:$0xff] }
 0x323   : > { %v2355_v4 = vadd.f32 %v2307_v30, %v1674_v58  ;;  %v4172_v30 = vunpack.i.h.bf16 %v4170_v38 }
 0x325   : > { %4116 = vmatpush.xpose.msk.msra.mxu1 %vm2431_vm6, %v6127_v29  ;;  %v2391_v47 = vadd.f32 %v6001_v60, %v2355_v4 }
 0x327   : > { %v2423_v61 = vmax.f32 %v2391_v47, 0.0  ;;  %v2310_v43 = vpop.f32.mrf.mxu2  ;;  %v3015_v47 = vsel %vm2431_vm6, %v5841_v23, %v4171_v12  ;;  %v6175_v12 = vld [vmem:[#allocation3 + $0x4a] sm:$0xff] }
 0x329   : > { %4117 = vmatpush.xpose.msk.msra.mxu1 %vm2431_vm6, %v6132_v45  ;;  %2512 = vst.msk [vmem:[#allocation3 + $0x139] sm:$0xff] %vm2431_vm6, %v2423_v61  ;;  %v1464_v36 = vpop.f32.mrf.mxu0  ;;  %v4175_v61 = vpop.permute.xlu0 %4174 }
 0x32a   : > { %v1677_v33 = vadd.f32 %v1676_v17, %v1464_v36  ;;  %v6161_v36 = vld [vmem:[#allocation3 + $0x62] sm:$0xff] }
 0x32c   : > { %v2356_v14 = vadd.f32 %v2310_v43, %v1677_v33 }
 0x32d   : > { %4118 = vmatpush.xpose.msk.msra.mxu1 %vm2431_vm6, %v6137_v2  ;;  %v4165_v10 = vpop.permute.xlu1 %4164 }
 0x32e   : > { %v2392_v9 = vadd.f32 %v6001_v60, %v2356_v14  ;;  %v4166_v57 = vunpack.i.l.bf16 %v4165_v10  ;;  %v4167_v21 = vunpack.i.h.bf16 %v4165_v10  ;;  %v4176_v14 = vunpack.i.l.bf16 %v4175_v61 }
 0x32f   : > { %v3014_v10 = vsel %vm2431_vm6, %v5849_v22, %v4172_v30 }
 0x330   : > { %v2424_v8 = vmax.f32 %v2392_v9, 0.0  ;;  %v3017_v26 = vsel %vm2431_vm6, %v5876_v53, %v4166_v57  ;;  %v3016_v0 = vsel %vm2431_vm6, %v5874_v28, %v4167_v21  ;;  %v6168_v57 = vld [vmem:[#allocation3 + $0x52] sm:$0xff]  ;;  %v4177_v21 = vunpack.i.h.bf16 %v4175_v61 }
 0x331   : > { %4119 = vmatpush.xpose.msk.msra.mxu1 %vm2431_vm6, %v6141_v15  ;;  %3139 = vmatpush.xpose.msra.mxu3 %v3017_v26  ;;  %v1467_v58 = vpop.f32.mrf.mxu0  ;;  %v3013_v26 = vsel %vm2431_vm6, %v5947_v5, %v4176_v14 }
 0x332   : > { %2513 = vst.msk [vmem:[#allocation3 + $0x141] sm:$0xff] %vm2431_vm6, %v2424_v8  ;;  %v3012_v30 = vsel %vm2431_vm6, %v5949_v6, %v4177_v21 }
 0x335   : > { %4120 = vmatpush.xpose.msk.msra.mxu1 %vm2431_vm6, %v6148_v32  ;;  %3140 = vmatpush.xpose.msra.mxu3 %v3016_v0  ;;  %v4180_v38 = vpop.permute.xlu1 %4179 }
 0x336   : > { %v4181_v0 = vunpack.i.l.bf16 %v4180_v38 }
 0x337   : > { %v2313_v33 = vpop.f32.mrf.mxu2 }
 0x338   : > { %v1679_v4 = vpop.f32.mrf.mxu1 }
 0x339   : > { %4121 = vmatpush.xpose.msk.msra.mxu1 %vm2431_vm6, %v6155_v19  ;;  %v1680_v17 = vadd.f32 %v1679_v4, %v1467_v58  ;;  %3141 = vmatpush.xpose.msra.mxu3 %v3015_v47  ;;  %v6181_v58 = vld [vmem:[#allocation3 + $0x3a] sm:$0xff]  ;;  %v4182_v47 = vunpack.i.h.bf16 %v4180_v38 }
 0x33a   : > { %6859 = vst [vmem:[#allocation5_spill] sm:$0xff] %v6181_v58 }
 0x33b   : > { %v2357_v43 = vadd.f32 %v2313_v33, %v1680_v17  ;;  %v3011_v17 = vsel %vm2431_vm6, %v5888_v42, %v4181_v0  ;;  %v4185_v33 = vpop.permute.xlu2 %4184  ;;  %v3010_v21 = vsel %vm2431_vm6, %v5900_v62, %v4182_v47  ;;  %v4190_v0 = vpop.permute.xlu0 %4189 }
 0x33d   : > { %4122 = vmatpush.xpose.msk.msra.mxu1 %vm2431_vm6, %v6161_v36  ;;  %v2393_v9 = vadd.f32 %v6001_v60, %v2357_v43  ;;  %3142 = vmatpush.xpose.msra.mxu3 %v3014_v10  ;;  %v6187_v10 = vld [vmem:[#allocation3 + $0x32] sm:$0xff] }
 0x33f   : > { %v2425_v8 = vmax.f32 %v2393_v9, 0.0 }
 0x341   : > { %4123 = vmatpush.xpose.msk.msra.mxu1 %vm2431_vm6, %v6168_v57  ;;  %2514 = vst.msk [vmem:[#allocation3 + $0x151] sm:$0xff] %vm2431_vm6, %v2425_v8  ;;  %3143 = vmatpush.xpose.msra.mxu3 %v3013_v26  ;;  %v1682_v4 = vpop.f32.mrf.mxu1  ;;  %v4186_v8 = vunpack.i.l.bf16 %v4185_v33 }
 0x345   : > { %4124 = vmatpush.xpose.msk.msra.mxu1 %vm2431_vm6, %v6175_v12  ;;  %3144 = vmatpush.xpose.msra.mxu3 %v3012_v30  ;;  %v4187_v30 = vunpack.i.h.bf16 %v4185_v33  ;;  %v4192_v33 = vunpack.i.h.bf16 %v4190_v0 }
 0x346   : > { %v2316_v43 = vpop.f32.mrf.mxu2 }
 0x347   : > { %v3008_v47 = vsel %vm2431_vm6, %v5865_v35, %v4187_v30 }
 0x348   : > { %v1470_v61 = vpop.f32.mrf.mxu0 }
 0x349   : > { %4125 = vmatpush.xpose.msk.msra.mxu1 %vm2431_vm6, %v6181_v58  ;;  %v1683_v14 = vadd.f32 %v1682_v4, %v1470_v61  ;;  %3145 = vmatpush.xpose.msra.mxu3 %v3011_v17  ;;  %v3009_v4 = vsel %vm2431_vm6, %v5860_v7, %v4186_v8  ;;  %v1685_v61 = vpop.f32.mrf.mxu1 }
 0x34b   : > { %v2358_v9 = vadd.f32 %v2316_v43, %v1683_v14  ;;  %v4191_v14 = vunpack.i.l.bf16 %v4190_v0  ;;  %v6212_v0 = vld [vmem:[#allocation3 + $0x111] sm:$0xff] }
 0x34d   : > { %4126 = vmatpush.xpose.msk.msra.mxu1 %vm2431_vm6, %v6187_v10  ;;  %v2394_v26 = vadd.f32 %v6001_v60, %v2358_v9  ;;  %3146 = vmatpush.xpose.msra.mxu3 %v3010_v21  ;;  %v3007_v8 = vsel %vm2431_vm6, %v5963_v16, %v4191_v14 }
 0x34f   : > { %v2426_v38 = vmax.f32 %v2394_v26, 0.0  ;;  %v2319_v43 = vpop.f32.mrf.mxu2  ;;  %v6202_v26 = vld [vmem:[#allocation3 + $0x151] sm:$0xff] }
 0x350   : > { %6860 = vst [vmem:[#allocation11_spill] sm:$0xff] %v6202_v26 }
 0x351   : > { %2515 = vst.msk [vmem:[#allocation3 + $0x159] sm:$0xff] %vm2431_vm6, %v2426_v38  ;;  %v1473_v17 = vpop.f32.mrf.mxu0  ;;  %3147 = vmatpush.xpose.msra.mxu3 %v3009_v4  ;;  %v4195_v4 = vpop.permute.xlu1 %4194 }
 0x352   : > { %v1686_v20 = vadd.f32 %v1685_v61, %v1473_v17  ;;  %v4196_v30 = vunpack.i.l.bf16 %v4195_v4  ;;  %v4197_v61 = vunpack.i.h.bf16 %v4195_v4 }
 0x354   : > { %v2359_v58 = vadd.f32 %v2319_v43, %v1686_v20  ;;  %v3005_v14 = vsel %vm2431_vm6, %v5910_v25, %v4196_v30  ;;  %v3004_v4 = vsel %vm2431_vm6, %v5916_v56, %v4197_v61  ;;  %v2779_v25 = vld [vmem:[#allocation3 + $0x9] sm:$0xff] }
 0x355   : > { %3148 = vmatpush.xpose.msra.mxu3 %v3008_v47  ;;  %v6216_v47 = vld [vmem:[#allocation3 + $0x109] sm:$0xff] }
 0x356   : > { %v2395_v9 = vadd.f32 %v6001_v60, %v2359_v58  ;;  %v3006_v58 = vsel %vm2431_vm6, %v5965_v11, %v4192_v33  ;;  %v6224_v30 = vld [vmem:[#allocation3 + $0x150] sm:$0xff] }
 0x358   : > { %v2427_v21 = vmax.f32 %v2395_v9, 0.0  ;;  %v6204_v38 = vld [vmem:[#allocation3 + $0x159] sm:$0xff]  ;;  %v4200_v9 = vpop.permute.xlu2 %4199 }
 0x359   : > { %6861 = vst [vmem:[#allocation4_spill] sm:$0xff] %v6204_v38  ;;  %3149 = vmatpush.xpose.msra.mxu3 %v3007_v8  ;;  %v4213_v20 = vpack.i.bf16 %v6202_v26, %v6204_v38  ;;  %v1476_v17 = vpop.f32.mrf.mxu0  ;;  %v4201_v33 = vunpack.i.l.bf16 %v4200_v9 }
 0x35a   : > { %2516 = vst.msk [vmem:[#allocation3 + $0x169] sm:$0xff] %vm2431_vm6, %v2427_v21  ;;  %v4228_v21 = vpack.i.bf16 %v6216_v47, %v6212_v0 }
 0x35b   : > { %4214 = vrot.lane.b32.xlu2 %v4213_v20, %s4434_s7 }
 0x35d   : > { %3150 = vmatpush.xpose.msra.mxu3 %v3006_v58 }
 0x35f   : > { %v2322_v20 = vpop.f32.mrf.mxu2 }
 0x360   : > { %v1688_v43 = vpop.f32.mrf.mxu1 }
 0x361   : > { %v1689_v8 = vadd.f32 %v1688_v43, %v1476_v17  ;;  %3151 = vmatpush.xpose.msra.mxu3 %v3005_v14  ;;  %v4202_v17 = vunpack.i.h.bf16 %v4200_v9  ;;  %v3003_v43 = vsel %vm2431_vm6, %v2779_v25, %v4201_v33  ;;  %v4258_v14 = vpack.i.bf16 %v6224_v30, %v6033_v31  ;;  %v6240_v31 = vld [vmem:[#allocation3 + $0xd9] sm:$0xff] }
 0x363   : > { %v2360_v26 = vadd.f32 %v2322_v20, %v1689_v8  ;;  %4229 = vrot.lane.b32.xlu2 %v4228_v21, %s4434_s7  ;;  %v2778_v8 = vld [vmem:[#allocation3 + $0x1] sm:$0xff]  ;;  %v6236_v21 = vld [vmem:[#allocation3 + $0x169] sm:$0xff] }
 0x364   : > { %v3002_v56 = vsel %vm2431_vm6, %v2778_v8, %v4202_v17  ;;  %v6250_v17 = vld [vmem:[#allocation3 + $0x129] sm:$0xff] }
 0x365   : > { %v2396_v58 = vadd.f32 %v6001_v60, %v2360_v26  ;;  %3152 = vmatpush.xpose.msra.mxu3 %v3004_v4  ;;  %v6232_v26 = vld [vmem:[#allocation3 + $0xe1] sm:$0xff] }
 0x367   : > { %v2428_v38 = vmax.f32 %v2396_v58, 0.0 }
 0x368   : > { %v1691_v61 = vpop.f32.mrf.mxu1 }
 0x369   : > { %2517 = vst.msk [vmem:[#allocation3 + $0x171] sm:$0xff] %vm2431_vm6, %v2428_v38  ;;  %3153 = vmatpush.xpose.msra.mxu3 %v3003_v43 }
 0x36b   : > { %4259 = vrot.lane.b32.xlu2 %v4258_v14, %s4434_s7  ;;  %v6252_v14 = vld [vmem:[#allocation3 + $0x121] sm:$0xff] }
 0x36d   : > { %3154 = vmatpush.xpose.msra.mxu3 %v3002_v56 }
 0x36e   : > { %v2325_v20 = vpop.f32.mrf.mxu2 }
 0x370   : > { %v1479_v9 = vpop.f32.mrf.mxu0  ;;  %v6238_v38 = vld [vmem:[#allocation3 + $0x171] sm:$0xff]  ;;  %v1694_v8 = vpop.f32.mrf.mxu1 }
 0x371   : > { %4042 = vmatpush.xpose.msk.msrb.mxu3 %vm2431_vm6, %v6232_v26  ;;  %v1692_v33 = vadd.f32 %v1691_v61, %v1479_v9  ;;  %v4208_v4 = vpack.i.bf16 %v6236_v21, %v6238_v38  ;;  %v4223_v61 = vpack.i.bf16 %v6252_v14, %v6250_v17 }
 0x373   : > { %v2361_v58 = vadd.f32 %v2325_v20, %v1692_v33  ;;  %4209 = vrot.lane.b32.xlu1 %v4208_v4, %s4434_s7 }
 0x375   : > { %4043 = vmatpush.xpose.msk.msrb.mxu3 %vm2431_vm6, %v6240_v31  ;;  %v2397_v25 = vadd.f32 %v6001_v60, %v2361_v58  ;;  %v4238_v58 = vpack.i.bf16 %v6240_v31, %v6232_v26 }
 0x377   : > { %v2429_v43 = vmax.f32 %v2397_v25, 0.0  ;;  %v2328_v20 = vpop.f32.mrf.mxu2 }
 0x379   : > { %4044 = vmatpush.xpose.msk.msrb.mxu3 %vm2431_vm6, %v5937_v18  ;;  %2518 = vst.msk [vmem:[#allocation3 + $0x181] sm:$0xff] %vm2431_vm6, %v2429_v43  ;;  %v1482_v56 = vpop.f32.mrf.mxu0 }
 0x37a   : > { %v1695_v9 = vadd.f32 %v1694_v8, %v1482_v56 }
 0x37b   : > { %4224 = vrot.lane.b32.xlu1 %v4223_v61, %s4434_s7  ;;  %v6292_v61 = vld [vmem:[#allocation3 + $0x141] sm:$0xff] }
 0x37c   : > { %v2362_v18 = vadd.f32 %v2328_v20, %v1695_v9  ;;  %v6296_v9 = vld [vmem:[#allocation3 + $0x139] sm:$0xff] }
 0x37d   : > { %4045 = vmatpush.xpose.msk.msrb.mxu3 %vm2431_vm6, %v5935_v24  ;;  %v6271_v24 = vld [vmem:[#allocation3 + $0x172] sm:$0xff] }
 0x37e   : > { %v2398_v33 = vadd.f32 %v6001_v60, %v2362_v18 }
 0x380   : > { %v2430_v4 = vmax.f32 %v2398_v33, 0.0  ;;  %v2582_v60 = vld [vmem:[#allocation3 + $0x180] sm:$0xff] }
 0x381   : > { %4046 = vmatpush.xpose.msk.msrb.mxu3 %vm2431_vm6, %v5876_v53  ;;  %v4253_v53 = vpack.i.bf16 %v6271_v24, %v6114_v59  ;;  %v6275_v43 = vld [vmem:[#allocation3 + $0x181] sm:$0xff]  ;;  %v6309_v33 = vld [vmem:[#allocation3 + $0xf9] sm:$0xff] }
 0x382   : > { %2519 = vst.msk [vmem:[#allocation3 + $0x189] sm:$0xff] %vm2431_vm6, %v2430_v4  ;;  %v6290_v59 = vld [vmem:[#allocation3 + $0x15a] sm:$0xff]  ;;  %v6312_v4 = vld [vmem:[#allocation3 + $0x168] sm:$0xff] }
 0x383   : > { %4239 = vrot.lane.b32.xlu1 %v4238_v58, %s4434_s7  ;;  %v4278_v20 = vpack.i.bf16 %v6290_v59, %v6123_v51  ;;  %6862 = vst [vmem:[#allocation23_spill] sm:$0xff] %v6312_v4  ;;  %v6314_v51 = vld [vmem:[#allocation3 + $0xf1] sm:$0xff] }
 0x385   : > { %4047 = vmatpush.xpose.msk.msrb.mxu3 %vm2431_vm6, %v5874_v28 }
 0x389   : > { %4048 = vmatpush.xpose.msk.msrb.mxu3 %vm2431_vm6, %v5841_v23  ;;  %v2583_v25 = vld [vmem:[#allocation3 + $0x188] sm:$0xff]  ;;  %v6288_v23 = vld [vmem:[#allocation3 + $0x140] sm:$0xff] }
 0x38a   : > { %v6277_v8 = vld [vmem:[#allocation3 + $0x189] sm:$0xff]  ;;  %v4273_v28 = vpack.i.bf16 %v2582_v60, %v2583_v25  ;;  %v4233_v60 = vpack.i.bf16 %v6314_v51, %v6309_v33 }
 0x38b   : > { %v4203_v56 = vpack.i.bf16 %v6275_v43, %v6277_v8  ;;  %4254 = vrot.lane.b32.xlu1 %v4253_v53, %s4434_s7  ;;  %v3464_v18 = vld [vmem:[#allocation3 + $0x182] sm:$0xff]  ;;  %v6330_v53 = vld [vmem:[#allocation3 + $0x170] sm:$0xff] }
 0x38c   : > { %4274 = vrot.lane.b32.xlu2 %v4273_v28, %s4434_s7  ;;  %v4298_v58 = vpack.i.bf16 %v3464_v18, %v6312_v4  ;;  %6863 = vst [vmem:[#allocation6_spill] sm:$0xff] %v6330_v53  ;;  %v4243_v28 = vpack.i.bf16 %v6330_v53, %v6006_v34  ;;  %v6392_v18 = vld [vmem:[#allocation3 + $0x10a] sm:$0xff] }
 0x38d   : > { %4049 = vmatpush.xpose.msk.msrb.mxu3 %vm2431_vm6, %v5849_v22  ;;  %4204 = vrot.lane.b32.xlu0 %v4203_v56, %s4434_s7  ;;  %v4268_v22 = vpack.i.bf16 %v6288_v23, %v6037_v44  ;;  %v3465_v44 = vld [vmem:[#allocation3 + $0x18a] sm:$0xff]  ;;  %6864 = vst [vmem:[#allocation26_spill] sm:$0xff] %v6392_v18 }
 0x391   : > { %4050 = vmatpush.xpose.msk.msrb.mxu3 %vm2431_vm6, %v5947_v5  ;;  %v4218_v5 = vpack.i.bf16 %v6296_v9, %v6292_v61 }
 0x393   : > { %4269 = vrot.lane.b32.xlu1 %v4268_v22, %s4434_s7  ;;  %v6364_v22 = vld [vmem:[#allocation3 + $0x108] sm:$0xff] }
 0x394   : > { %4279 = vrot.lane.b32.xlu2 %v4278_v20, %s4434_s7  ;;  %v6377_v20 = vld [vmem:[#allocation3 + $0xf8] sm:$0xff] }
 0x395   : > { %4051 = vmatpush.xpose.msk.msrb.mxu3 %vm2431_vm6, %v5949_v6  ;;  %4219 = vrot.lane.b32.xlu0 %v4218_v5, %s4434_s7  ;;  %v4288_v6 = vpack.i.bf16 %v6018_v37, %v3465_v44  ;;  %v6328_v37 = vld [vmem:[#allocation3 + $0x128] sm:$0xff]  ;;  %v6379_v5 = vld [vmem:[#allocation3 + $0x112] sm:$0xff] }
 0x396   : > { %v4303_v25 = vpack.i.bf16 %v6328_v37, %v6054_v54  ;;  %v6381_v44 = vld [vmem:[#allocation3 + $0x138] sm:$0xff] }
 0x399   : > { %4052 = vmatpush.xpose.msk.msrb.mxu3 %vm2431_vm6, %v5888_v42  ;;  %v6326_v42 = vld [vmem:[#allocation3 + $0x152] sm:$0xff] }
 0x39b   : > { %4289 = vrot.lane.b32.xlu1 %v4288_v6, %s4434_s7  ;;  %v6394_v6 = vld [vmem:[#allocation3 + $0x142] sm:$0xff] }
 0x39c   : > { %4299 = vrot.lane.b32.xlu2 %v4298_v58, %s4434_s7  ;;  %v4358_v58 = vpack.i.bf16 %v6392_v18, %v6161_v36 }
 0x39d   : > { %4053 = vmatpush.xpose.msk.msrb.mxu3 %vm2431_vm6, %v5900_v62  ;;  %4234 = vrot.lane.b32.xlu0 %v4233_v60, %s4434_s7  ;;  %v4293_v62 = vpack.i.bf16 %v6326_v42, %v6127_v29  ;;  %v6347_v29 = vld [vmem:[#allocation3 + $0x13a] sm:$0xff]  ;;  %v6408_v60 = vld [vmem:[#allocation3 + $0xf2] sm:$0xff] }
 0x39e   : > { %v4318_v34 = vpack.i.bf16 %v6347_v29, %v6137_v2  ;;  %v4333_v2 = vpack.i.bf16 %v6364_v22, %v6083_v1  ;;  %v4348_v1 = vpack.i.bf16 %v6379_v5, %v6155_v19  ;;  %v6406_v19 = vld [vmem:[#allocation3 + $0x110] sm:$0xff]  ;;  %6866 = vst [vmem:[#allocation10_spill] sm:$0xff] %v6408_v60 }
 0x3a1   : > { %4054 = vmatpush.xpose.msk.msrb.mxu3 %vm2431_vm6, %v5860_v7  ;;  %v6345_v7 = vld [vmem:[#allocation3 + $0x120] sm:$0xff] }
 0x3a2   : > { %v4313_v54 = vpack.i.bf16 %v6345_v7, %v6071_v3  ;;  %v6366_v3 = vld [vmem:[#allocation3 + $0x16a] sm:$0xff] }
 0x3a3   : > { %4294 = vrot.lane.b32.xlu1 %v4293_v62, %s4434_s7  ;;  %v4373_v62 = vpack.i.bf16 %v5996_v27, %v6101_v49 }
 0x3a4   : > { %4304 = vrot.lane.b32.xlu2 %v4303_v25, %s4434_s7  ;;  %v4378_v25 = vpack.i.bf16 %v6408_v60, %v6175_v12 }
 0x3a5   : > { %4055 = vmatpush.xpose.msk.msrb.mxu3 %vm2431_vm6, %v5865_v35  ;;  %4244 = vrot.lane.b32.xlu0 %v4243_v28, %s4434_s7  ;;  %v6349_v35 = vld [vmem:[#allocation3 + $0x158] sm:$0xff]  ;;  %v6436_v28 = vld [vmem:[#allocation3 + $0xf0] sm:$0xff] }
 0x3a6   : > { %v4248_v56 = vpack.i.bf16 %v6349_v35, %v6024_v63  ;;  %v4263_v63 = vpack.i.bf16 %v6366_v3, %v6119_v52  ;;  %v4283_v52 = vpack.i.bf16 %v6381_v44, %v6049_v50  ;;  %v6865_v50 = vpack.i.bf16 %v5984_v13, %v5988_v55  ;;  %v6421_v13 = vld [vmem:[#allocation3 + $0x122] sm:$0xff]  ;;  %v6423_v55 = vld [vmem:[#allocation3 + $0x18] sm:$0xff] }
 0x3a7   : > { %v4388_v27 = vpack.i.bf16 %v6423_v55, %v6105_v39  ;;  %v4338_v49 = vpack.i.bf16 %v6421_v13, %v6148_v32  ;;  %v4353_v39 = vpack.i.bf16 %v6436_v28, %v6093_v48  ;;  %v6447_v32 = vld [vmem:[#allocation3 + $0xfa] sm:$0xff] }
 0x3a8   : > { %6868 = vst [vmem:[#allocation7_spill] sm:$0xff] %v6447_v32 }
 0x3a9   : > { %4056 = vmatpush.xpose.msk.msrb.mxu3 %vm2431_vm6, %v5963_v16  ;;  %v6362_v16 = vld [vmem:[#allocation3 + $0x12a] sm:$0xff] }
 0x3ab   : > { %4314 = vrot.lane.b32.xlu1 %v4313_v54, %s4434_s7  ;;  %v6438_v54 = vld [vmem:[#allocation3 + $0x1a] sm:$0xff] }
 0x3ac   : > { %4319 = vrot.lane.b32.xlu2 %v4318_v34, %s4434_s7  ;;  %6867 = vst [vmem:[#allocation14_spill] sm:$0xff] %v6438_v54  ;;  %v4368_v34 = vpack.i.bf16 %v6447_v32, %v6168_v57 }
 0x3ad   : > { %4057 = vmatpush.xpose.msk.msrb.mxu3 %vm2431_vm6, %v5965_v11  ;;  %4249 = vrot.lane.b32.xlu0 %v4248_v56, %s4434_s7  ;;  %v4328_v11 = vpack.i.bf16 %v6362_v16, %v6141_v15  ;;  %v4343_v15 = vpack.i.bf16 %v6377_v20, %v6088_v46  ;;  %v4308_v46 = vpack.i.bf16 %v6394_v6, %v6132_v45 }
 0x3ae   : > { %v4323_v45 = vpack.i.bf16 %v6406_v19, %v6075_v41  ;;  %v4393_v41 = vpack.i.bf16 %v6109_v40, %v6187_v10  ;;  %v4041_v10 = vld [vmem:[%s6787_s4 + $0x8] sm:$0x77] }
 0x3af   : > { %3037 = vst [vmem:[#allocation1] ss:$2 sm:$0xff] %v4041_v10  ;;  %v2777_v10 = vld [vmem:[%s6787_s4] sm:$0x77] }
 0x3b3   : > { %4329 = vrot.lane.b32.xlu1 %v4328_v11, %s4434_s7 }
 0x3b4   : > { %4334 = vrot.lane.b32.xlu2 %v4333_v2, %s4434_s7 }
 0x3b5   : > { %4264 = vrot.lane.b32.xlu0 %v4263_v63, %s4434_s7  ;;  %v6412_v36 = vpop.permute.xlu2 %4214 }
 0x3b6   : > { %v6455_v2 = vld.sshfl [vmem:[#allocation1] sm:$0xff pattern:$0x75316420] }
 0x3b7   : > { %3155 = vmatmul.f32.vlgmr.msra.gmra.mxu3 %v6455_v2 }
 0x3bb   : > { %4344 = vrot.lane.b32.xlu1 %v4343_v15, %s4434_s7 }
 0x3bc   : > { %4349 = vrot.lane.b32.xlu2 %v4348_v1, %s4434_s7  ;;  %v6460_v1 = vld [vmem:[#allocation3 + $0x20] sm:$0xff] }
 0x3bd   : > { %4284 = vrot.lane.b32.xlu0 %v4283_v52, %s4434_s7  ;;  %v6432_v12 = vpop.permute.xlu2 %4229  ;;  %v6869_v52 = vld [vmem:[#allocation5_spill] sm:$0xff] }
 0x3c3   : > { %4359 = vrot.lane.b32.xlu1 %v4358_v58, %s4434_s7  ;;  %v4383_v58 = vpack.i.bf16 %v6869_v52, %v6460_v1 }
 0x3c4   : > { %4364 = vrot.lane.b32.xlu2 %v6865_v50, %s4434_s7  ;;  %v6469_v50 = vld [vmem:[#allocation3 + $0x22] sm:$0xff] }
 0x3c5   : > { %4309 = vrot.lane.b32.xlu0 %v4308_v46, %s4434_s7  ;;  %v6445_v40 = vpop.permute.xlu2 %4259  ;;  %6870 = vst [vmem:[#allocation13_spill] sm:$0xff] %v6469_v50 }
 0x3cb   : > { %4374 = vrot.lane.b32.xlu1 %v4373_v62, %s4434_s7 }
 0x3cc   : > { %4379 = vrot.lane.b32.xlu2 %v4378_v25, %s4434_s7 }
 0x3cd   : > { %4324 = vrot.lane.b32.xlu0 %v4323_v45, %s4434_s7 }
 0x3d3   : > { %4389 = vrot.lane.b32.xlu1 %v4388_v27, %s4434_s7 }
 0x3d4   : > { %4394 = vrot.lane.b32.xlu2 %v4393_v41, %s4434_s7 }
 0x3d5   : > { %4339 = vrot.lane.b32.xlu0 %v4338_v49, %s4434_s7 }
 0x3db   : > { %3530 = vrot.lane.b32.xlu1 %v6438_v54, %s4434_s7 }
 0x3dd   : > { %4354 = vrot.lane.b32.xlu0 %v4353_v39, %s4434_s7  ;;  %v6479_v39 = vld.sshfl [vmem:[#allocation1 + $0x8] sm:$0xff pattern:$0x75316420] }
 0x3de   : > { %4058 = vmatmul.msk.f32.vlgmr.msrb.gmra.mxu3 %vm2431_vm6, %v6479_v39  ;;  %3220 = vst [vmem:[#allocation1] ss:$2 sm:$0xff] %v2777_v10 }
 0x3e5   : > { %4369 = vrot.lane.b32.xlu0 %v4368_v34, %s4434_s7  ;;  %v4210_v48 = vpop.permute.xlu1 %4209 }
 0x3e6   : > { %v4275_v56 = vpop.permute.xlu2 %4274  ;;  %v4211_v34 = vunpack.i.l.bf16 %v4210_v48 }
 0x3e7   : > { %v4276_v11 = vunpack.i.l.bf16 %v4275_v56  ;;  %v4277_v63 = vunpack.i.h.bf16 %v4275_v56 }
 0x3e9   : > { %v2776_v15 = vsel %vm2431_vm6, %v6330_v53, %v4276_v11  ;;  %v2775_v57 = vsel %vm2431_vm6, %v6312_v4, %v4277_v63  ;;  %v4212_v63 = vunpack.i.h.bf16 %v4210_v48 }
 0x3ea   : > { %3362 = vmatpush.xpose.msrb.mxu2 %v2776_v15  ;;  %v6871_v15 = vld [vmem:[#allocation4_spill] sm:$0xff] }
 0x3eb   : > { %v3031_v52 = vsel %vm2431_vm6, %v6871_v15, %v4211_v34 }
 0x3ed   : > { %4384 = vrot.lane.b32.xlu0 %v4383_v58, %s4434_s7  ;;  %v6467_v46 = vpop.permute.xlu1 %4224 }
 0x3ee   : > { %3363 = vmatpush.xpose.msrb.mxu2 %v2775_v57  ;;  %v4216_v57 = vunpack.i.l.bf16 %v6412_v36 }
 0x3f0   : > { %v3029_v48 = vsel %vm2431_vm6, %v6292_v61, %v4216_v57 }
 0x3f5   : > { %3532 = vrot.lane.b32.xlu0 %v6469_v50, %s4434_s7  ;;  %v6473_v62 = vpop.permute.xlu1 %4239 }
 0x3fd   : > { %v6477_v41 = vpop.permute.xlu1 %4254 }
 0x3ff   : > { %v4205_v45 = vpop.permute.xlu0 %4204 }
 0x400   : > { %v4206_v25 = vunpack.i.l.bf16 %v4205_v45  ;;  %v4207_v27 = vunpack.i.h.bf16 %v4205_v45  ;;  %v6493_v45 = vpop.permute.xlu2 %4279 }
 0x402   : > { %v3033_v49 = vsel %vm2431_vm6, %v6238_v38, %v4206_v25  ;;  %v3032_v56 = vsel %vm2431_vm6, %v6236_v21, %v4207_v27  ;;  %v6872_v25 = vld [vmem:[#allocation11_spill] sm:$0xff]  ;;  %v4217_v27 = vunpack.i.h.bf16 %v6412_v36 }
 0x403   : > { %3179 = vmatpush.xpose.msra.mxu3 %v3033_v49  ;;  %v3030_v49 = vsel %vm2431_vm6, %v6872_v25, %v4212_v63 }
 0x405   : > { %v6490_v58 = vpop.permute.xlu1 %4269 }
 0x407   : > { %v4220_v11 = vpop.permute.xlu0 %4219  ;;  %3180 = vmatpush.xpose.msra.mxu3 %v3032_v56  ;;  %v3028_v56 = vsel %vm2431_vm6, %v6296_v9, %v4217_v27 }
 0x408   : > { %v4221_v34 = vunpack.i.l.bf16 %v4220_v11  ;;  %v6506_v50 = vpop.permute.xlu2 %4299  ;;  %v4222_v53 = vunpack.i.h.bf16 %v4220_v11 }
 0x409   : > { %v4301_v60 = vunpack.i.l.bf16 %v6506_v50 }
 0x40a   : > { %v3027_v57 = vsel %vm2431_vm6, %v6250_v17, %v4221_v34  ;;  %v3026_v11 = vsel %vm2431_vm6, %v6252_v14, %v4222_v53 }
 0x40b   : > { %3181 = vmatpush.xpose.msra.mxu3 %v3031_v52 }
 0x40d   : > { %v6504_v52 = vpop.permute.xlu1 %4289 }
 0x40e   : > { %v4292_v36 = vunpack.i.h.bf16 %v6504_v52 }
 0x40f   : > { %v6497_v10 = vpop.permute.xlu0 %4234  ;;  %3182 = vmatpush.xpose.msra.mxu3 %v3030_v49  ;;  %v2535_v49 = vld [vmem:[#allocation3 + $0xb0] sm:$0xff] }
 0x413   : > { %3183 = vmatpush.xpose.msra.mxu3 %v3029_v48 }
 0x417   : > { %v4245_v54 = vpop.permute.xlu0 %4244  ;;  %3184 = vmatpush.xpose.msra.mxu3 %v3028_v56  ;;  %v2534_v56 = vld [vmem:[#allocation3 + $0xa8] sm:$0xff] }
 0x418   : > { %v4247_v63 = vunpack.i.h.bf16 %v4245_v54  ;;  %v4246_v4 = vunpack.i.l.bf16 %v4245_v54  ;;  %v4226_v54 = vunpack.i.l.bf16 %v6467_v46  ;;  %v2759_v32 = vsel %vm2431_vm6, %v2534_v56, %v4292_v36 }
 0x419   : > { %v4271_v56 = vunpack.i.l.bf16 %v6490_v58 }
 0x41a   : > { %v2760_v48 = vsel %vm2431_vm6, %v2535_v49, %v4246_v4  ;;  %v2774_v27 = vsel %vm2431_vm6, %v6349_v35, %v4247_v63  ;;  %v2773_v4 = vsel %vm2431_vm6, %v6224_v30, %v4301_v60  ;;  %v4261_v49 = vunpack.i.l.bf16 %v6445_v40 }
 0x41b   : > { %3185 = vmatpush.xpose.msra.mxu3 %v3027_v57  ;;  %3322 = vmatpush.xpose.msrb.mxu0 %v2760_v48  ;;  %v6522_v57 = vpop.permute.xlu1 %4294  ;;  %v2533_v48 = vld [vmem:[#allocation3 + $0x98] sm:$0xff]  ;;  %v3025_v53 = vsel %vm2431_vm6, %v6212_v0, %v4226_v54  ;;  %v4262_v30 = vunpack.i.h.bf16 %v6445_v40  ;;  %v4231_v60 = vunpack.i.l.bf16 %v6432_v12  ;;  %v4305_v54 = vpop.permute.xlu2 %4304  ;;  %v2531_v40 = vld [vmem:[#allocation3 + $0x80] sm:$0xff] }
 0x41c   : > { %3364 = vmatpush.xpose.msrb.mxu2 %v2774_v27  ;;  %v4227_v27 = vunpack.i.h.bf16 %v6467_v46 }
 0x41e   : > { %v3024_v46 = vsel %vm2431_vm6, %v6216_v47, %v4227_v27  ;;  %v2756_v47 = vsel %vm2431_vm6, %v2531_v40, %v4271_v56  ;;  %v4241_v40 = vunpack.i.l.bf16 %v6473_v62 }
 0x41f   : > { %v4250_v18 = vpop.permute.xlu0 %4249  ;;  %3186 = vmatpush.xpose.msra.mxu3 %v3026_v11  ;;  %3323 = vmatpush.xpose.msrb.mxu0 %v2759_v32  ;;  %v4272_v11 = vunpack.i.h.bf16 %v6490_v58 }
 0x420   : > { %v4252_v34 = vunpack.i.h.bf16 %v4250_v18  ;;  %v4251_v63 = vunpack.i.l.bf16 %v4250_v18  ;;  %3365 = vmatpush.xpose.msrb.mxu2 %v2773_v4  ;;  %v2532_v18 = vld [vmem:[#allocation3 + $0x90] sm:$0xff] }
 0x421   : > { %v2757_v0 = vsel %vm2431_vm6, %v2532_v18, %v4261_v49  ;;  %v2770_v58 = vsel %vm2431_vm6, %v6328_v37, %v4272_v11  ;;  %v2530_v18 = vld [vmem:[#allocation3 + $0x78] sm:$0xff] }
 0x422   : > { %v2758_v36 = vsel %vm2431_vm6, %v2533_v48, %v4251_v63  ;;  %v2772_v32 = vsel %vm2431_vm6, %v6288_v23, %v4252_v34  ;;  %v2771_v23 = vsel %vm2431_vm6, %v6381_v44, %v4262_v30  ;;  %v4232_v34 = vunpack.i.h.bf16 %v6432_v12 }
 0x423   : > { %3187 = vmatpush.xpose.msra.mxu3 %v3025_v53  ;;  %3324 = vmatpush.xpose.msrb.mxu0 %v2758_v36  ;;  %v3023_v63 = vsel %vm2431_vm6, %v6309_v33, %v4231_v60  ;;  %v4315_v49 = vpop.permute.xlu1 %4314  ;;  %v4236_v48 = vunpack.i.l.bf16 %v6497_v10  ;;  %v6550_v30 = vpop.permute.xlu2 %4319  ;;  %v4237_v60 = vunpack.i.h.bf16 %v6497_v10 }
 0x424   : > { %3366 = vmatpush.xpose.msrb.mxu2 %v2772_v32  ;;  %v3022_v27 = vsel %vm2431_vm6, %v6314_v51, %v4232_v34  ;;  %v4306_v32 = vunpack.i.l.bf16 %v4305_v54  ;;  %v4316_v34 = vunpack.i.l.bf16 %v4315_v49 }
 0x425   : > { %v3021_v56 = vsel %vm2431_vm6, %v6232_v26, %v4236_v48  ;;  %v3020_v10 = vsel %vm2431_vm6, %v6240_v31, %v4237_v60  ;;  %v4242_v48 = vunpack.i.h.bf16 %v6473_v62 }
 0x427   : > { %v6537_v4 = vpop.permute.xlu0 %4264  ;;  %3188 = vmatpush.xpose.msra.mxu3 %v3024_v46  ;;  %3325 = vmatpush.xpose.msrb.mxu0 %v2757_v0  ;;  %v4307_v0 = vunpack.i.h.bf16 %v4305_v54  ;;  %v2795_v54 = vld [vmem:[#allocation3 + $0xc9] sm:$0xff] }
 0x428   : > { %3367 = vmatpush.xpose.msrb.mxu2 %v2771_v23  ;;  %v2529_v23 = vld [vmem:[#allocation3 + $0x68] sm:$0xff] }
 0x429   : > { %v2754_v26 = vsel %vm2431_vm6, %v2529_v23, %v4306_v32 }
 0x42b   : > { %3189 = vmatpush.xpose.msra.mxu3 %v3023_v63  ;;  %3326 = vmatpush.xpose.msrb.mxu0 %v2756_v47  ;;  %v6558_v11 = vpop.permute.xlu1 %4329  ;;  %v4317_v63 = vunpack.i.h.bf16 %v4315_v49  ;;  %v4335_v31 = vpop.permute.xlu2 %4334 }
 0x42c   : > { %3368 = vmatpush.xpose.msrb.mxu2 %v2770_v58  ;;  %v2528_v58 = vld [vmem:[#allocation3 + $0x60] sm:$0xff]  ;;  %v4336_v23 = vunpack.i.l.bf16 %v4335_v31 }
 0x42d   : > { %v2767_v49 = vsel %vm2431_vm6, %v6364_v22, %v4317_v63 }
 0x42f   : > { %v4285_v53 = vpop.permute.xlu0 %4284  ;;  %3190 = vmatpush.xpose.msra.mxu3 %v3022_v27  ;;  %v3019_v27 = vsel %vm2431_vm6, %v2795_v54, %v4241_v40 }
 0x430   : > { %v4287_v12 = vunpack.i.h.bf16 %v4285_v53  ;;  %v4286_v36 = vunpack.i.l.bf16 %v4285_v53  ;;  %v2753_v53 = vsel %vm2431_vm6, %v2528_v58, %v4316_v34 }
 0x432   : > { %v2755_v37 = vsel %vm2431_vm6, %v2530_v18, %v4286_v36  ;;  %v2769_v46 = vsel %vm2431_vm6, %v6345_v7, %v4287_v12  ;;  %v2768_v7 = vsel %vm2431_vm6, %v6406_v19, %v4307_v0  ;;  %v2794_v12 = vld [vmem:[#allocation3 + $0xc1] sm:$0xff]  ;;  %v4337_v0 = vunpack.i.h.bf16 %v4335_v31 }
 0x433   : > { %3191 = vmatpush.xpose.msra.mxu3 %v3021_v56  ;;  %3327 = vmatpush.xpose.msrb.mxu0 %v2755_v37  ;;  %v2873_v36 = vld [vmem:[#allocation3 + $0x1a1] sm:$0xff]  ;;  %v3018_v32 = vsel %vm2431_vm6, %v2794_v12, %v4242_v48  ;;  %v4345_v18 = vpop.permute.xlu1 %4344  ;;  %v2527_v37 = vld [vmem:[#allocation3 + $0x50] sm:$0xff] }
 0x434   : > { %3369 = vmatpush.xpose.msrb.mxu2 %v2769_v46  ;;  %v2872_v46 = vld [vmem:[#allocation3 + $0x199] sm:$0xff]  ;;  %v4347_v63 = vunpack.i.h.bf16 %v4345_v18  ;;  %v2765_v58 = vsel %vm2431_vm6, %v6436_v28, %v4337_v0  ;;  %v6593_v12 = vld.sshfl [vmem:[#allocation1] sm:$0xff pattern:$0x75316420] }
 0x437   : > { %v6564_v47 = vpop.permute.xlu0 %4309  ;;  %3192 = vmatpush.xpose.msra.mxu3 %v3020_v10  ;;  %3328 = vmatpush.xpose.msrb.mxu0 %v2754_v26  ;;  %v6580_v10 = vpop.permute.xlu2 %4349  ;;  %v2526_v26 = vld [vmem:[#allocation3 + $0x48] sm:$0xff] }
 0x438   : > { %3370 = vmatpush.xpose.msrb.mxu2 %v2768_v7  ;;  %v4346_v7 = vunpack.i.l.bf16 %v4345_v18  ;;  %v2751_v54 = vsel %vm2431_vm6, %v2526_v26, %v4336_v23 }
 0x43b   : > { %3193 = vmatpush.xpose.msra.mxu3 %v3019_v27  ;;  %3329 = vmatpush.xpose.msrb.mxu0 %v2753_v53  ;;  %v2525_v27 = vld [vmem:[#allocation3 + $0x38] sm:$0xff]  ;;  %v2539_v53 = vld [vmem:[#allocation3 + $0xe0] sm:$0xff] }
 0x43c   : > { %3371 = vmatpush.xpose.msrb.mxu2 %v2767_v49  ;;  %v2750_v31 = vsel %vm2431_vm6, %v2525_v27, %v4346_v7  ;;  %v2764_v49 = vsel %vm2431_vm6, %v2539_v53, %v4347_v63  ;;  %v2536_v27 = vld [vmem:[#allocation3 + $0xc0] sm:$0xff] }
 0x43f   : > { %v4325_v60 = vpop.permute.xlu0 %4324  ;;  %3194 = vmatpush.xpose.msra.mxu3 %v3018_v32  ;;  %v4365_v32 = vpop.permute.xlu2 %4364 }
 0x440   : > { %v4327_v56 = vunpack.i.h.bf16 %v4325_v60  ;;  %v4326_v62 = vunpack.i.l.bf16 %v4325_v60 }
 0x442   : > { %v2752_v40 = vsel %vm2431_vm6, %v2527_v37, %v4326_v62  ;;  %v2766_v34 = vsel %vm2431_vm6, %v6377_v20, %v4327_v56  ;;  %3195 = vmatmul.f32.vlgmr.msra.gmra.mxu3 %v6455_v2  ;;  %v6589_v2 = vpop.permute.xlu1 %4359  ;;  %v2524_v62 = vld [vmem:[#allocation3 + $0x30] sm:$0xff]  ;;  %v2538_v37 = vld [vmem:[#allocation3 + $0xd8] sm:$0xff] }
 0x443   : > { %4059 = vmatpush.xpose.msk.msrb.mxu3 %vm2431_vm6, %v2873_v36  ;;  %3330 = vmatpush.xpose.msrb.mxu0 %v2752_v40  ;;  %v6597_v36 = vld.sshfl [vmem:[#allocation1 + $0x8] sm:$0xff pattern:$0x75316420] }
 0x444   : > { %3372 = vmatpush.xpose.msrb.mxu2 %v2766_v34  ;;  %4092 = vmatmul.msk.f32.vlgmr.msrb.gmra.mxu1 %vm2431_vm6, %v6597_v36  ;;  %v2537_v34 = vld [vmem:[#allocation3 + $0xc8] sm:$0xff] }
 0x447   : > { %4060 = vmatpush.xpose.msk.msrb.mxu3 %vm2431_vm6, %v2872_v46  ;;  %v6585_v48 = vpop.permute.xlu0 %4339  ;;  %3331 = vmatpush.xpose.msrb.mxu0 %v2751_v54  ;;  %v4366_v46 = vunpack.i.l.bf16 %v4365_v32  ;;  %v4291_v54 = vunpack.i.l.bf16 %v6504_v52 }
 0x448   : > { %3373 = vmatpush.xpose.msrb.mxu2 %v2765_v58 }
 0x44a   : > { %v4375_v40 = vpop.permute.xlu1 %4374 }
 0x44b   : > { %4061 = vmatpush.xpose.msk.msrb.mxu3 %vm2431_vm6, %v6277_v8  ;;  %3332 = vmatpush.xpose.msrb.mxu0 %v2750_v31  ;;  %v4110_v8 = vld [vmem:[%s6787_s4 + $0x10] sm:$0x77]  ;;  %v4377_v26 = vunpack.i.h.bf16 %v4375_v40  ;;  %v4376_v63 = vunpack.i.l.bf16 %v4375_v40  ;;  %v4302_v31 = vunpack.i.h.bf16 %v6506_v50 }
 0x44c   : > { %3374 = vmatpush.xpose.msrb.mxu2 %v2764_v49  ;;  %3661 = vst [vmem:[#allocation1] ss:$2 sm:$0xff] %v4110_v8  ;;  %v2521_v49 = vld [vmem:[#allocation3 + $0x8] sm:$0xff] }
 0x44d   : > { %v2761_v53 = vsel %vm2431_vm6, %v2536_v27, %v4377_v26  ;;  %v3656_v50 = vsel %vm2431_vm6, %v6366_v3, %v4302_v31  ;;  %v4267_v3 = vunpack.i.h.bf16 %v6537_v4  ;;  %v2860_v26 = vld [vmem:[#allocation3 + $0x109] sm:$0xff]  ;;  %v4332_v27 = vunpack.i.h.bf16 %v6558_v11 }
 0x44f   : > { %4062 = vmatpush.xpose.msk.msrb.mxu3 %vm2431_vm6, %v6275_v43  ;;  %v4355_v18 = vpop.permute.xlu0 %4354  ;;  %v4367_v43 = vunpack.i.h.bf16 %v4365_v32  ;;  %v4256_v32 = vunpack.i.l.bf16 %v6477_v41 }
 0x450   : > { %v4357_v60 = vunpack.i.h.bf16 %v4355_v18  ;;  %v4356_v56 = vunpack.i.l.bf16 %v4355_v18 }
 0x451   : > { %v2762_v7 = vsel %vm2431_vm6, %v2537_v34, %v4367_v43  ;;  %v4281_v43 = vunpack.i.l.bf16 %v6493_v45  ;;  %v4311_v34 = vunpack.i.l.bf16 %v6564_v47 }
 0x452   : > { %v2749_v0 = vsel %vm2431_vm6, %v2524_v62, %v4356_v56  ;;  %v2763_v23 = vsel %vm2431_vm6, %v2538_v37, %v4357_v60  ;;  %v6628_v52 = vpop.permute.xlu1 %4389  ;;  %v2520_v60 = vld [vmem:[#allocation3] sm:$0xff]  ;;  %v3417_v56 = vld [vmem:[#allocation3 + $0xb2] sm:$0xff]  ;;  %v4266_v62 = vunpack.i.l.bf16 %v6537_v4 }
 0x453   : > { %4063 = vmatpush.xpose.msk.msrb.mxu3 %vm2431_vm6, %v6238_v38  ;;  %3333 = vmatpush.xpose.msrb.mxu0 %v2749_v0  ;;  %v2748_v38 = vsel %vm2431_vm6, %v6460_v1, %v4366_v46  ;;  %v3657_v1 = vsel %vm2431_vm6, %v6271_v24, %v4291_v54  ;;  %v4392_v24 = vunpack.i.h.bf16 %v6628_v52  ;;  %v3641_v37 = vsel %vm2431_vm6, %v3417_v56, %v4256_v32  ;;  %v3415_v0 = vld [vmem:[#allocation3 + $0x9a] sm:$0xff]  ;;  %v6874_v32 = vld [vmem:[#allocation7_spill] sm:$0xff] }
 0x454   : > { %3375 = vmatpush.xpose.msrb.mxu2 %v2763_v23  ;;  %v4297_v46 = vunpack.i.h.bf16 %v6522_v57  ;;  %v2861_v23 = vld [vmem:[#allocation3 + $0x111] sm:$0xff]  ;;  %v4321_v54 = vunpack.i.l.bf16 %v6550_v30 }
 0x456   : > { %v3652_v40 = vsel %vm2431_vm6, %v6347_v29, %v4297_v46 }
 0x457   : > { %4064 = vmatpush.xpose.msk.msrb.mxu3 %vm2431_vm6, %v6236_v21  ;;  %v6614_v58 = vpop.permute.xlu0 %4369  ;;  %3334 = vmatpush.xpose.msrb.mxu0 %v2748_v38  ;;  %v2747_v21 = vsel %vm2431_vm6, %v6423_v55, %v4376_v63 }
 0x458   : > { %3376 = vmatpush.xpose.msrb.mxu2 %v2762_v7  ;;  %v3413_v7 = vld [vmem:[#allocation3 + $0x82] sm:$0xff] }
 0x459   : > { %v3637_v29 = vsel %vm2431_vm6, %v3413_v7, %v4311_v34  ;;  %v6877_v34 = vld [vmem:[#allocation23_spill] sm:$0xff] }
 0x45b   : > { %4065 = vmatpush.xpose.msk.msrb.mxu3 %vm2431_vm6, %v6871_v15  ;;  %3335 = vmatpush.xpose.msrb.mxu0 %v2747_v21  ;;  %v4257_v15 = vunpack.i.h.bf16 %v6477_v41  ;;  %v4282_v41 = vunpack.i.h.bf16 %v6493_v45  ;;  %v4312_v45 = vunpack.i.h.bf16 %v6564_v47  ;;  %v3412_v21 = vld [vmem:[#allocation3 + $0x7a] sm:$0xff] }
 0x45c   : > { %3377 = vmatpush.xpose.msrb.mxu2 %v2761_v53  ;;  %v2616_v53 = vld [vmem:[#allocation3 + $0x1a0] sm:$0xff]  ;;  %v3636_v31 = vsel %vm2431_vm6, %v3412_v21, %v4321_v54 }
 0x45d   : > { %v3655_v18 = vsel %vm2431_vm6, %v6290_v59, %v4257_v15  ;;  %v3654_v59 = vsel %vm2431_vm6, %v6326_v42, %v4267_v3  ;;  %v4296_v42 = vunpack.i.l.bf16 %v6522_v57  ;;  %v4322_v57 = vunpack.i.h.bf16 %v6550_v30  ;;  %v2615_v15 = vld [vmem:[#allocation3 + $0x198] sm:$0xff]  ;;  %v4380_v3 = vpop.permute.xlu2 %4379 }
 0x45e   : > { %v3651_v38 = vsel %vm2431_vm6, %v6362_v16, %v4312_v45  ;;  %v4331_v16 = vunpack.i.l.bf16 %v6558_v11  ;;  %v4342_v30 = vunpack.i.h.bf16 %v6585_v48  ;;  %v4382_v46 = vunpack.i.h.bf16 %v4380_v3  ;;  %v3420_v45 = vld [vmem:[#allocation3 + $0xda] sm:$0xff] }
 0x45f   : > { %4066 = vmatpush.xpose.msk.msrb.mxu3 %vm2431_vm6, %v6872_v25  ;;  %3378 = vmatmul.f32.vlgmr.msrb.gmra.mxu2 %v6593_v12  ;;  %v6630_v55 = vpop.permute.xlu0 %4384  ;;  %v3650_v47 = vsel %vm2431_vm6, %v6421_v13, %v4322_v57 }
 0x460   : > { %3803 = vmatpush.xpose.msra.mxu2 %v3657_v1  ;;  %v4386_v8 = vunpack.i.l.bf16 %v6630_v55  ;;  %v3411_v1 = vld [vmem:[#allocation3 + $0x6a] sm:$0xff] }
 0x461   : > { %v3635_v11 = vsel %vm2431_vm6, %v3411_v1, %v4331_v16 }
 0x462   : > { %v2746_v25 = vsel %vm2431_vm6, %v2521_v49, %v4386_v8  ;;  %v4352_v49 = vunpack.i.h.bf16 %v6580_v10 }
 0x463   : > { %4067 = vmatpush.xpose.msk.msrb.mxu3 %vm2431_vm6, %v6292_v61  ;;  %3336 = vmatpush.xpose.msrb.mxu0 %v2746_v25  ;;  %v2745_v61 = vsel %vm2431_vm6, %v2520_v60, %v4392_v24  ;;  %v4351_v24 = vunpack.i.l.bf16 %v6580_v10  ;;  %v3409_v60 = vld [vmem:[#allocation3 + $0x52] sm:$0xff]  ;;  %v4372_v10 = vunpack.i.h.bf16 %v6614_v58 }
 0x464   : > { %3804 = vmatpush.xpose.msra.mxu2 %v3656_v50  ;;  %v4341_v50 = vunpack.i.l.bf16 %v6585_v48  ;;  %v4362_v48 = vunpack.i.h.bf16 %v6589_v2 }
 0x465   : > { %v3633_v56 = vsel %vm2431_vm6, %v3409_v60, %v4351_v24  ;;  %v3496_v24 = vld [vmem:[#allocation3 + $0x19a] sm:$0xff]  ;;  %v3484_v60 = vld [vmem:[#allocation3 + $0x10a] sm:$0xff] }
 0x467   : > { %4068 = vmatpush.xpose.msk.msrb.mxu3 %vm2431_vm6, %v6296_v9  ;;  %3337 = vmatpush.xpose.msrb.mxu0 %v2745_v61  ;;  %v3416_v9 = vld [vmem:[#allocation3 + $0xaa] sm:$0xff]  ;;  %v4361_v61 = vunpack.i.l.bf16 %v6589_v2  ;;  %v4371_v2 = vunpack.i.l.bf16 %v6614_v58  ;;  %v3644_v58 = vsel %vm2431_vm6, %v3420_v45, %v4382_v46 }
 0x468   : > { %3805 = vmatpush.xpose.msra.mxu2 %v3655_v18  ;;  %v3640_v4 = vsel %vm2431_vm6, %v3416_v9, %v4266_v62  ;;  %v2614_v18 = vld [vmem:[#allocation3 + $0x188] sm:$0xff]  ;;  %v6704_v62 = vld.sshfl [vmem:[#allocation1 + $0x8] sm:$0xff pattern:$0x75316420] }
 0x469   : > { %4127 = vmatmul.msk.f32.vlgmr.msra.gmra.mxu1 %vm2431_vm6, %v6704_v62  ;;  %v3408_v9 = vld [vmem:[#allocation3 + $0x4a] sm:$0xff] }
 0x46a   : > { %3338 = vmatmul.f32.vlgmr.msrb.gmra.mxu0 %v6593_v12  ;;  %v3639_v12 = vsel %vm2431_vm6, %v3415_v0, %v4281_v43  ;;  %v3632_v43 = vsel %vm2431_vm6, %v3408_v9, %v4361_v61  ;;  %v6876_v0 = vld [vmem:[#allocation6_spill] sm:$0xff] }
 0x46b   : > { %4069 = vmatpush.xpose.msk.msrb.mxu3 %vm2431_vm6, %v6250_v17  ;;  %3763 = vmatpush.xpose.msra.mxu0 %v3641_v37  ;;  %v3653_v17 = vsel %vm2431_vm6, %v6394_v6, %v4282_v41  ;;  %v6875_v37 = vld [vmem:[#allocation10_spill] sm:$0xff] }
 0x46c   : > { %3806 = vmatpush.xpose.msra.mxu2 %v3654_v59  ;;  %v3646_v41 = vsel %vm2431_vm6, %v6875_v37, %v4362_v48  ;;  %v2613_v59 = vld [vmem:[#allocation3 + $0x180] sm:$0xff]  ;;  %v3490_v48 = vld [vmem:[#allocation3 + $0x152] sm:$0xff] }
 0x46f   : > { %4070 = vmatpush.xpose.msk.msrb.mxu3 %vm2431_vm6, %v6252_v14  ;;  %3764 = vmatpush.xpose.msra.mxu0 %v3640_v4  ;;  %v3414_v14 = vld [vmem:[#allocation3 + $0x92] sm:$0xff]  ;;  %v3421_v4 = vld [vmem:[#allocation3 + $0xe2] sm:$0xff] }
 0x470   : > { %3807 = vmatpush.xpose.msra.mxu2 %v3653_v17  ;;  %v3638_v63 = vsel %vm2431_vm6, %v3414_v14, %v4296_v42  ;;  %v3645_v17 = vsel %vm2431_vm6, %v3421_v4, %v4372_v10  ;;  %v3407_v42 = vld [vmem:[#allocation3 + $0x3a] sm:$0xff]  ;;  %v4395_v14 = vpop.permute.xlu2 %4394 }
 0x471   : > { %v4397_v7 = vunpack.i.h.bf16 %v4395_v14 }
 0x473   : > { %4071 = vmatpush.xpose.msk.msrb.mxu3 %vm2431_vm6, %v2861_v23  ;;  %3765 = vmatpush.xpose.msra.mxu0 %v3639_v12  ;;  %v4381_v23 = vunpack.i.l.bf16 %v4380_v3  ;;  %v3631_v12 = vsel %vm2431_vm6, %v3407_v42, %v4371_v2 }
 0x474   : > { %3808 = vmatpush.xpose.msra.mxu2 %v3652_v40  ;;  %v4391_v40 = vunpack.i.l.bf16 %v6628_v52  ;;  %v4396_v52 = vunpack.i.l.bf16 %v4395_v14 }
 0x477   : > { %4072 = vmatpush.xpose.msk.msrb.mxu3 %vm2431_vm6, %v2860_v26  ;;  %3766 = vmatpush.xpose.msra.mxu0 %v3638_v63  ;;  %v3406_v26 = vld [vmem:[#allocation3 + $0x32] sm:$0xff]  ;;  %v4387_v63 = vunpack.i.h.bf16 %v6630_v55 }
 0x478   : > { %3809 = vmatpush.xpose.msra.mxu2 %v3651_v38  ;;  %v3630_v57 = vsel %vm2431_vm6, %v3406_v26, %v4381_v23  ;;  %v3419_v38 = vld [vmem:[#allocation3 + $0xca] sm:$0xff] }
 0x479   : > { %v3643_v54 = vsel %vm2431_vm6, %v3419_v38, %v4391_v40  ;;  %v2609_v55 = vld [vmem:[#allocation3 + $0x150] sm:$0xff] }
 0x47b   : > { %4073 = vmatpush.xpose.msk.msrb.mxu3 %vm2431_vm6, %v6309_v33  ;;  %3767 = vmatpush.xpose.msra.mxu0 %v3637_v29  ;;  %v3649_v33 = vsel %vm2431_vm6, %v6379_v5, %v4332_v27  ;;  %v3410_v5 = vld [vmem:[#allocation3 + $0x62] sm:$0xff]  ;;  %v6878_v29 = vld [vmem:[#allocation13_spill] sm:$0xff] }
 0x47c   : > { %3810 = vmatpush.xpose.msra.mxu2 %v3650_v47  ;;  %v3634_v25 = vsel %vm2431_vm6, %v3410_v5, %v4341_v50  ;;  %v3629_v27 = vsel %vm2431_vm6, %v6878_v29, %v4387_v63  ;;  %v3418_v47 = vld [vmem:[#allocation3 + $0xc2] sm:$0xff] }
 0x47d   : > { %v3642_v21 = vsel %vm2431_vm6, %v3418_v47, %v4397_v7  ;;  %v3402_v50 = vld [vmem:[#allocation3 + $0x2] sm:$0xff] }
 0x47e   : > { %v3497_v5 = vld [vmem:[#allocation3 + $0x1a2] sm:$0xff] }
 0x47f   : > { %4074 = vmatpush.xpose.msk.msrb.mxu3 %vm2431_vm6, %v6314_v51  ;;  %3768 = vmatpush.xpose.msra.mxu0 %v3636_v31  ;;  %v6873_v51 = vld [vmem:[#allocation26_spill] sm:$0xff]  ;;  %v3662_v31 = vld.sshfl [vmem:[#allocation1] sm:$0xff pattern:$0x75316420] }
 0x480   : > { %3811 = vmatpush.xpose.msra.mxu2 %v3649_v33  ;;  %v3648_v8 = vsel %vm2431_vm6, %v6873_v51, %v4342_v30  ;;  %v3533_v30 = vpop.permute.xlu0 %3532  ;;  %v2608_v33 = vld [vmem:[#allocation3 + $0x140] sm:$0xff] }
 0x481   : > { %v2605_v51 = vld [vmem:[#allocation3 + $0x120] sm:$0xff] }
 0x482   : > { %4075 = vmatmul.msk.f32.vlgmr.msrb.gmra.mxu3 %vm2431_vm6, %v6479_v39  ;;  %v3647_v39 = vsel %vm2431_vm6, %v6874_v32, %v4352_v49  ;;  %v2606_v49 = vld [vmem:[#allocation3 + $0x128] sm:$0xff] }
 0x483   : > { %4093 = vmatpush.xpose.msk.msra.mxu3 %vm2431_vm6, %v2616_v53  ;;  %3769 = vmatpush.xpose.msra.mxu0 %v3635_v11  ;;  %v6879_v53 = vld [vmem:[#allocation14_spill] sm:$0xff] }
 0x484   : > { %3812 = vmatpush.xpose.msra.mxu2 %v3648_v8  ;;  %v3628_v16 = vsel %vm2431_vm6, %v6879_v53, %v4396_v52  ;;  %v4435_v8 = vmov 0  }
 0x485   : > { %4398 = vset.pattern.permute.xlu2 %v4435_v8  ;;  %4399 = vset.pattern.permute.xlu0 %v4435_v8 }
 0x487   : > { %4094 = vmatpush.xpose.msk.msra.mxu3 %vm2431_vm6, %v2615_v15  ;;  %3770 = vmatpush.xpose.msra.mxu0 %v3634_v25  ;;  %v3531_v15 = vpop.permute.xlu1 %3530  ;;  %v3494_v25 = vld [vmem:[#allocation3 + $0x182] sm:$0xff] }
 0x488   : > { %3813 = vmatpush.xpose.msra.mxu2 %v3647_v39  ;;  %v3626_v11 = vsel %vm2431_vm6, %v3402_v50, %v3531_v15  ;;  %v3487_v39 = vld [vmem:[#allocation3 + $0x12a] sm:$0xff] }
 0x48b   : > { %4095 = vmatpush.xpose.msk.msra.mxu3 %vm2431_vm6, %v2614_v18  ;;  %3771 = vmatpush.xpose.msra.mxu0 %v3633_v56  ;;  %v3485_v18 = vld [vmem:[#allocation3 + $0x112] sm:$0xff] }
 0x48c   : > { %3814 = vmatpush.xpose.msra.mxu2 %v3646_v41 }
 0x48f   : > { %4096 = vmatpush.xpose.msk.msra.mxu3 %vm2431_vm6, %v2613_v59  ;;  %3772 = vmatpush.xpose.msra.mxu0 %v3632_v43 }
 0x490   : > { %3815 = vmatpush.xpose.msra.mxu2 %v3645_v17 }
 0x493   : > { %4097 = vmatpush.xpose.msk.msra.mxu3 %vm2431_vm6, %v6876_v0  ;;  %3773 = vmatpush.xpose.msra.mxu0 %v3631_v12 }
 0x494   : > { %3816 = vmatpush.xpose.msra.mxu2 %v3644_v58 }
 0x497   : > { %4098 = vmatpush.xpose.msk.msra.mxu3 %vm2431_vm6, %v6877_v34  ;;  %3774 = vmatpush.xpose.msra.mxu0 %v3630_v57 }
 0x498   : > { %3817 = vmatpush.xpose.msra.mxu2 %v3643_v54 }
 0x49b   : > { %4099 = vmatpush.xpose.msk.msra.mxu3 %vm2431_vm6, %v6349_v35  ;;  %3775 = vmatpush.xpose.msra.mxu0 %v3629_v27  ;;  %v3403_v35 = vld [vmem:[#allocation3 + $0xa] sm:$0xff] }
 0x49c   : > { %3818 = vmatpush.xpose.msra.mxu2 %v3642_v21  ;;  %v3627_v1 = vsel %vm2431_vm6, %v3403_v35, %v3533_v30 }
 0x49f   : > { %4100 = vmatpush.xpose.msk.msra.mxu3 %vm2431_vm6, %v2609_v55  ;;  %3776 = vmatpush.xpose.msra.mxu0 %v3628_v16 }
 0x4a0   : > { %3819 = vmatmul.f32.vlgmr.msra.gmra.mxu2 %v3662_v31 }
 0x4a3   : > { %4101 = vmatpush.xpose.msk.msra.mxu3 %vm2431_vm6, %v2608_v33  ;;  %3777 = vmatpush.xpose.msra.mxu0 %v3627_v1 }
 0x4a7   : > { %4102 = vmatpush.xpose.msk.msra.mxu3 %vm2431_vm6, %v6381_v44  ;;  %3778 = vmatpush.xpose.msra.mxu0 %v3626_v11  ;;  %v3845_v44 = vld [vmem:[%s6788_s5] sm:$0x7] }
 0x4a8   : > { %3848 = vperm.xlu2 %4398, %v3845_v44  }
 0x4aa   : > { %3779 = vmatmul.f32.vlgmr.msra.gmra.mxu0 %v3662_v31 }
 0x4ab   : > { %4103 = vmatpush.xpose.msk.msra.mxu3 %vm2431_vm6, %v2606_v49 }
 0x4af   : > { %4104 = vmatpush.xpose.msk.msra.mxu3 %vm2431_vm6, %v2605_v51 }
 0x4b3   : > { %4105 = vmatpush.xpose.msk.msra.mxu3 %vm2431_vm6, %v6406_v19  ;;  %v3495_v19 = vld [vmem:[#allocation3 + $0x18a] sm:$0xff] }
 0x4b7   : > { %4106 = vmatpush.xpose.msk.msra.mxu3 %vm2431_vm6, %v6364_v22  ;;  %v3493_v22 = vld [vmem:[#allocation3 + $0x172] sm:$0xff] }
 0x4bb   : > { %4107 = vmatpush.xpose.msk.msra.mxu3 %vm2431_vm6, %v6377_v20  ;;  %v3492_v20 = vld [vmem:[#allocation3 + $0x16a] sm:$0xff] }
 0x4bf   : > { %4108 = vmatpush.xpose.msk.msra.mxu3 %vm2431_vm6, %v6436_v28  ;;  %v3491_v28 = vld [vmem:[#allocation3 + $0x15a] sm:$0xff] }
 0x4c1   : > { %v3359_v10 = vpop.f32.mrf.mxu1 }
 0x4c2   : > { %4109 = vmatmul.msk.f32.vlgmr.msra.gmra.mxu3 %vm2431_vm6, %v6597_v36  ;;  %v3488_v36 = vld [vmem:[#allocation3 + $0x13a] sm:$0xff] }
 0x4c3   : > { %4128 = vmatpush.xpose.msk.msrb.mxu3 %vm2431_vm6, %v3497_v5 }
 0x4c7   : > { %4129 = vmatpush.xpose.msk.msrb.mxu3 %vm2431_vm6, %v3496_v24 }
 0x4cb   : > { %4130 = vmatpush.xpose.msk.msrb.mxu3 %vm2431_vm6, %v3495_v19 }
 0x4cf   : > { %4131 = vmatpush.xpose.msk.msrb.mxu3 %vm2431_vm6, %v3494_v25 }
 0x4d3   : > { %4132 = vmatpush.xpose.msk.msrb.mxu3 %vm2431_vm6, %v3493_v22 }
 0x4d7   : > { %4133 = vmatpush.xpose.msk.msrb.mxu3 %vm2431_vm6, %v3492_v20 }
 0x4db   : > { %4134 = vmatpush.xpose.msk.msrb.mxu3 %vm2431_vm6, %v3491_v28 }
 0x4df   : > { %4135 = vmatpush.xpose.msk.msrb.mxu3 %vm2431_vm6, %v3490_v48 }
 0x4e2   : > { %v3379_v41 = vpop.f32.mrf.mxu2 }
 0x4e3   : > { %4136 = vmatpush.xpose.msk.msrb.mxu3 %vm2431_vm6, %v6394_v6  ;;  %v3156_v6 = vpop.f32.mrf.mxu3 }
 0x4e6   : > { %v3800_v4 = vpop.f32.mrf.mxu1 }
 0x4e7   : > { %4137 = vmatpush.xpose.msk.msrb.mxu3 %vm2431_vm6, %v3488_v36 }
 0x4eb   : > { %4138 = vmatpush.xpose.msk.msrb.mxu3 %vm2431_vm6, %v3487_v39  ;;  %v3176_v3 = vpop.f32.mrf.mxu3 }
 0x4ec   : > { %v3177_v9 = vadd.f32 %v3176_v3, %v3156_v6 }
 0x4ef   : > { %4139 = vmatpush.xpose.msk.msrb.mxu3 %vm2431_vm6, %v6421_v13  ;;  %v3339_v13 = vpop.f32.mrf.mxu0 }
 0x4f3   : > { %4140 = vmatpush.xpose.msk.msrb.mxu3 %vm2431_vm6, %v3485_v18  ;;  %v3196_v61 = vpop.f32.mrf.mxu3 }
 0x4f7   : > { %4141 = vmatpush.xpose.msk.msrb.mxu3 %vm2431_vm6, %v3484_v60 }
 0x4fb   : > { %4142 = vmatpush.xpose.msk.msrb.mxu3 %vm2431_vm6, %v6874_v32  ;;  %v3340_v32 = vadd.f32 %v3339_v13, %v3177_v9 }
 0x4fd   : > { %v3360_v42 = vadd.f32 %v3359_v10, %v3340_v32 }
 0x4ff   : > { %4143 = vmatpush.xpose.msk.msrb.mxu3 %vm2431_vm6, %v6875_v37 }
 0x502   : > { %4144 = vmatmul.msk.f32.vlgmr.msrb.gmra.mxu3 %vm2431_vm6, %v6704_v62  ;;  %v3849_v40 = vpop.permute.xlu2 %3848 }
 0x505   : > { %v3216_v56 = vpop.f32.mrf.mxu3 }
 0x506   : > { %v3217_v2 = vadd.f32 %v3216_v56, %v3196_v61 }
 0x508   : > { %v3380_v17 = vadd.f32 %v3379_v41, %v3217_v2 }
 0x523   : > { %v3820_v46 = vpop.f32.mrf.mxu2 }
 0x527   : > { %v3780_v43 = vpop.f32.mrf.mxu0 }
 0x528   : > { %v3801_v37 = vadd.f32 %v3800_v4, %v3780_v43 }
 0x52a   : > { %v3843_v12 = vadd.f32 %v3801_v37, %v3360_v42 }
 0x52c   : > { %v3851_v14 = vadd.f32 %v3849_v40, %v3843_v12 }
 0x545   : > { %v3399_v59 = vpop.f32.mrf.mxu3 }
 0x546   : > { %v3400_v62 = vadd.f32 %v3399_v59, %v3380_v17 }
 0x585   : > { %v3840_v0 = vpop.f32.mrf.mxu3 }
 0x586   : > { %v3841_v23 = vadd.f32 %v3840_v0, %v3820_v46 }
 0x588   : > { %v3844_v45 = vadd.f32 %v3841_v23, %v3400_v62 }
 0x58a   : > { %v3852_v58 = vadd.f32 %v3849_v40, %v3844_v45 }
 0x58c   : > { %v3855_v34 = vrot.slane %v3852_v58, 4 }
 0x58e   : > { %v3856_v26 = vsel %vm1368_vm3, %v3851_v14, %v3855_v34 }
 0x58f   : > { %3858 = vst [vmem:[%s265_s13] sm:$0x77] %v3856_v26 }
 0x590 PF: > { %s16_s21 = sadd.s32 1, %s4428_s21  }
 0x591   : > { %p13_p4 = scmp.ge.s32.totalorder %s16_s21, 4  }
 0x593   :  { %15 = sbr.rel (!%p13_p4) target bundleno = 1 (0x1), region = 85 }

</bundles_post_ra>
